<compile_context>
chip_gen: v7x
topology: tpu7x:2x2x1
jax: 0.10.0
libtpu: 0.0.40
codegen_flags: <defaults>
</compile_context>

<pallas_src>
import functools

import jax
import jax.numpy as jnp
from jax.experimental import pallas as pl
from jax.experimental.pallas import tpu as pltpu

# Logical dims from the PyTorch module and their lane-padded versions.
DIMS = (1280, 960, 400, 100, 20, 2)
PADDED = (1280, 1024, 512, 128, 128, 128)


def _round_up(n, m):
    return ((n + m - 1) // m) * m


def _cdiv(a, b):
    return -(-a // b)


def _vmem_limit_bytes():
    # v5e/v6e: 128 MiB physical -> 96 MiB; v7x: 64 MiB physical -> 48 MiB.
    try:
        cap = int(pltpu.get_tpu_info().vmem_capacity_bytes)
        return min((cap * 3) // 4, 96 << 20)
    except Exception:
        return 48 << 20  # v7x-safe fallback


def _invariant_spec(shape):
    # Block-invariant (constant index_map) tiles are DMA'd once; single-buffer
    # them to save VMEM.  Fall back to the default spec on older jax versions.
    try:
        return pl.BlockSpec(shape, lambda i: (0, 0), pipeline_mode=pl.Buffered(1))
    except Exception:
        return pl.BlockSpec(shape, lambda i: (0, 0))


def _choose_tile(B, tile_b):
    """Pick (tile_rows, padded_batch, n_tiles).

    - tile rows are always a multiple of 16 (bf16 (16,128) tiling rule),
    - tiles divide the 16-rounded batch as evenly as possible (minimal padding),
    - >=2 grid steps whenever the batch can be split, so the "parallel" batch
      axis shards across both v7x TensorCores.
    """
    tile_b = max(16, _round_up(tile_b, 16))
    B16 = _round_up(max(B, 1), 16)
    n = _cdiv(B16, tile_b)
    if n == 1 and B16 >= 32:
        n = 2
    tb = _round_up(_cdiv(B16, n), 16)
    n = _cdiv(B16, tb)
    return tb, tb * n, n


def mlp_kernel(x_ref,
               w1_ref, b1_ref,
               w2_ref, b2_ref,
               w3_ref, b3_ref,
               w4_ref, b4_ref,
               w5_ref, b5_ref,
               o_ref):
    # f32 input cast to bf16 in-kernel (hidden under layer-1 MXU time);
    # bf16 MXU inputs, f32 accumulation, bias + ReLU on the f32 accumulator.
    x = x_ref[...].astype(jnp.bfloat16)
    h = jnp.dot(x, w1_ref[...], preferred_element_type=jnp.float32) + b1_ref[...]
    h = jnp.maximum(h, 0.0).astype(jnp.bfloat16)
    h = jnp.dot(h, w2_ref[...], preferred_element_type=jnp.float32) + b2_ref[...]
    h = jnp.maximum(h, 0.0).astype(jnp.bfloat16)
    h = jnp.dot(h, w3_ref[...], preferred_element_type=jnp.float32) + b3_ref[...]
    h = jnp.maximum(h, 0.0).astype(jnp.bfloat16)
    h = jnp.dot(h, w4_ref[...], preferred_element_type=jnp.float32) + b4_ref[...]
    h = jnp.maximum(h, 0.0).astype(jnp.bfloat16)
    h = jnp.dot(h, w5_ref[...], preferred_element_type=jnp.float32) + b5_ref[...]
    o_ref[...] = h.astype(o_ref.dtype)


def prepare_params(params):
    """One-time weight prep (hoisted out of the per-call path).

    params: list of (W, b) with W (in, out) f32, b (1, out) f32.
    Returns list of (W_padded bf16, b_padded f32).
    """
    prepped = []
    for li, (w, b) in enumerate(params):
        assert w.shape == (DIMS[li], DIMS[li + 1])
        wp = jnp.pad(
            w, ((0, PADDED[li] - DIMS[li]), (0, PADDED[li + 1] - DIMS[li + 1]))
        ).astype(jnp.bfloat16)
        bp = jnp.pad(
            b.reshape(1, -1), ((0, 0), (0, PADDED[li + 1] - DIMS[li + 1]))
        ).astype(jnp.float32)
        prepped.append((wp, bp))
    return prepped


@functools.partial(jax.jit, static_argnames=("tile_b",))
def mlp_esm650(x, prepped_params, *, tile_b=1024):
    """x: [B, 1280] float32.  prepped_params: output of prepare_params()."""
    B, D_in = x.shape
    assert D_in == DIMS[0]

    tb, Bp, n_tiles = _choose_tile(B, tile_b)
    xp = x if Bp == B else jnp.pad(x, ((0, Bp - B), (0, 0)))

    flat = []
    in_specs = [pl.BlockSpec((tb, PADDED[0]), lambda i: (i, 0))]
    for li, (wp, bp) in enumerate(prepped_params):
        assert wp.shape == (PADDED[li], PADDED[li + 1])
        flat.append(wp)
        flat.append(bp)
        in_specs.append(_invariant_spec(wp.shape))
        in_specs.append(_invariant_spec(bp.shape))

    out_padded = pl.pallas_call(
        mlp_kernel,
        out_shape=jax.ShapeDtypeStruct((Bp, PADDED[-1]), jnp.float32),
        grid_spec=pltpu.PrefetchScalarGridSpec(
            num_scalar_prefetch=0,
            grid=(n_tiles,),
            in_specs=in_specs,
            out_specs=pl.BlockSpec((tb, PADDED[-1]), lambda i: (i, 0)),
        ),
        compiler_params=pltpu.CompilerParams(
            dimension_semantics=("parallel",),
            vmem_limit_bytes=_vmem_limit_bytes(),
        ),
    )(xp, *flat)

    # Strip batch padding and the lane padding of the 2-wide output.
    return out_padded[:B, :DIMS[-1]]


def init_params(key):
    """Deterministic init mimicking PyTorch nn.Linear default (uniform +/- 1/sqrt(fan_in))."""
    params = []
    for i in range(len(DIMS) - 1):
        fan_in, fan_out = DIMS[i], DIMS[i + 1]
        key, kw, kb = jax.random.split(key, 3)
        bound = 1.0 / jnp.sqrt(fan_in)
        # stored as (in, out) so the kernel does x @ W
        w = jax.random.uniform(kw, (fan_in, fan_out), jnp.float32, -bound, bound)
        b = jax.random.uniform(kb, (1, fan_out), jnp.float32, -bound, bound)
        params.append((w, b))
    return params


def mlp_ref_f32(x, params):
    h = x
    for i, (w, b) in enumerate(params):
        h = h @ w + b
        if i < len(params) - 1:
            h = jnp.maximum(h, 0.0)
    return h


def mlp_ref_bf16(x, params):
    """Reference matching the kernel's bf16 quantization (f32 accumulation)."""
    h = x.astype(jnp.bfloat16).astype(jnp.float32)
    for i, (w, b) in enumerate(params):
        wq = w.astype(jnp.bfloat16).astype(jnp.float32)
        h = h @ wq + b
        if i < len(params) - 1:
            h = jnp.maximum(h, 0.0).astype(jnp.bfloat16).astype(jnp.float32)
    return h


if __name__ == "__main__":
    key = jax.random.PRNGKey(0)
    kx, kp = jax.random.split(key)
    B = 8
    x = jax.random.normal(kx, (B, DIMS[0]), jnp.float32)
    params = init_params(kp)

    # One-time weight prep (pad + bf16 cast), then the fused Pallas forward.
    prepped = prepare_params(params)
    prepped = jax.block_until_ready(prepped)

    out = mlp_esm650(x, prepped)
    out = jax.block_until_ready(out)
    assert out.shape == (B, DIMS[-1])

    # Tight check vs. a bf16-quantization-matched reference (isolates kernel bugs).
    ref_q = mlp_ref_bf16(x, params)
    assert jnp.allclose(out, ref_q, atol=1e-2, rtol=1e-2), "mismatch vs bf16-matched reference"

    # Loose check vs. the pure-f32 PyTorch-equivalent reference (bf16 quantization error).
    ref_f32 = mlp_ref_f32(x, params)
    assert jnp.allclose(out, ref_f32, atol=8e-2, rtol=8e-2), "mismatch vs f32 reference"

    print("KERNEL_OK")
</pallas_src>

<mosaic_0001>
module attributes {stable_mosaic.version = 11 : i64} {
  func.func @mlp_kernel(%arg0: i32, %arg1: memref<16x1280xf32, #tpu.memory_space<vmem>>, %arg2: memref<1280x1024xbf16, #tpu.memory_space<vmem>>, %arg3: memref<1x1024xf32, #tpu.memory_space<vmem>>, %arg4: memref<1024x512xbf16, #tpu.memory_space<vmem>>, %arg5: memref<1x512xf32, #tpu.memory_space<vmem>>, %arg6: memref<512x128xbf16, #tpu.memory_space<vmem>>, %arg7: memref<1x128xf32, #tpu.memory_space<vmem>>, %arg8: memref<128x128xbf16, #tpu.memory_space<vmem>>, %arg9: memref<1x128xf32, #tpu.memory_space<vmem>>, %arg10: memref<128x128xbf16, #tpu.memory_space<vmem>>, %arg11: memref<1x128xf32, #tpu.memory_space<vmem>>, %arg12: memref<16x128xf32, #tpu.memory_space<vmem>>) attributes {dimension_semantics = [#tpu.dimension_semantics<parallel>], iteration_bounds = array<i64: 1>, scalar_prefetch = 0 : i64, scratch_operands = 0 : i64, tpu.core_type = #tpu.core_type<tc>, window_params = [{transform_indices = @transform_0, window_bounds = array<i64: 16, 1280>}, {pipeline_mode = #tpu.pipeline_mode<synchronous>, transform_indices = @transform_1, window_bounds = array<i64: 1280, 1024>}, {pipeline_mode = #tpu.pipeline_mode<synchronous>, transform_indices = @transform_2, window_bounds = array<i64: 1, 1024>}, {pipeline_mode = #tpu.pipeline_mode<synchronous>, transform_indices = @transform_3, window_bounds = array<i64: 1024, 512>}, {pipeline_mode = #tpu.pipeline_mode<synchronous>, transform_indices = @transform_4, window_bounds = array<i64: 1, 512>}, {pipeline_mode = #tpu.pipeline_mode<synchronous>, transform_indices = @transform_5, window_bounds = array<i64: 512, 128>}, {pipeline_mode = #tpu.pipeline_mode<synchronous>, transform_indices = @transform_6, window_bounds = array<i64: 1, 128>}, {pipeline_mode = #tpu.pipeline_mode<synchronous>, transform_indices = @transform_7, window_bounds = array<i64: 128, 128>}, {pipeline_mode = #tpu.pipeline_mode<synchronous>, transform_indices = @transform_8, window_bounds = array<i64: 1, 128>}, {pipeline_mode = #tpu.pipeline_mode<synchronous>, transform_indices = @transform_9, window_bounds = array<i64: 128, 128>}, {pipeline_mode = #tpu.pipeline_mode<synchronous>, transform_indices = @transform_10, window_bounds = array<i64: 1, 128>}, {transform_indices = @transform_11, window_bounds = array<i64: 16, 128>}]} {
    %c0 = arith.constant 0 : index
    %c0_0 = arith.constant 0 : index
    %0 = vector.load %arg1[%c0, %c0_0] : memref<16x1280xf32, #tpu.memory_space<vmem>>, vector<16x1280xf32>
    %1 = arith.truncf %0 : vector<16x1280xf32> to vector<16x1280xbf16>
    %c0_1 = arith.constant 0 : index
    %c0_2 = arith.constant 0 : index
    %2 = vector.load %arg2[%c0_1, %c0_2] : memref<1280x1024xbf16, #tpu.memory_space<vmem>>, vector<1280x1024xbf16>
    %cst = arith.constant dense<0.000000e+00> : vector<16x1024xf32>
    %3 = tpu.matmul %1, %2, %cst {dimension_numbers = #tpu.dot_dimension_numbers<[1], [0], [0], [1], [0, 0, 1, 1], [], []>} : vector<16x1280xbf16>, vector<1280x1024xbf16>, vector<16x1024xf32> -> vector<16x1024xf32>
    %c0_3 = arith.constant 0 : index
    %c0_4 = arith.constant 0 : index
    %4 = vector.load %arg3[%c0_3, %c0_4] : memref<1x1024xf32, #tpu.memory_space<vmem>>, vector<1x1024xf32>
    %5 = vector.broadcast %4 : vector<1x1024xf32> to vector<16x1024xf32>
    %6 = arith.addf %3, %5 : vector<16x1024xf32>
    %cst_5 = arith.constant 0.000000e+00 : f32
    %7 = vector.broadcast %cst_5 : f32 to vector<16x1024xf32>
    %8 = arith.maximumf %6, %7 : vector<16x1024xf32>
    %9 = arith.truncf %8 : vector<16x1024xf32> to vector<16x1024xbf16>
    %c0_6 = arith.constant 0 : index
    %c0_7 = arith.constant 0 : index
    %10 = vector.load %arg4[%c0_6, %c0_7] : memref<1024x512xbf16, #tpu.memory_space<vmem>>, vector<1024x512xbf16>
    %cst_8 = arith.constant dense<0.000000e+00> : vector<16x512xf32>
    %11 = tpu.matmul %9, %10, %cst_8 {dimension_numbers = #tpu.dot_dimension_numbers<[1], [0], [0], [1], [0, 0, 1, 1], [], []>} : vector<16x1024xbf16>, vector<1024x512xbf16>, vector<16x512xf32> -> vector<16x512xf32>
    %c0_9 = arith.constant 0 : index
    %c0_10 = arith.constant 0 : index
    %12 = vector.load %arg5[%c0_9, %c0_10] : memref<1x512xf32, #tpu.memory_space<vmem>>, vector<1x512xf32>
    %13 = vector.broadcast %12 : vector<1x512xf32> to vector<16x512xf32>
    %14 = arith.addf %11, %13 : vector<16x512xf32>
    %cst_11 = arith.constant 0.000000e+00 : f32
    %15 = vector.broadcast %cst_11 : f32 to vector<16x512xf32>
    %16 = arith.maximumf %14, %15 : vector<16x512xf32>
    %17 = arith.truncf %16 : vector<16x512xf32> to vector<16x512xbf16>
    %c0_12 = arith.constant 0 : index
    %c0_13 = arith.constant 0 : index
    %18 = vector.load %arg6[%c0_12, %c0_13] : memref<512x128xbf16, #tpu.memory_space<vmem>>, vector<512x128xbf16>
    %cst_14 = arith.constant dense<0.000000e+00> : vector<16x128xf32>
    %19 = tpu.matmul %17, %18, %cst_14 {dimension_numbers = #tpu.dot_dimension_numbers<[1], [0], [0], [1], [0, 0, 1, 1], [], []>} : vector<16x512xbf16>, vector<512x128xbf16>, vector<16x128xf32> -> vector<16x128xf32>
    %c0_15 = arith.constant 0 : index
    %c0_16 = arith.constant 0 : index
    %20 = vector.load %arg7[%c0_15, %c0_16] : memref<1x128xf32, #tpu.memory_space<vmem>>, vector<1x128xf32>
    %21 = vector.broadcast %20 : vector<1x128xf32> to vector<16x128xf32>
    %22 = arith.addf %19, %21 : vector<16x128xf32>
    %cst_17 = arith.constant 0.000000e+00 : f32
    %23 = vector.broadcast %cst_17 : f32 to vector<16x128xf32>
    %24 = arith.maximumf %22, %23 : vector<16x128xf32>
    %25 = arith.truncf %24 : vector<16x128xf32> to vector<16x128xbf16>
    %c0_18 = arith.constant 0 : index
    %c0_19 = arith.constant 0 : index
    %26 = vector.load %arg8[%c0_18, %c0_19] : memref<128x128xbf16, #tpu.memory_space<vmem>>, vector<128x128xbf16>
    %cst_20 = arith.constant dense<0.000000e+00> : vector<16x128xf32>
    %27 = tpu.matmul %25, %26, %cst_20 {dimension_numbers = #tpu.dot_dimension_numbers<[1], [0], [0], [1], [0, 0, 1, 1], [], []>} : vector<16x128xbf16>, vector<128x128xbf16>, vector<16x128xf32> -> vector<16x128xf32>
    %c0_21 = arith.constant 0 : index
    %c0_22 = arith.constant 0 : index
    %28 = vector.load %arg9[%c0_21, %c0_22] : memref<1x128xf32, #tpu.memory_space<vmem>>, vector<1x128xf32>
    %29 = vector.broadcast %28 : vector<1x128xf32> to vector<16x128xf32>
    %30 = arith.addf %27, %29 : vector<16x128xf32>
    %cst_23 = arith.constant 0.000000e+00 : f32
    %31 = vector.broadcast %cst_23 : f32 to vector<16x128xf32>
    %32 = arith.maximumf %30, %31 : vector<16x128xf32>
    %33 = arith.truncf %32 : vector<16x128xf32> to vector<16x128xbf16>
    %c0_24 = arith.constant 0 : index
    %c0_25 = arith.constant 0 : index
    %34 = vector.load %arg10[%c0_24, %c0_25] : memref<128x128xbf16, #tpu.memory_space<vmem>>, vector<128x128xbf16>
    %cst_26 = arith.constant dense<0.000000e+00> : vector<16x128xf32>
    %35 = tpu.matmul %33, %34, %cst_26 {dimension_numbers = #tpu.dot_dimension_numbers<[1], [0], [0], [1], [0, 0, 1, 1], [], []>} : vector<16x128xbf16>, vector<128x128xbf16>, vector<16x128xf32> -> vector<16x128xf32>
    %c0_27 = arith.constant 0 : index
    %c0_28 = arith.constant 0 : index
    %36 = vector.load %arg11[%c0_27, %c0_28] : memref<1x128xf32, #tpu.memory_space<vmem>>, vector<1x128xf32>
    %37 = vector.broadcast %36 : vector<1x128xf32> to vector<16x128xf32>
    %38 = arith.addf %35, %37 : vector<16x128xf32>
    %c0_29 = arith.constant 0 : index
    %c0_30 = arith.constant 0 : index
    %39 = vector.load %arg12[%c0_29, %c0_30] : memref<16x128xf32, #tpu.memory_space<vmem>>, vector<16x128xf32>
    tpu.vector_store %arg12[%c0_29, %c0_30], %38 {strides = array<i32>} : memref<16x128xf32, #tpu.memory_space<vmem>>, vector<16x128xf32>,
    return
  }
  func.func @transform_0(%arg0: i32) -> (i32, i32) {
    %c0_i32 = arith.constant 0 : i32
    %c0_i32_0 = arith.constant 0 : i32
    return %arg0, %c0_i32 : i32, i32
  }
  func.func @transform_1(%arg0: i32) -> (i32, i32) {
    %c0_i32 = arith.constant 0 : i32
    %c0_i32_0 = arith.constant 0 : i32
    %c0_i32_1 = arith.constant 0 : i32
    return %c0_i32, %c0_i32_0 : i32, i32
  }
  func.func @transform_2(%arg0: i32) -> (i32, i32) {
    %c0_i32 = arith.constant 0 : i32
    %c0_i32_0 = arith.constant 0 : i32
    %c0_i32_1 = arith.constant 0 : i32
    return %c0_i32, %c0_i32_0 : i32, i32
  }
  func.func @transform_3(%arg0: i32) -> (i32, i32) {
    %c0_i32 = arith.constant 0 : i32
    %c0_i32_0 = arith.constant 0 : i32
    %c0_i32_1 = arith.constant 0 : i32
    return %c0_i32, %c0_i32_0 : i32, i32
  }
  func.func @transform_4(%arg0: i32) -> (i32, i32) {
    %c0_i32 = arith.constant 0 : i32
    %c0_i32_0 = arith.constant 0 : i32
    %c0_i32_1 = arith.constant 0 : i32
    return %c0_i32, %c0_i32_0 : i32, i32
  }
  func.func @transform_5(%arg0: i32) -> (i32, i32) {
    %c0_i32 = arith.constant 0 : i32
    %c0_i32_0 = arith.constant 0 : i32
    %c0_i32_1 = arith.constant 0 : i32
    return %c0_i32, %c0_i32_0 : i32, i32
  }
  func.func @transform_6(%arg0: i32) -> (i32, i32) {
    %c0_i32 = arith.constant 0 : i32
    %c0_i32_0 = arith.constant 0 : i32
    %c0_i32_1 = arith.constant 0 : i32
    return %c0_i32, %c0_i32_0 : i32, i32
  }
  func.func @transform_7(%arg0: i32) -> (i32, i32) {
    %c0_i32 = arith.constant 0 : i32
    %c0_i32_0 = arith.constant 0 : i32
    %c0_i32_1 = arith.constant 0 : i32
    return %c0_i32, %c0_i32_0 : i32, i32
  }
  func.func @transform_8(%arg0: i32) -> (i32, i32) {
    %c0_i32 = arith.constant 0 : i32
    %c0_i32_0 = arith.constant 0 : i32
    %c0_i32_1 = arith.constant 0 : i32
    return %c0_i32, %c0_i32_0 : i32, i32
  }
  func.func @transform_9(%arg0: i32) -> (i32, i32) {
    %c0_i32 = arith.constant 0 : i32
    %c0_i32_0 = arith.constant 0 : i32
    %c0_i32_1 = arith.constant 0 : i32
    return %c0_i32, %c0_i32_0 : i32, i32
  }
  func.func @transform_10(%arg0: i32) -> (i32, i32) {
    %c0_i32 = arith.constant 0 : i32
    %c0_i32_0 = arith.constant 0 : i32
    %c0_i32_1 = arith.constant 0 : i32
    return %c0_i32, %c0_i32_0 : i32, i32
  }
  func.func @transform_11(%arg0: i32) -> (i32, i32) {
    %c0_i32 = arith.constant 0 : i32
    %c0_i32_0 = arith.constant 0 : i32
    return %arg0, %c0_i32 : i32, i32
  }
}

</mosaic_0001>

<bundles_post_ra>
// kernel: mlp_esm650.1
= control target key start
LH: loop header
LB: loop body
LE: loop exit
PB: predicated region body
PF: predicated region fallthrough
CT: control target
= control target key end

     0   :  { %16 = vsyncpa [#allocation3], 0  ;;  %s9703_s0 = inlined_call_operand.vmem [shape: f32[16,1280], index: 0, kind: input, shape index: {}]   ;;  %s9704_s1 = inlined_call_operand.hbm [shape: bf16[1280,1024], index: 1, kind: input, shape index: {}]   ;;  %s9705_s2 = inlined_call_operand.hbm [shape: f32[1,1024], index: 2, kind: input, shape index: {}]   ;;  %s9706_s3 = inlined_call_operand.hbm [shape: bf16[1024,512], index: 3, kind: input, shape index: {}]   ;;  %s9707_s4 = inlined_call_operand.hbm [shape: f32[1,512], index: 4, kind: input, shape index: {}]   ;;  %s9708_s5 = inlined_call_operand.hbm [shape: bf16[512,128], index: 5, kind: input, shape index: {}]   ;;  %s9709_s6 = inlined_call_operand.hbm [shape: f32[1,128], index: 6, kind: input, shape index: {}]   ;;  %s9710_s7 = inlined_call_operand.hbm [shape: bf16[128,128], index: 7, kind: input, shape index: {}]   ;;  %s9711_s8 = inlined_call_operand.hbm [shape: f32[1,128], index: 8, kind: input, shape index: {}]   ;;  %s9712_s9 = inlined_call_operand.hbm [shape: bf16[128,128], index: 9, kind: input, shape index: {}]   ;;  %s9713_s10 = inlined_call_operand.hbm [shape: f32[1,128], index: 10, kind: input, shape index: {}]   ;;  %s9714_s11 = inlined_call_operand.vmem [shape: f32[16,128], index: 11, kind: output, shape index: {}]  }
   0x1   :  { %17 = vsyncpa [#allocation5], 0 }
   0x2   :  { %18 = vsyncpa [#allocation8], 0 }
   0x3   :  { %19 = vsyncpa [#allocation11], 0 }
   0x4   :  { %20 = vsyncpa [#allocation14], 0 }
   0x5   :  { %21 = vsyncpa [#allocation17], 0  ;;  %s9306_s17 = smov [#allocation4]   ;;  %s9307_s19 = smov [#allocation7]  }
   0x6   :  { %s42_s18 = sshll.u32 %s9306_s17, 4  ;;  %s64_s20 = sshll.u32 %s9307_s19, 4  ;;  %s43_s18 = int_to_ptr.vmem [resolvable:$true] %s42_s18  ;;  %s65_s20 = int_to_ptr.vmem [resolvable:$true] %s64_s20 }
   0x7   :  { %s9074_s23 = scalar_lea.hbm %s9705_s2, 128 }
   0x8   :  { %p9075_p0 = scmp.ne.s32.totalorder %s9705_s2, %s9074_s23  ;;  %p9078_p1 = scmp.lt.u32.totalorder %s9074_s23, %s9705_s2 }
   0xa   :  { %p9080_p2 = pnand %p9078_p1, %p9075_p0 }
   0xc   :  { %9083 = shalt.err (!%p9080_p2)
}
   0xd   :  { %s9084_s28 = scalar_lea.vmem %s43_s18, 128  ;;  %p9089_p4 = scmp.lt.s32.totalorder %s43_s18, %s43_s18 }
   0xe   :  { %p9085_p3 = scmp.ne.s32.totalorder %s43_s18, %s9084_s28  ;;  %p9090_p5 = scmp.lt.s32.totalorder %s9084_s28, %s9084_s28 }
  0x10   :  { %p9091_p6 = por %p9090_p5, %p9089_p4 }
  0x12   :  { %p9092_p7 = pnand %p9091_p6, %p9085_p3 }
  0x14   :  { %9095 = shalt.err (!%p9092_p7)
}
  0x15   :  { %45 = dma.hbm_to_vmem [thread:$0]  %s9705_s2, 128, %s43_s18, [#allocation5]  }
  0x16   :  { %s9096_s14 = scalar_lea.hbm %s9707_s4, 64 }
  0x17   :  { %p9097_p8 = scmp.ne.s32.totalorder %s9707_s4, %s9096_s14  ;;  %p9100_p9 = scmp.lt.u32.totalorder %s9096_s14, %s9707_s4 }
  0x19   :  { %p9102_p10 = pnand %p9100_p9, %p9097_p8 }
  0x1b   :  { %9105 = shalt.err (!%p9102_p10)
}
  0x1c   :  { %s9106_s21 = scalar_lea.vmem %s65_s20, 64  ;;  %p9111_p12 = scmp.lt.s32.totalorder %s65_s20, %s65_s20 }
  0x1d   :  { %p9107_p11 = scmp.ne.s32.totalorder %s65_s20, %s9106_s21  ;;  %p9112_p13 = scmp.lt.s32.totalorder %s9106_s21, %s9106_s21 }
  0x1f   :  { %p9113_p0 = por %p9112_p13, %p9111_p12 }
  0x21   :  { %p9114_p1 = pnand %p9113_p0, %p9107_p11 }
  0x23   :  { %9117 = shalt.err (!%p9114_p1)
}
  0x24   :  { %67 = dma.hbm_to_vmem [thread:$0]  %s9707_s4, 64, %s65_s20, [#allocation8]  }
  0x25   :  { %s9308_s22 = smov [#allocation10]   ;;  %s9309_s24 = smov [#allocation13]  }
  0x26   :  { %s86_s23 = sshll.u32 %s9308_s22, 4  ;;  %s108_s25 = sshll.u32 %s9309_s24, 4  ;;  %s87_s23 = int_to_ptr.vmem [resolvable:$true] %s86_s23  ;;  %s109_s25 = int_to_ptr.vmem [resolvable:$true] %s108_s25 }
  0x27   :  { %s9118_s28 = scalar_lea.hbm %s9709_s6, 16 }
  0x28   :  { %p9119_p2 = scmp.ne.s32.totalorder %s9709_s6, %s9118_s28  ;;  %p9122_p3 = scmp.lt.u32.totalorder %s9118_s28, %s9709_s6 }
  0x2a   :  { %p9124_p4 = pnand %p9122_p3, %p9119_p2 }
  0x2c   :  { %9127 = shalt.err (!%p9124_p4)
}
  0x2d   :  { %s9128_s4 = scalar_lea.vmem %s87_s23, 16  ;;  %s9132_s20 = scalar_lea.vmem %s87_s23, 32 }
  0x2e   :  { %p9129_p5 = scmp.ne.s32.totalorder %s87_s23, %s9128_s4  ;;  %p9133_p6 = scmp.lt.s32.totalorder %s87_s23, %s87_s23 }
  0x2f   :  { %p9134_p7 = scmp.lt.s32.totalorder %s9132_s20, %s9128_s4 }
  0x31   :  { %p9135_p8 = por %p9134_p7, %p9133_p6 }
  0x33   :  { %p9136_p9 = pnand %p9135_p8, %p9129_p5 }
  0x35   :  { %9139 = shalt.err (!%p9136_p9)
}
  0x36   :  { %89 = dma.hbm_to_vmem [thread:$0]  %s9709_s6, 16, %s87_s23, [#allocation11]  }
  0x37   :  { %s9140_s19 = scalar_lea.hbm %s9711_s8, 16 }
  0x38   :  { %p9141_p10 = scmp.ne.s32.totalorder %s9711_s8, %s9140_s19  ;;  %p9144_p11 = scmp.lt.u32.totalorder %s9140_s19, %s9711_s8 }
  0x3a   :  { %p9146_p12 = pnand %p9144_p11, %p9141_p10 }
  0x3c   :  { %9149 = shalt.err (!%p9146_p12)
}
  0x3d   :  { %s9150_s24 = scalar_lea.vmem %s109_s25, 16  ;;  %s9154_s26 = scalar_lea.vmem %s109_s25, 32 }
  0x3e   :  { %p9151_p13 = scmp.ne.s32.totalorder %s109_s25, %s9150_s24  ;;  %p9155_p0 = scmp.lt.s32.totalorder %s109_s25, %s109_s25 }
  0x3f   :  { %p9156_p1 = scmp.lt.s32.totalorder %s9154_s26, %s9150_s24 }
  0x41   :  { %p9157_p2 = por %p9156_p1, %p9155_p0 }
  0x43   :  { %p9158_p3 = pnand %p9157_p2, %p9151_p13 }
  0x45   :  { %9161 = shalt.err (!%p9158_p3)
}
  0x46   :  { %111 = dma.hbm_to_vmem [thread:$0]  %s9711_s8, 16, %s109_s25, [#allocation14]  }
  0x47   :  { %s9310_s27 = smov [#allocation2]   ;;  %s9162_s12 = scalar_lea.hbm %s9704_s1, 81920 }
  0x48   :  { %s29_s28 = sshll.u32 %s9310_s27, 4  ;;  %p9163_p4 = scmp.ne.s32.totalorder %s9704_s1, %s9162_s12  ;;  %s30_s28 = int_to_ptr.vmem [resolvable:$true] %s29_s28 }
  0x49   :  { %p9166_p5 = scmp.lt.u32.totalorder %s9162_s12, %s9704_s1 }
  0x4b   :  { %p9168_p6 = pnand %p9166_p5, %p9163_p4 }
  0x4d   :  { %9171 = shalt.err (!%p9168_p6)
}
  0x4e   :  { %s9172_s15 = scalar_lea.vmem %s30_s28, 81920  ;;  %p9177_p8 = scmp.lt.s32.totalorder %s30_s28, %s30_s28 }
  0x4f   :  { %p9173_p7 = scmp.ne.s32.totalorder %s30_s28, %s9172_s15  ;;  %p9178_p9 = scmp.lt.s32.totalorder %s9172_s15, %s9172_s15 }
  0x51   :  { %p9179_p10 = por %p9178_p9, %p9177_p8 }
  0x53   :  { %p9180_p11 = pnand %p9179_p10, %p9173_p7 }
  0x55   :  { %9183 = shalt.err (!%p9180_p11)
}
  0x56   :  { %s9311_s8 = smov 512   ;;  %s9312_s25 = smov 32  }
  0x57   :  { %35 = dma.hbm_to_vmem [thread:$0]  %s9704_s1, 81920, %s30_s28, [#allocation3], %s9311_s8, %s9311_s8, %s9312_s25  }
  0x58   :  { %s9313_s19 = smov [#allocation6]   ;;  %s9184_s22 = scalar_lea.hbm %s9706_s3, 32768 }
  0x59   :  { %s51_s21 = sshll.u32 %s9313_s19, 4  ;;  %p9185_p12 = scmp.ne.s32.totalorder %s9706_s3, %s9184_s22  ;;  %s52_s21 = int_to_ptr.vmem [resolvable:$true] %s51_s21 }
  0x5a   :  { %p9188_p13 = scmp.lt.u32.totalorder %s9184_s22, %s9706_s3 }
  0x5c   :  { %p9190_p0 = pnand %p9188_p13, %p9185_p12 }
  0x5e   :  { %9193 = shalt.err (!%p9190_p0)
}
  0x5f   :  { %s9194_s27 = scalar_lea.vmem %s52_s21, 32768  ;;  %p9199_p2 = scmp.lt.s32.totalorder %s52_s21, %s52_s21 }
  0x60   :  { %p9195_p1 = scmp.ne.s32.totalorder %s52_s21, %s9194_s27  ;;  %p9200_p3 = scmp.lt.s32.totalorder %s9194_s27, %s9194_s27 }
  0x62   :  { %p9201_p4 = por %p9200_p3, %p9199_p2 }
  0x64   :  { %p9202_p5 = pnand %p9201_p4, %p9195_p1 }
  0x66   :  { %9205 = shalt.err (!%p9202_p5)
}
  0x67   :  { %s9314_s1 = smov 256   ;;  %s9315_s28 = smov 16  }
  0x68   :  { %57 = dma.hbm_to_vmem [thread:$0]  %s9706_s3, 32768, %s52_s21, [#allocation5], %s9314_s1, %s9314_s1, %s9315_s28  }
  0x69   :  { %s9316_s12 = smov [#allocation9]   ;;  %s9206_s14 = scalar_lea.hbm %s9708_s5, 4096 }
  0x6a   :  { %s73_s13 = sshll.u32 %s9316_s12, 4  ;;  %p9207_p6 = scmp.ne.s32.totalorder %s9708_s5, %s9206_s14  ;;  %s74_s13 = int_to_ptr.vmem [resolvable:$true] %s73_s13 }
  0x6b   :  { %p9210_p7 = scmp.lt.u32.totalorder %s9206_s14, %s9708_s5 }
  0x6d   :  { %p9212_p8 = pnand %p9210_p7, %p9207_p6 }
  0x6f   :  { %9215 = shalt.err (!%p9212_p8)
}
  0x70   :  { %s9216_s17 = scalar_lea.vmem %s74_s13, 4096  ;;  %p9221_p10 = scmp.lt.s32.totalorder %s74_s13, %s74_s13 }
  0x71   :  { %p9217_p9 = scmp.ne.s32.totalorder %s74_s13, %s9216_s17  ;;  %p9222_p11 = scmp.lt.s32.totalorder %s9216_s17, %s9216_s17 }
  0x73   :  { %p9223_p12 = por %p9222_p11, %p9221_p10 }
  0x75   :  { %p9224_p13 = pnand %p9223_p12, %p9217_p9 }
  0x77   :  { %9227 = shalt.err (!%p9224_p13)
}
  0x78   :  { %s9317_s3 = smov 64   ;;  %s9318_s19 = smov 4  }
  0x79   :  { %79 = dma.hbm_to_vmem [thread:$0]  %s9708_s5, 4096, %s74_s13, [#allocation8], %s9317_s3, %s9317_s3, %s9318_s19  }
  0x7a   :  { %s9319_s18 = smov [#allocation12]   ;;  %s9320_s24 = smov [#allocation15]  }
  0x7b   :  { %s95_s22 = sshll.u32 %s9319_s18, 4  ;;  %s117_s26 = sshll.u32 %s9320_s24, 4  ;;  %s96_s22 = int_to_ptr.vmem [resolvable:$true] %s95_s22  ;;  %s118_s26 = int_to_ptr.vmem [resolvable:$true] %s117_s26 }
  0x7c   :  { %s9228_s27 = scalar_lea.hbm %s9710_s7, 1024 }
  0x7d   :  { %p9229_p0 = scmp.ne.s32.totalorder %s9710_s7, %s9228_s27  ;;  %p9232_p1 = scmp.lt.u32.totalorder %s9228_s27, %s9710_s7 }
  0x7f   :  { %p9234_p2 = pnand %p9232_p1, %p9229_p0 }
  0x81   :  { %9237 = shalt.err (!%p9234_p2)
}
  0x82   :  { %s9238_s5 = scalar_lea.vmem %s96_s22, 1024  ;;  %p9243_p4 = scmp.lt.s32.totalorder %s96_s22, %s96_s22 }
  0x83   :  { %p9239_p3 = scmp.ne.s32.totalorder %s96_s22, %s9238_s5  ;;  %p9244_p5 = scmp.lt.s32.totalorder %s9238_s5, %s9238_s5 }
  0x85   :  { %p9245_p6 = por %p9244_p5, %p9243_p4 }
  0x87   :  { %p9246_p7 = pnand %p9245_p6, %p9239_p3 }
  0x89   :  { %9249 = shalt.err (!%p9246_p7)
}
  0x8a   :  { %101 = dma.hbm_to_vmem [thread:$0]  %s9710_s7, 1024, %s96_s22, [#allocation11], %s9317_s3, %s9317_s3, %s9318_s19  }
  0x8b   :  { %s9250_s14 = scalar_lea.hbm %s9712_s9, 1024 }
  0x8c   :  { %p9251_p8 = scmp.ne.s32.totalorder %s9712_s9, %s9250_s14  ;;  %p9254_p9 = scmp.lt.u32.totalorder %s9250_s14, %s9712_s9 }
  0x8e   :  { %p9256_p10 = pnand %p9254_p9, %p9251_p8 }
  0x90   :  { %9259 = shalt.err (!%p9256_p10)
}
  0x91   :  { %s9260_s17 = scalar_lea.vmem %s118_s26, 1024  ;;  %p9265_p12 = scmp.lt.s32.totalorder %s118_s26, %s118_s26 }
  0x92   :  { %p9261_p11 = scmp.ne.s32.totalorder %s118_s26, %s9260_s17  ;;  %p9266_p13 = scmp.lt.s32.totalorder %s9260_s17, %s9260_s17 }
  0x94   :  { %p9267_p0 = por %p9266_p13, %p9265_p12 }
  0x96   :  { %p9268_p1 = pnand %p9267_p0, %p9261_p11 }
  0x98   :  { %9271 = shalt.err (!%p9268_p1)
}
  0x99   :  { %123 = dma.hbm_to_vmem [thread:$0]  %s9712_s9, 1024, %s118_s26, [#allocation14], %s9317_s3, %s9317_s3, %s9318_s19  }
  0x9a   :  { %s9321_s2 = smov [#allocation16]   ;;  %s9272_s6 = scalar_lea.hbm %s9713_s10, 16 }
  0x9b   :  { %s130_s18 = sshll.u32 %s9321_s2, 4  ;;  %p9273_p2 = scmp.ne.s32.totalorder %s9713_s10, %s9272_s6  ;;  %s131_s18 = int_to_ptr.vmem [resolvable:$true] %s130_s18 }
  0x9c   :  { %p9276_p3 = scmp.lt.u32.totalorder %s9272_s6, %s9713_s10 }
  0x9e   :  { %p9278_p4 = pnand %p9276_p3, %p9273_p2 }
  0xa0   :  { %9281 = shalt.err (!%p9278_p4)
}
  0xa1   :  { %s9282_s29 = scalar_lea.vmem %s131_s18, 16  ;;  %s9286_s9 = scalar_lea.vmem %s131_s18, 32 }
  0xa2   :  { %p9283_p5 = scmp.ne.s32.totalorder %s131_s18, %s9282_s29  ;;  %p9287_p6 = scmp.lt.s32.totalorder %s131_s18, %s131_s18 }
  0xa3   :  { %p9288_p7 = scmp.lt.s32.totalorder %s9286_s9, %s9282_s29 }
  0xa5   :  { %p9289_p8 = por %p9288_p7, %p9287_p6 }
  0xa7   :  { %p9290_p9 = pnand %p9289_p8, %p9283_p5 }
  0xa9   :  { %9293 = shalt.err (!%p9290_p9)
}
  0xaa   :  { %133 = dma.hbm_to_vmem [thread:$0]  %s9713_s10, 16, %s131_s18, [#allocation17]  }
  0xab   :  { %9294 = dma.done.wait [#allocation3], 81920  }
  0xac   :  { %9295 = vsyncadd [#allocation3], 4294885376 }
  0xad   :  { %9296 = dma.done.wait [#allocation5], 32896  }
  0xae   :  { %9297 = vsyncadd [#allocation5], 4294934400 }
  0xaf   :  { %9298 = dma.done.wait [#allocation8], 4160  }
  0xb0   :  { %9299 = vsyncadd [#allocation8], 4294963136 }
  0xb1   :  { %9300 = dma.done.wait [#allocation11], 1040  }
  0xb2   :  { %9301 = vsyncadd [#allocation11], 4294966256 }
  0xb3   :  { %9302 = dma.done.wait [#allocation14], 1040  }
  0xb4   :  { %9303 = vsyncadd [#allocation14], 4294966256 }
  0xb5   :  { %9304 = dma.done.wait [#allocation17], 16  }
  0xb6   :  { %9305 = vsyncadd [#allocation17], 4294967280  ;;  %v195_v0 = vld [vmem:[#allocation2] sm:$0xff]  ;;  %v196_v2 = vld [vmem:[#allocation2 + $0x8] sm:$0xff]  ;;  %vm9323_vm0 = vmmov 0  }
  0xb7   :  { %v199_v1 = vld [vmem:[#allocation2 + $0x20] sm:$0xff]  ;;  %v200_v4 = vld [vmem:[#allocation2 + $0x28] sm:$0xff]  ;;  %v176_v54 = vld [vmem:[%s9703_s0 + $0x58] sm:$0xff] }
  0xb8   :  { %v7463_v3 = vcombine.high %v195_v0, %v199_v1  ;;  %v7462_v5 = vcombine.low %v195_v0, %v199_v1  ;;  %v203_v6 = vld [vmem:[#allocation2 + $0x40] sm:$0xff]  ;;  %v7465_v8 = vcombine.high %v196_v2, %v200_v4  ;;  %v7464_v9 = vcombine.low %v196_v2, %v200_v4  ;;  %v204_v11 = vld [vmem:[#allocation2 + $0x48] sm:$0xff] }
  0xb9   :  { %v207_v7 = vld [vmem:[#allocation2 + $0x60] sm:$0xff]  ;;  %v208_v12 = vld [vmem:[#allocation2 + $0x68] sm:$0xff] }
  0xba   :  { %v7471_v10 = vcombine.high %v203_v6, %v207_v7  ;;  %v211_v13 = vld [vmem:[#allocation2 + $0x80] sm:$0xff]  ;;  %4077 = vmatprep.subr.bf16.mxu0 %v7463_v3  ;;  %v7473_v14 = vcombine.high %v204_v11, %v208_v12  ;;  %v212_v16 = vld [vmem:[#allocation2 + $0x88] sm:$0xff]  ;;  %4292 = vmatprep.subr.bf16.mxu1 %v7465_v8  ;;  %v7470_v18 = vcombine.low %v203_v6, %v207_v7 }
  0xbb   :  { %v215_v15 = vld [vmem:[#allocation2 + $0xa0] sm:$0xff]  ;;  %v216_v17 = vld [vmem:[#allocation2 + $0xa8] sm:$0xff]  ;;  %4078 = vmatpush1.bf16.msra.mxu0 %v7462_v5  ;;  %4293 = vmatpush1.bf16.msra.mxu1 %v7464_v9  ;;  %v7472_v19 = vcombine.low %v204_v11, %v208_v12 }
  0xbc   :  { %4079 = vmatprep.subr.bf16.mxu0 %v7471_v10  ;;  %v7479_v20 = vcombine.high %v211_v13, %v215_v15  ;;  %4294 = vmatprep.subr.bf16.mxu1 %v7473_v14  ;;  %v7481_v21 = vcombine.high %v212_v16, %v216_v17  ;;  %v219_v22 = vld [vmem:[#allocation2 + $0xc0] sm:$0xff]  ;;  %v220_v24 = vld [vmem:[#allocation2 + $0xc8] sm:$0xff]  ;;  %v7478_v26 = vcombine.low %v211_v13, %v215_v15 }
  0xbd   :  { %v223_v23 = vld [vmem:[#allocation2 + $0xe0] sm:$0xff]  ;;  %v224_v25 = vld [vmem:[#allocation2 + $0xe8] sm:$0xff]  ;;  %v7480_v27 = vcombine.low %v212_v16, %v216_v17 }
  0xbe   :  { %v7487_v28 = vcombine.high %v219_v22, %v223_v23  ;;  %v7489_v29 = vcombine.high %v220_v24, %v224_v25  ;;  %v227_v30 = vld [vmem:[#allocation2 + $0x100] sm:$0xff]  ;;  %v228_v32 = vld [vmem:[#allocation2 + $0x108] sm:$0xff]  ;;  %v7486_v34 = vcombine.low %v219_v22, %v223_v23  ;;  %v7488_v35 = vcombine.low %v220_v24, %v224_v25 }
  0xbf   :  { %4080 = vmatpush1.bf16.msra.mxu0 %v7470_v18  ;;  %4295 = vmatpush1.bf16.msra.mxu1 %v7472_v19  ;;  %v231_v31 = vld [vmem:[#allocation2 + $0x120] sm:$0xff]  ;;  %v232_v33 = vld [vmem:[#allocation2 + $0x128] sm:$0xff] }
  0xc0   :  { %4081 = vmatprep.subr.bf16.mxu0 %v7479_v20  ;;  %4296 = vmatprep.subr.bf16.mxu1 %v7481_v21  ;;  %v7495_v36 = vcombine.high %v227_v30, %v231_v31  ;;  %v7497_v37 = vcombine.high %v228_v32, %v232_v33  ;;  %v235_v38 = vld [vmem:[#allocation2 + $0x140] sm:$0xff]  ;;  %v236_v40 = vld [vmem:[#allocation2 + $0x148] sm:$0xff]  ;;  %v7494_v42 = vcombine.low %v227_v30, %v231_v31 }
  0xc1   :  { %v239_v39 = vld [vmem:[#allocation2 + $0x160] sm:$0xff]  ;;  %v240_v41 = vld [vmem:[#allocation2 + $0x168] sm:$0xff]  ;;  %v7496_v43 = vcombine.low %v228_v32, %v232_v33 }
  0xc2   :  { %v7503_v44 = vcombine.high %v235_v38, %v239_v39  ;;  %v7505_v45 = vcombine.high %v236_v40, %v240_v41  ;;  %v243_v46 = vld [vmem:[#allocation2 + $0x180] sm:$0xff]  ;;  %v244_v48 = vld [vmem:[#allocation2 + $0x188] sm:$0xff]  ;;  %v7502_v50 = vcombine.low %v235_v38, %v239_v39  ;;  %v7504_v51 = vcombine.low %v236_v40, %v240_v41 }
  0xc3   :  { %4082 = vmatpush1.bf16.msra.mxu0 %v7478_v26  ;;  %4297 = vmatpush1.bf16.msra.mxu1 %v7480_v27  ;;  %v247_v47 = vld [vmem:[#allocation2 + $0x1a0] sm:$0xff]  ;;  %v248_v49 = vld [vmem:[#allocation2 + $0x1a8] sm:$0xff] }
  0xc4   :  { %4083 = vmatprep.subr.bf16.mxu0 %v7487_v28  ;;  %4298 = vmatprep.subr.bf16.mxu1 %v7489_v29  ;;  %v7511_v52 = vcombine.high %v243_v46, %v247_v47  ;;  %v166_v53 = vld [vmem:[%s9703_s0 + $0x8] sm:$0xff]  ;;  %v7513_v55 = vcombine.high %v244_v48, %v248_v49  ;;  %v251_v56 = vld [vmem:[#allocation2 + $0x1c0] sm:$0xff]  ;;  %v7510_v61 = vcombine.low %v243_v46, %v247_v47 }
  0xc5   :  { %v255_v57 = vld [vmem:[#allocation2 + $0x1e0] sm:$0xff]  ;;  %v9519_v58 = vpack.c.bf16 %v176_v54, %v166_v53  ;;  %v252_v59 = vld [vmem:[#allocation2 + $0x1c8] sm:$0xff]  ;;  %v7512_v62 = vcombine.low %v244_v48, %v248_v49 }
  0xc6   :  { %v256_v60 = vld [vmem:[#allocation2 + $0x1e8] sm:$0xff]  ;;  %v7519_v63 = vcombine.high %v251_v56, %v255_v57  ;;  %v259_v1 = vld [vmem:[#allocation2 + $0x200] sm:$0xff]  ;;  %v7518_v5 = vcombine.low %v251_v56, %v255_v57 }
  0xc7   :  { %4084 = vmatpush1.bf16.msra.mxu0 %v7486_v34  ;;  %4299 = vmatpush1.bf16.msra.mxu1 %v7488_v35  ;;  %v7521_v0 = vcombine.high %v252_v59, %v256_v60  ;;  %v263_v2 = vld [vmem:[#allocation2 + $0x220] sm:$0xff]  ;;  %v260_v3 = vld [vmem:[#allocation2 + $0x208] sm:$0xff]  ;;  %v7520_v6 = vcombine.low %v252_v59, %v256_v60 }
  0xc8   :  { %4085 = vmatprep.subr.bf16.mxu0 %v7495_v36  ;;  %4300 = vmatprep.subr.bf16.mxu1 %v7497_v37  ;;  %v264_v4 = vld [vmem:[#allocation2 + $0x228] sm:$0xff]  ;;  %v7527_v7 = vcombine.high %v259_v1, %v263_v2  ;;  %v267_v9 = vld [vmem:[#allocation2 + $0x240] sm:$0xff]  ;;  %v7526_v13 = vcombine.low %v259_v1, %v263_v2 }
  0xc9   :  { %4109 = vmatprep.mubr.bf16.mxu0 %v9519_v58  ;;  %4324 = vmatprep.mubr.bf16.mxu1 %v9519_v58  ;;  %v7529_v8 = vcombine.high %v260_v3, %v264_v4  ;;  %v271_v10 = vld [vmem:[#allocation2 + $0x260] sm:$0xff]  ;;  %v268_v11 = vld [vmem:[#allocation2 + $0x248] sm:$0xff]  ;;  %v7528_v14 = vcombine.low %v260_v3, %v264_v4 }
  0xca   :  { %v272_v12 = vld [vmem:[#allocation2 + $0x268] sm:$0xff]  ;;  %v7535_v15 = vcombine.high %v267_v9, %v271_v10  ;;  %v275_v17 = vld [vmem:[#allocation2 + $0x280] sm:$0xff]  ;;  %v7534_v21 = vcombine.low %v267_v9, %v271_v10 }
  0xcb   :  { %4086 = vmatpush1.bf16.msra.mxu0 %v7494_v42  ;;  %4301 = vmatpush1.bf16.msra.mxu1 %v7496_v43  ;;  %v7537_v16 = vcombine.high %v268_v11, %v272_v12  ;;  %v279_v18 = vld [vmem:[#allocation2 + $0x2a0] sm:$0xff]  ;;  %v276_v19 = vld [vmem:[#allocation2 + $0x288] sm:$0xff]  ;;  %v7536_v22 = vcombine.low %v268_v11, %v272_v12 }
  0xcc   :  { %4087 = vmatprep.subr.bf16.mxu0 %v7503_v44  ;;  %4302 = vmatprep.subr.bf16.mxu1 %v7505_v45  ;;  %v280_v20 = vld [vmem:[#allocation2 + $0x2a8] sm:$0xff]  ;;  %v7543_v23 = vcombine.high %v275_v17, %v279_v18  ;;  %v283_v25 = vld [vmem:[#allocation2 + $0x2c0] sm:$0xff]  ;;  %v7542_v29 = vcombine.low %v275_v17, %v279_v18  ;;  %v168_v17 = vld [vmem:[%s9703_s0 + $0x18] sm:$0xff] }
  0xcd   :  { %v7545_v24 = vcombine.high %v276_v19, %v280_v20  ;;  %v287_v26 = vld [vmem:[#allocation2 + $0x2e0] sm:$0xff]  ;;  %v284_v27 = vld [vmem:[#allocation2 + $0x2c8] sm:$0xff]  ;;  %v7544_v30 = vcombine.low %v276_v19, %v280_v20 }
  0xce   :  { %v288_v28 = vld [vmem:[#allocation2 + $0x2e8] sm:$0xff]  ;;  %v7551_v31 = vcombine.high %v283_v25, %v287_v26  ;;  %v291_v33 = vld [vmem:[#allocation2 + $0x300] sm:$0xff]  ;;  %v7550_v37 = vcombine.low %v283_v25, %v287_v26 }
  0xcf   :  { %4088 = vmatpush1.bf16.msra.mxu0 %v7502_v50  ;;  %4303 = vmatpush1.bf16.msra.mxu1 %v7504_v51  ;;  %v7553_v32 = vcombine.high %v284_v27, %v288_v28  ;;  %v295_v34 = vld [vmem:[#allocation2 + $0x320] sm:$0xff]  ;;  %v292_v35 = vld [vmem:[#allocation2 + $0x308] sm:$0xff]  ;;  %v7552_v38 = vcombine.low %v284_v27, %v288_v28 }
  0xd0   :  { %4089 = vmatprep.subr.bf16.mxu0 %v7511_v52  ;;  %4304 = vmatprep.subr.bf16.mxu1 %v7513_v55  ;;  %v296_v36 = vld [vmem:[#allocation2 + $0x328] sm:$0xff]  ;;  %v7559_v39 = vcombine.high %v291_v33, %v295_v34  ;;  %v299_v41 = vld [vmem:[#allocation2 + $0x340] sm:$0xff]  ;;  %v7558_v45 = vcombine.low %v291_v33, %v295_v34 }
  0xd1   :  { %v7561_v40 = vcombine.high %v292_v35, %v296_v36  ;;  %v303_v42 = vld [vmem:[#allocation2 + $0x360] sm:$0xff]  ;;  %v300_v43 = vld [vmem:[#allocation2 + $0x348] sm:$0xff]  ;;  %v7560_v46 = vcombine.low %v292_v35, %v296_v36 }
  0xd2   :  { %v304_v44 = vld [vmem:[#allocation2 + $0x368] sm:$0xff]  ;;  %v7567_v47 = vcombine.high %v299_v41, %v303_v42  ;;  %v307_v49 = vld [vmem:[#allocation2 + $0x380] sm:$0xff]  ;;  %v7566_v53 = vcombine.low %v299_v41, %v303_v42 }
  0xd3   :  { %4090 = vmatpush1.bf16.msra.mxu0 %v7510_v61  ;;  %4305 = vmatpush1.bf16.msra.mxu1 %v7512_v62  ;;  %v7569_v48 = vcombine.high %v300_v43, %v304_v44  ;;  %v311_v50 = vld [vmem:[#allocation2 + $0x3a0] sm:$0xff]  ;;  %v308_v51 = vld [vmem:[#allocation2 + $0x388] sm:$0xff]  ;;  %v7568_v54 = vcombine.low %v300_v43, %v304_v44 }
  0xd4   :  { %4091 = vmatprep.subr.bf16.mxu0 %v7519_v63  ;;  %4306 = vmatprep.subr.bf16.mxu1 %v7521_v0  ;;  %v312_v52 = vld [vmem:[#allocation2 + $0x3a8] sm:$0xff]  ;;  %v7575_v55 = vcombine.high %v307_v49, %v311_v50  ;;  %v315_v57 = vld [vmem:[#allocation2 + $0x3c0] sm:$0xff]  ;;  %v7574_v62 = vcombine.low %v307_v49, %v311_v50 }
  0xd5   :  { %v7577_v56 = vcombine.high %v308_v51, %v312_v52  ;;  %v319_v59 = vld [vmem:[#allocation2 + $0x3e0] sm:$0xff]  ;;  %v316_v60 = vld [vmem:[#allocation2 + $0x3c8] sm:$0xff]  ;;  %v7576_v63 = vcombine.low %v308_v51, %v312_v52 }
  0xd6   :  { %v320_v61 = vld [vmem:[#allocation2 + $0x3e8] sm:$0xff]  ;;  %v7583_v0 = vcombine.high %v315_v57, %v319_v59  ;;  %v323_v2 = vld [vmem:[#allocation2 + $0x400] sm:$0xff] }
  0xd7   :  { %4092 = vmatpush1.bf16.msra.mxu0 %v7518_v5  ;;  %4307 = vmatpush1.bf16.msra.mxu1 %v7520_v6  ;;  %v7585_v1 = vcombine.high %v316_v60, %v320_v61  ;;  %v327_v3 = vld [vmem:[#allocation2 + $0x420] sm:$0xff]  ;;  %v324_v4 = vld [vmem:[#allocation2 + $0x408] sm:$0xff]  ;;  %v7582_v6 = vcombine.low %v315_v57, %v319_v59  ;;  %v7584_v9 = vcombine.low %v316_v60, %v320_v61 }
  0xd8   :  { %4093 = vmatprep.subr.bf16.mxu0 %v7527_v7  ;;  %4308 = vmatprep.subr.bf16.mxu1 %v7529_v8  ;;  %v328_v5 = vld [vmem:[#allocation2 + $0x428] sm:$0xff]  ;;  %v165_v7 = vld [vmem:[%s9703_s0] sm:$0xff]  ;;  %v175_v8 = vld [vmem:[%s9703_s0 + $0x50] sm:$0xff]  ;;  %v7591_v10 = vcombine.high %v323_v2, %v327_v3  ;;  %v7590_v19 = vcombine.low %v323_v2, %v327_v3 }
  0xd9   :  { %v7593_v11 = vcombine.high %v324_v4, %v328_v5  ;;  %v331_v12 = vld [vmem:[#allocation2 + $0x440] sm:$0xff]  ;;  %v178_v18 = vld [vmem:[%s9703_s0 + $0x68] sm:$0xff]  ;;  %v7592_v20 = vcombine.low %v324_v4, %v328_v5 }
  0xda   :  { %v9537_v25 = vpack.c.bf16 %v178_v18, %v168_v17  ;;  %v340_v26 = vld [vmem:[#allocation2 + $0x488] sm:$0xff]  ;;  %v395_v17 = vld [vmem:[#allocation2 + $0x640] sm:$0xff] }
  0xdb   :  { %4094 = vmatpush1.bf16.msra.mxu0 %v7526_v13  ;;  %4309 = vmatpush1.bf16.msra.mxu1 %v7528_v14  ;;  %v335_v13 = vld [vmem:[#allocation2 + $0x460] sm:$0xff]  ;;  %v332_v14 = vld [vmem:[#allocation2 + $0x448] sm:$0xff] }
  0xdc   :  { %4095 = vmatprep.subr.bf16.mxu0 %v7535_v15  ;;  %4310 = vmatprep.subr.bf16.mxu1 %v7537_v16  ;;  %v9529_v15 = vpack.c.bf16 %v175_v8, %v165_v7  ;;  %v336_v16 = vld [vmem:[#allocation2 + $0x468] sm:$0xff]  ;;  %v7598_v28 = vcombine.low %v331_v12, %v335_v13  ;;  %v387_v8 = vld [vmem:[#allocation2 + $0x600] sm:$0xff] }
  0xdd   :  { %v344_v27 = vld [vmem:[#allocation2 + $0x4a8] sm:$0xff]  ;;  %v399_v18 = vld [vmem:[#allocation2 + $0x660] sm:$0xff] }
  0xde   :  { %v7609_v33 = vcombine.high %v340_v26, %v344_v27  ;;  %v348_v34 = vld [vmem:[#allocation2 + $0x4c8] sm:$0xff] }
  0xdf   :  { %4096 = vmatpush1.bf16.msra.mxu0 %v7534_v21  ;;  %4311 = vmatpush1.bf16.msra.mxu1 %v7536_v22  ;;  %v7599_v21 = vcombine.high %v331_v12, %v335_v13  ;;  %v7601_v22 = vcombine.high %v332_v14, %v336_v16  ;;  %v352_v35 = vld [vmem:[#allocation2 + $0x4e8] sm:$0xff] }
  0xe0   :  { %4097 = vmatprep.subr.bf16.mxu0 %v7543_v23  ;;  %4312 = vmatprep.subr.bf16.mxu1 %v7545_v24  ;;  %v339_v23 = vld [vmem:[#allocation2 + $0x480] sm:$0xff]  ;;  %v356_v41 = vld [vmem:[#allocation2 + $0x508] sm:$0xff]  ;;  %v7617_v42 = vcombine.high %v348_v34, %v352_v35 }
  0xe1   :  { %v343_v24 = vld [vmem:[#allocation2 + $0x4a0] sm:$0xff]  ;;  %v360_v43 = vld [vmem:[#allocation2 + $0x528] sm:$0xff] }
  0xe2   :  { %v7606_v36 = vcombine.low %v339_v23, %v343_v24  ;;  %v364_v49 = vld [vmem:[#allocation2 + $0x548] sm:$0xff]  ;;  %v7625_v50 = vcombine.high %v356_v41, %v360_v43 }
  0xe3   :  { %4098 = vmatpush1.bf16.msra.mxu0 %v7542_v29  ;;  %4313 = vmatpush1.bf16.msra.mxu1 %v7544_v30  ;;  %v7600_v29 = vcombine.low %v332_v14, %v336_v16  ;;  %v7607_v30 = vcombine.high %v339_v23, %v343_v24  ;;  %v368_v51 = vld [vmem:[#allocation2 + $0x568] sm:$0xff]  ;;  %v7663_v24 = vcombine.high %v395_v17, %v399_v18 }
  0xe4   :  { %4099 = vmatprep.subr.bf16.mxu0 %v7551_v31  ;;  %4314 = vmatprep.subr.bf16.mxu1 %v7553_v32  ;;  %v347_v31 = vld [vmem:[#allocation2 + $0x4c0] sm:$0xff]  ;;  %v372_v57 = vld [vmem:[#allocation2 + $0x588] sm:$0xff]  ;;  %v7633_v59 = vcombine.high %v364_v49, %v368_v51 }
  0xe5   :  { %v351_v32 = vld [vmem:[#allocation2 + $0x4e0] sm:$0xff]  ;;  %v376_v60 = vld [vmem:[#allocation2 + $0x5a8] sm:$0xff] }
  0xe6   :  { %v7614_v44 = vcombine.low %v347_v31, %v351_v32  ;;  %v380_v2 = vld [vmem:[#allocation2 + $0x5c8] sm:$0xff]  ;;  %v7641_v3 = vcombine.high %v372_v57, %v376_v60 }
  0xe7   :  { %4100 = vmatpush1.bf16.msra.mxu0 %v7550_v37  ;;  %4315 = vmatpush1.bf16.msra.mxu1 %v7552_v38  ;;  %v7608_v37 = vcombine.low %v340_v26, %v344_v27  ;;  %v7615_v38 = vcombine.high %v347_v31, %v351_v32  ;;  %v384_v4 = vld [vmem:[#allocation2 + $0x5e8] sm:$0xff]  ;;  %v403_v26 = vld [vmem:[#allocation2 + $0x680] sm:$0xff]  ;;  %v7662_v31 = vcombine.low %v395_v17, %v399_v18  ;;  %v167_v17 = vld [vmem:[%s9703_s0 + $0x10] sm:$0xff] }
  0xe8   :  { %4101 = vmatprep.subr.bf16.mxu0 %v7559_v39  ;;  %4316 = vmatprep.subr.bf16.mxu1 %v7561_v40  ;;  %v355_v39 = vld [vmem:[#allocation2 + $0x500] sm:$0xff]  ;;  %v392_v12 = vld [vmem:[#allocation2 + $0x628] sm:$0xff]  ;;  %v7648_v14 = vcombine.low %v380_v2, %v384_v4 }
  0xe9   :  { %v359_v40 = vld [vmem:[#allocation2 + $0x520] sm:$0xff] }
  0xea   :  { %v7622_v52 = vcombine.low %v355_v39, %v359_v40  ;;  %v407_v27 = vld [vmem:[#allocation2 + $0x6a0] sm:$0xff] }
  0xeb   :  { %4102 = vmatpush1.bf16.msra.mxu0 %v7558_v45  ;;  %4317 = vmatpush1.bf16.msra.mxu1 %v7560_v46  ;;  %v7616_v45 = vcombine.low %v348_v34, %v352_v35  ;;  %v7623_v46 = vcombine.high %v355_v39, %v359_v40  ;;  %v411_v34 = vld [vmem:[#allocation2 + $0x6c0] sm:$0xff]  ;;  %v7670_v39 = vcombine.low %v403_v26, %v407_v27 }
  0xec   :  { %4103 = vmatprep.subr.bf16.mxu0 %v7567_v47  ;;  %4318 = vmatprep.subr.bf16.mxu1 %v7569_v48  ;;  %v363_v47 = vld [vmem:[#allocation2 + $0x540] sm:$0xff] }
  0xed   :  { %v367_v48 = vld [vmem:[#allocation2 + $0x560] sm:$0xff] }
  0xee   :  { %v7630_v61 = vcombine.low %v363_v47, %v367_v48  ;;  %v415_v35 = vld [vmem:[#allocation2 + $0x6e0] sm:$0xff] }
  0xef   :  { %4104 = vmatpush1.bf16.msra.mxu0 %v7566_v53  ;;  %4319 = vmatpush1.bf16.msra.mxu1 %v7568_v54  ;;  %v7624_v53 = vcombine.low %v356_v41, %v360_v43  ;;  %v7631_v54 = vcombine.high %v363_v47, %v367_v48  ;;  %v7679_v41 = vcombine.high %v411_v34, %v415_v35  ;;  %v423_v43 = vld [vmem:[#allocation2 + $0x720] sm:$0xff] }
  0xf0   :  { %4105 = vmatprep.subr.bf16.mxu0 %v7575_v55  ;;  %4320 = vmatprep.subr.bf16.mxu1 %v7577_v56  ;;  %v371_v55 = vld [vmem:[#allocation2 + $0x580] sm:$0xff]  ;;  %v7678_v47 = vcombine.low %v411_v34, %v415_v35 }
  0xf1   :  { %v375_v56 = vld [vmem:[#allocation2 + $0x5a0] sm:$0xff] }
  0xf2   :  { %v7638_v5 = vcombine.low %v371_v55, %v375_v56  ;;  %v177_v18 = vld [vmem:[%s9703_s0 + $0x60] sm:$0xff] }
  0xf3   :  { %4106 = vmatpush1.bf16.msra.mxu0 %v7574_v62  ;;  %4321 = vmatpush1.bf16.msra.mxu1 %v7576_v63  ;;  %v7632_v62 = vcombine.low %v364_v49, %v368_v51  ;;  %v7639_v63 = vcombine.high %v371_v55, %v375_v56  ;;  %v431_v51 = vld [vmem:[#allocation2 + $0x760] sm:$0xff] }
  0xf4   :  { %4107 = vmatprep.subr.bf16.mxu0 %v7583_v0  ;;  %4322 = vmatprep.subr.bf16.mxu1 %v7585_v1  ;;  %v379_v0 = vld [vmem:[#allocation2 + $0x5c0] sm:$0xff] }
  0xf5   :  { %v383_v1 = vld [vmem:[#allocation2 + $0x5e0] sm:$0xff] }
  0xf6   :  { %v7647_v7 = vcombine.high %v379_v0, %v383_v1  ;;  %v7646_v13 = vcombine.low %v379_v0, %v383_v1  ;;  %v467_v35 = vld [vmem:[#allocation2 + $0x880] sm:$0xff] }
  0xf7   :  { %4108 = vmatpush1.bf16.msra.mxu0 %v7582_v6  ;;  %4323 = vmatpush1.bf16.msra.mxu1 %v7584_v9  ;;  %v7640_v6 = vcombine.low %v372_v57, %v376_v60  ;;  %v391_v9 = vld [vmem:[#allocation2 + $0x620] sm:$0xff] }
  0xf8   :  { %4120 = vmatprep.subr.bf16.mxu0 %v7591_v10  ;;  %4335 = vmatprep.subr.bf16.mxu1 %v7593_v11  ;;  %v388_v10 = vld [vmem:[#allocation2 + $0x608] sm:$0xff]  ;;  %v7649_v11 = vcombine.high %v380_v2, %v384_v4  ;;  %v7655_v16 = vcombine.high %v387_v8, %v391_v9  ;;  %v439_v60 = vld [vmem:[#allocation2 + $0x7a0] sm:$0xff] }
  0xf9   :  { %v7656_v23 = vcombine.low %v388_v10, %v392_v12  ;;  %v447_v4 = vld [vmem:[#allocation2 + $0x7e0] sm:$0xff] }
  0xfa   :  { %4110 = vmatmul.mubr.bf16.vlgmr.msra.gmra.mrb[0].mxu0 %v9529_v15  ;;  %4325 = vmatmul.mubr.bf16.vlgmr.msra.gmra.mrb[0].mxu1 %v9529_v15 }
  0xfb   :  { %4121 = vmatpush1.bf16.msra.mxu0 %v7590_v19  ;;  %4336 = vmatpush1.bf16.msra.mxu1 %v7592_v20  ;;  %v396_v19 = vld [vmem:[#allocation2 + $0x648] sm:$0xff]  ;;  %v7657_v20 = vcombine.high %v388_v10, %v392_v12  ;;  %v455_v12 = vld [vmem:[#allocation2 + $0x820] sm:$0xff] }
  0xfc   :  { %4122 = vmatprep.subr.bf16.mxu0 %v7599_v21  ;;  %4337 = vmatprep.subr.bf16.mxu1 %v7601_v22  ;;  %v400_v21 = vld [vmem:[#allocation2 + $0x668] sm:$0xff]  ;;  %v7654_v22 = vcombine.low %v387_v8, %v391_v9  ;;  %v451_v9 = vld [vmem:[#allocation2 + $0x800] sm:$0xff] }
  0xfd   :  { %4152 = vmatprep.mubr.bf16.mxu0 %v9537_v25  ;;  %4367 = vmatprep.mubr.bf16.mxu1 %v9537_v25  ;;  %v7664_v32 = vcombine.low %v396_v19, %v400_v21 }
  0xff   :  { %4123 = vmatpush1.bf16.msra.mxu0 %v7598_v28  ;;  %4338 = vmatpush1.bf16.msra.mxu1 %v7600_v29  ;;  %v404_v28 = vld [vmem:[#allocation2 + $0x688] sm:$0xff]  ;;  %v7665_v29 = vcombine.high %v396_v19, %v400_v21  ;;  %v463_v21 = vld [vmem:[#allocation2 + $0x860] sm:$0xff] }
 0x100   :  { %4124 = vmatprep.subr.bf16.mxu0 %v7607_v30  ;;  %4339 = vmatprep.subr.bf16.mxu1 %v7609_v33  ;;  %v408_v30 = vld [vmem:[#allocation2 + $0x6a8] sm:$0xff]  ;;  %v7671_v33 = vcombine.high %v403_v26, %v407_v27 }
 0x101   :  { %v7672_v40 = vcombine.low %v404_v28, %v408_v30  ;;  %v464_v26 = vld [vmem:[#allocation2 + $0x868] sm:$0xff] }
 0x102   :  { %v170_v27 = vld [vmem:[%s9703_s0 + $0x28] sm:$0xff] }
 0x103   :  { %4125 = vmatpush1.bf16.msra.mxu0 %v7606_v36  ;;  %4340 = vmatpush1.bf16.msra.mxu1 %v7608_v37  ;;  %v412_v36 = vld [vmem:[#allocation2 + $0x6c8] sm:$0xff]  ;;  %v7673_v37 = vcombine.high %v404_v28, %v408_v30  ;;  %v9555_v30 = vpack.c.bf16 %v177_v18, %v167_v17 }
 0x104   :  { %4126 = vmatprep.subr.bf16.mxu0 %v7615_v38  ;;  %4341 = vmatprep.subr.bf16.mxu1 %v7617_v42  ;;  %v416_v38 = vld [vmem:[#allocation2 + $0x6e8] sm:$0xff]  ;;  %v419_v42 = vld [vmem:[#allocation2 + $0x700] sm:$0xff] }
 0x105   :  { %v7680_v48 = vcombine.low %v412_v36, %v416_v38  ;;  %v7687_v49 = vcombine.high %v419_v42, %v423_v43  ;;  %v7686_v55 = vcombine.low %v419_v42, %v423_v43  ;;  %v475_v43 = vld [vmem:[#allocation2 + $0x8c0] sm:$0xff]  ;;  %v512_v17 = vld [vmem:[#allocation2 + $0x9e8] sm:$0xff] }
 0x107   :  { %4127 = vmatpush1.bf16.msra.mxu0 %v7614_v44  ;;  %4342 = vmatpush1.bf16.msra.mxu1 %v7616_v45  ;;  %v420_v44 = vld [vmem:[#allocation2 + $0x708] sm:$0xff]  ;;  %v7681_v45 = vcombine.high %v412_v36, %v416_v38  ;;  %v471_v36 = vld [vmem:[#allocation2 + $0x8a0] sm:$0xff] }
 0x108   :  { %4128 = vmatprep.subr.bf16.mxu0 %v7623_v46  ;;  %4343 = vmatprep.subr.bf16.mxu1 %v7625_v50  ;;  %v424_v46 = vld [vmem:[#allocation2 + $0x728] sm:$0xff]  ;;  %v427_v50 = vld [vmem:[#allocation2 + $0x740] sm:$0xff]  ;;  %v7735_v42 = vcombine.high %v467_v35, %v471_v36 }
 0x109   :  { %v7688_v56 = vcombine.low %v420_v44, %v424_v46  ;;  %v7695_v57 = vcombine.high %v427_v50, %v431_v51  ;;  %v7694_v0 = vcombine.low %v427_v50, %v431_v51  ;;  %v468_v38 = vld [vmem:[#allocation2 + $0x888] sm:$0xff]  ;;  %v483_v51 = vld [vmem:[#allocation2 + $0x900] sm:$0xff] }
 0x10b   :  { %4129 = vmatpush1.bf16.msra.mxu0 %v7622_v52  ;;  %4344 = vmatpush1.bf16.msra.mxu1 %v7624_v53  ;;  %v428_v52 = vld [vmem:[#allocation2 + $0x748] sm:$0xff]  ;;  %v7689_v53 = vcombine.high %v420_v44, %v424_v46  ;;  %v479_v44 = vld [vmem:[#allocation2 + $0x8e0] sm:$0xff] }
 0x10c   :  { %4130 = vmatprep.subr.bf16.mxu0 %v7631_v54  ;;  %4345 = vmatprep.subr.bf16.mxu1 %v7633_v59  ;;  %v432_v54 = vld [vmem:[#allocation2 + $0x768] sm:$0xff]  ;;  %v435_v59 = vld [vmem:[#allocation2 + $0x780] sm:$0xff]  ;;  %v7743_v50 = vcombine.high %v475_v43, %v479_v44 }
 0x10d   :  { %v7696_v1 = vcombine.low %v428_v52, %v432_v54  ;;  %v7703_v2 = vcombine.high %v435_v59, %v439_v60  ;;  %v7702_v8 = vcombine.low %v435_v59, %v439_v60  ;;  %v491_v60 = vld [vmem:[#allocation2 + $0x940] sm:$0xff] }
 0x10f   :  { %4131 = vmatpush1.bf16.msra.mxu0 %v7630_v61  ;;  %4346 = vmatpush1.bf16.msra.mxu1 %v7632_v62  ;;  %v436_v61 = vld [vmem:[#allocation2 + $0x788] sm:$0xff]  ;;  %v7697_v62 = vcombine.high %v428_v52, %v432_v54  ;;  %v487_v52 = vld [vmem:[#allocation2 + $0x920] sm:$0xff] }
 0x110   :  { %4132 = vmatprep.subr.bf16.mxu0 %v7639_v63  ;;  %4347 = vmatprep.subr.bf16.mxu1 %v7641_v3  ;;  %v440_v63 = vld [vmem:[#allocation2 + $0x7a8] sm:$0xff]  ;;  %v443_v3 = vld [vmem:[#allocation2 + $0x7c0] sm:$0xff]  ;;  %v7751_v59 = vcombine.high %v483_v51, %v487_v52 }
 0x111   :  { %v7704_v10 = vcombine.low %v436_v61, %v440_v63  ;;  %v7710_v19 = vcombine.low %v443_v3, %v447_v4 }
 0x113   :  { %4133 = vmatpush1.bf16.msra.mxu0 %v7638_v5  ;;  %4348 = vmatpush1.bf16.msra.mxu1 %v7640_v6  ;;  %v444_v5 = vld [vmem:[#allocation2 + $0x7c8] sm:$0xff]  ;;  %v7705_v6 = vcombine.high %v436_v61, %v440_v63  ;;  %v495_v61 = vld [vmem:[#allocation2 + $0x960] sm:$0xff] }
 0x114   :  { %4134 = vmatprep.subr.bf16.mxu0 %v7647_v7  ;;  %4349 = vmatprep.subr.bf16.mxu1 %v7649_v11  ;;  %v448_v7 = vld [vmem:[#allocation2 + $0x7e8] sm:$0xff]  ;;  %v7711_v11 = vcombine.high %v443_v3, %v447_v4  ;;  %v7759_v3 = vcombine.high %v491_v60, %v495_v61  ;;  %v499_v4 = vld [vmem:[#allocation2 + $0x980] sm:$0xff] }
 0x117   :  { %4135 = vmatpush1.bf16.msra.mxu0 %v7646_v13  ;;  %4350 = vmatpush1.bf16.msra.mxu1 %v7648_v14  ;;  %v452_v13 = vld [vmem:[#allocation2 + $0x808] sm:$0xff] }
 0x118   :  { %4136 = vmatprep.subr.bf16.mxu0 %v7655_v16  ;;  %4351 = vmatprep.subr.bf16.mxu1 %v7657_v20  ;;  %v456_v14 = vld [vmem:[#allocation2 + $0x828] sm:$0xff]  ;;  %v7713_v16 = vcombine.high %v444_v5, %v448_v7  ;;  %v459_v20 = vld [vmem:[#allocation2 + $0x840] sm:$0xff] }
 0x119   :  { %v7721_v28 = vcombine.high %v452_v13, %v456_v14 }
 0x11b   :  { %4137 = vmatpush1.bf16.msra.mxu0 %v7654_v22  ;;  %4352 = vmatpush1.bf16.msra.mxu1 %v7656_v23  ;;  %v7712_v22 = vcombine.low %v444_v5, %v448_v7  ;;  %v7719_v23 = vcombine.high %v451_v9, %v455_v12  ;;  %v503_v5 = vld [vmem:[#allocation2 + $0x9a0] sm:$0xff] }
 0x11c   :  { %4138 = vmatprep.subr.bf16.mxu0 %v7663_v24  ;;  %4353 = vmatprep.subr.bf16.mxu1 %v7665_v29  ;;  %v460_v24 = vld [vmem:[#allocation2 + $0x848] sm:$0xff]  ;;  %v180_v29 = vld [vmem:[%s9703_s0 + $0x78] sm:$0xff]  ;;  %v7766_v18 = vcombine.low %v499_v4, %v503_v5 }
 0x11d   :  { %v7729_v34 = vcombine.high %v460_v24, %v464_v26 }
 0x11f   :  { %4139 = vmatpush1.bf16.msra.mxu0 %v7662_v31  ;;  %4354 = vmatpush1.bf16.msra.mxu1 %v7664_v32  ;;  %v7718_v31 = vcombine.low %v451_v9, %v455_v12  ;;  %v7720_v32 = vcombine.low %v452_v13, %v456_v14  ;;  %v7758_v9 = vcombine.low %v491_v60, %v495_v61  ;;  %v507_v12 = vld [vmem:[#allocation2 + $0x9c0] sm:$0xff]  ;;  %v508_v14 = vld [vmem:[#allocation2 + $0x9c8] sm:$0xff] }
 0x120   :  { %4140 = vmatprep.subr.bf16.mxu0 %v7671_v33  ;;  %4355 = vmatprep.subr.bf16.mxu1 %v7673_v37  ;;  %v7727_v33 = vcombine.high %v459_v20, %v463_v21  ;;  %v9557_v37 = vpack.c.bf16 %v180_v29, %v170_v27  ;;  %v511_v13 = vld [vmem:[#allocation2 + $0x9e0] sm:$0xff]  ;;  %v552_v61 = vld [vmem:[#allocation2 + $0xb28] sm:$0xff] }
 0x121   :  { %v7774_v27 = vcombine.low %v507_v12, %v511_v13 }
 0x123   :  { %4141 = vmatpush1.bf16.msra.mxu0 %v7670_v39  ;;  %4356 = vmatpush1.bf16.msra.mxu1 %v7672_v40  ;;  %v472_v39 = vld [vmem:[#allocation2 + $0x8a8] sm:$0xff]  ;;  %v7726_v40 = vcombine.low %v459_v20, %v463_v21  ;;  %v7775_v20 = vcombine.high %v507_v12, %v511_v13  ;;  %v515_v21 = vld [vmem:[#allocation2 + $0xa00] sm:$0xff] }
 0x124   :  { %4142 = vmatprep.subr.bf16.mxu0 %v7679_v41  ;;  %4357 = vmatprep.subr.bf16.mxu1 %v7681_v45  ;;  %v7728_v41 = vcombine.low %v460_v24, %v464_v26  ;;  %v476_v45 = vld [vmem:[#allocation2 + $0x8c8] sm:$0xff]  ;;  %v7737_v46 = vcombine.high %v468_v38, %v472_v39  ;;  %v7777_v24 = vcombine.high %v508_v14, %v512_v17 }
 0x125   :  { %v520_v26 = vld [vmem:[#allocation2 + $0xa28] sm:$0xff] }
 0x126   :  { %v568_v13 = vld [vmem:[#allocation2 + $0xba8] sm:$0xff] }
 0x127   :  { %4143 = vmatpush1.bf16.msra.mxu0 %v7678_v47  ;;  %4358 = vmatpush1.bf16.msra.mxu1 %v7680_v48  ;;  %v480_v47 = vld [vmem:[#allocation2 + $0x8e8] sm:$0xff]  ;;  %v7734_v48 = vcombine.low %v467_v35, %v471_v36 }
 0x128   :  { %4144 = vmatprep.subr.bf16.mxu0 %v7687_v49  ;;  %4359 = vmatprep.subr.bf16.mxu1 %v7689_v53  ;;  %v7736_v49 = vcombine.low %v468_v38, %v472_v39  ;;  %v484_v53 = vld [vmem:[#allocation2 + $0x908] sm:$0xff]  ;;  %v7745_v54 = vcombine.high %v476_v45, %v480_v47 }
 0x129   :  { %v528_v35 = vld [vmem:[#allocation2 + $0xa68] sm:$0xff] }
 0x12b   :  { %4145 = vmatpush1.bf16.msra.mxu0 %v7686_v55  ;;  %4360 = vmatpush1.bf16.msra.mxu1 %v7688_v56  ;;  %v488_v55 = vld [vmem:[#allocation2 + $0x928] sm:$0xff]  ;;  %v7742_v56 = vcombine.low %v475_v43, %v479_v44 }
 0x12c   :  { %4146 = vmatprep.subr.bf16.mxu0 %v7695_v57  ;;  %4361 = vmatprep.subr.bf16.mxu1 %v7697_v62  ;;  %v7744_v57 = vcombine.low %v476_v45, %v480_v47  ;;  %v492_v62 = vld [vmem:[#allocation2 + $0x948] sm:$0xff]  ;;  %v7753_v63 = vcombine.high %v484_v53, %v488_v55 }
 0x12d   :  { %v536_v44 = vld [vmem:[#allocation2 + $0xaa8] sm:$0xff] }
 0x12f   :  { %4147 = vmatpush1.bf16.msra.mxu0 %v7694_v0  ;;  %4362 = vmatpush1.bf16.msra.mxu1 %v7696_v1  ;;  %v496_v0 = vld [vmem:[#allocation2 + $0x968] sm:$0xff]  ;;  %v7750_v1 = vcombine.low %v483_v51, %v487_v52 }
 0x130   :  { %4148 = vmatprep.subr.bf16.mxu0 %v7703_v2  ;;  %4363 = vmatprep.subr.bf16.mxu1 %v7705_v6  ;;  %v7752_v2 = vcombine.low %v484_v53, %v488_v55  ;;  %v500_v6 = vld [vmem:[#allocation2 + $0x988] sm:$0xff]  ;;  %v7761_v7 = vcombine.high %v492_v62, %v496_v0 }
 0x131   :  { %v544_v52 = vld [vmem:[#allocation2 + $0xae8] sm:$0xff] }
 0x133   :  { %4149 = vmatpush1.bf16.msra.mxu0 %v7702_v8  ;;  %4364 = vmatpush1.bf16.msra.mxu1 %v7704_v10  ;;  %v504_v8 = vld [vmem:[#allocation2 + $0x9a8] sm:$0xff]  ;;  %v7760_v10 = vcombine.low %v492_v62, %v496_v0 }
 0x134   :  { %4150 = vmatprep.subr.bf16.mxu0 %v7711_v11  ;;  %4365 = vmatprep.subr.bf16.mxu1 %v7713_v16  ;;  %v7767_v11 = vcombine.high %v499_v4, %v503_v5  ;;  %v7769_v16 = vcombine.high %v500_v6, %v504_v8  ;;  %v560_v5 = vld [vmem:[#allocation2 + $0xb68] sm:$0xff] }
 0x137   :  { %4151 = vmatpush1.bf16.msra.mxu0 %v7710_v19  ;;  %4366 = vmatpush1.bf16.msra.mxu1 %v7712_v22  ;;  %v7768_v19 = vcombine.low %v500_v6, %v504_v8  ;;  %v519_v22 = vld [vmem:[#allocation2 + $0xa20] sm:$0xff] }
 0x138   :  { %4163 = vmatprep.subr.bf16.mxu0 %v7719_v23  ;;  %4378 = vmatprep.subr.bf16.mxu1 %v7721_v28  ;;  %v516_v23 = vld [vmem:[#allocation2 + $0xa08] sm:$0xff]  ;;  %v7776_v28 = vcombine.low %v508_v14, %v512_v17  ;;  %v7783_v29 = vcombine.high %v515_v21, %v519_v22  ;;  %v7782_v36 = vcombine.low %v515_v21, %v519_v22 }
 0x139   :  { %v7784_v38 = vcombine.low %v516_v23, %v520_v26  ;;  %v576_v22 = vld [vmem:[#allocation2 + $0xbe8] sm:$0xff] }
 0x13a   :  { %4153 = vmatmul.mubr.bf16.vlgmr.msra.gmra.mrb[0].mxu0 %v9555_v30  ;;  %4368 = vmatmul.mubr.bf16.vlgmr.msra.gmra.mrb[0].mxu1 %v9555_v30 }
 0x13b   :  { %4164 = vmatpush1.bf16.msra.mxu0 %v7718_v31  ;;  %4379 = vmatpush1.bf16.msra.mxu1 %v7720_v32  ;;  %v523_v31 = vld [vmem:[#allocation2 + $0xa40] sm:$0xff] }
 0x13c   :  { %4165 = vmatprep.subr.bf16.mxu0 %v7727_v33  ;;  %4380 = vmatprep.subr.bf16.mxu1 %v7729_v34  ;;  %v527_v32 = vld [vmem:[#allocation2 + $0xa60] sm:$0xff]  ;;  %v524_v33 = vld [vmem:[#allocation2 + $0xa48] sm:$0xff]  ;;  %v7785_v34 = vcombine.high %v516_v23, %v520_v26 }
 0x13d   :  { %4195 = vmatprep.mubr.bf16.mxu0 %v9557_v37  ;;  %4410 = vmatprep.mubr.bf16.mxu1 %v9557_v37  ;;  %v7791_v39 = vcombine.high %v523_v31, %v527_v32  ;;  %v7793_v43 = vcombine.high %v524_v33, %v528_v35  ;;  %v7790_v45 = vcombine.low %v523_v31, %v527_v32  ;;  %v584_v31 = vld [vmem:[#allocation2 + $0xc28] sm:$0xff] }
 0x13f   :  { %4166 = vmatpush1.bf16.msra.mxu0 %v7726_v40  ;;  %4381 = vmatpush1.bf16.msra.mxu1 %v7728_v41  ;;  %v531_v40 = vld [vmem:[#allocation2 + $0xa80] sm:$0xff] }
 0x140   :  { %4167 = vmatprep.subr.bf16.mxu0 %v7735_v42  ;;  %4382 = vmatprep.subr.bf16.mxu1 %v7737_v46  ;;  %v535_v41 = vld [vmem:[#allocation2 + $0xaa0] sm:$0xff]  ;;  %v532_v42 = vld [vmem:[#allocation2 + $0xa88] sm:$0xff]  ;;  %v7792_v46 = vcombine.low %v524_v33, %v528_v35 }
 0x141   :  { %v7799_v47 = vcombine.high %v531_v40, %v535_v41  ;;  %v7801_v51 = vcombine.high %v532_v42, %v536_v44  ;;  %v7798_v53 = vcombine.low %v531_v40, %v535_v41  ;;  %v169_v33 = vld [vmem:[%s9703_s0 + $0x20] sm:$0xff]  ;;  %v588_v41 = vld [vmem:[#allocation2 + $0xc48] sm:$0xff] }
 0x143   :  { %4168 = vmatpush1.bf16.msra.mxu0 %v7734_v48  ;;  %4383 = vmatpush1.bf16.msra.mxu1 %v7736_v49  ;;  %v539_v48 = vld [vmem:[#allocation2 + $0xac0] sm:$0xff] }
 0x144   :  { %4169 = vmatprep.subr.bf16.mxu0 %v7743_v50  ;;  %4384 = vmatprep.subr.bf16.mxu1 %v7745_v54  ;;  %v543_v49 = vld [vmem:[#allocation2 + $0xae0] sm:$0xff]  ;;  %v540_v50 = vld [vmem:[#allocation2 + $0xac8] sm:$0xff]  ;;  %v7800_v54 = vcombine.low %v532_v42, %v536_v44 }
 0x145   :  { %v7807_v55 = vcombine.high %v539_v48, %v543_v49  ;;  %v7809_v60 = vcombine.high %v540_v50, %v544_v52  ;;  %v7806_v62 = vcombine.low %v539_v48, %v543_v49  ;;  %v592_v42 = vld [vmem:[#allocation2 + $0xc68] sm:$0xff] }
 0x147   :  { %4170 = vmatpush1.bf16.msra.mxu0 %v7742_v56  ;;  %4385 = vmatpush1.bf16.msra.mxu1 %v7744_v57  ;;  %v547_v56 = vld [vmem:[#allocation2 + $0xb00] sm:$0xff] }
 0x148   :  { %4171 = vmatprep.subr.bf16.mxu0 %v7751_v59  ;;  %4386 = vmatprep.subr.bf16.mxu1 %v7753_v63  ;;  %v551_v57 = vld [vmem:[#allocation2 + $0xb20] sm:$0xff]  ;;  %v548_v59 = vld [vmem:[#allocation2 + $0xb08] sm:$0xff]  ;;  %v7808_v63 = vcombine.low %v540_v50, %v544_v52 }
 0x149   :  { %v7815_v0 = vcombine.high %v547_v56, %v551_v57  ;;  %v7817_v4 = vcombine.high %v548_v59, %v552_v61  ;;  %v7814_v6 = vcombine.low %v547_v56, %v551_v57  ;;  %v595_v50 = vld [vmem:[#allocation2 + $0xc80] sm:$0xff]  ;;  %v7856_v57 = vcombine.low %v588_v41, %v592_v42 }
 0x14a   :  { %v599_v52 = vld [vmem:[#allocation2 + $0xca0] sm:$0xff] }
 0x14b   :  { %4172 = vmatpush1.bf16.msra.mxu0 %v7750_v1  ;;  %4387 = vmatpush1.bf16.msra.mxu1 %v7752_v2  ;;  %v555_v1 = vld [vmem:[#allocation2 + $0xb40] sm:$0xff] }
 0x14c   :  { %4173 = vmatprep.subr.bf16.mxu0 %v7759_v3  ;;  %4388 = vmatprep.subr.bf16.mxu1 %v7761_v7  ;;  %v559_v2 = vld [vmem:[#allocation2 + $0xb60] sm:$0xff]  ;;  %v556_v3 = vld [vmem:[#allocation2 + $0xb48] sm:$0xff]  ;;  %v7816_v7 = vcombine.low %v548_v59, %v552_v61  ;;  %v7863_v59 = vcombine.high %v595_v50, %v599_v52 }
 0x14d   :  { %v7823_v8 = vcombine.high %v555_v1, %v559_v2  ;;  %v7825_v12 = vcombine.high %v556_v3, %v560_v5  ;;  %v7822_v14 = vcombine.low %v555_v1, %v559_v2  ;;  %v607_v61 = vld [vmem:[#allocation2 + $0xce0] sm:$0xff]  ;;  %v7862_v1 = vcombine.low %v595_v50, %v599_v52 }
 0x14e   :  { %v655_v50 = vld [vmem:[#allocation2 + $0xe60] sm:$0xff] }
 0x14f   :  { %4174 = vmatpush1.bf16.msra.mxu0 %v7758_v9  ;;  %4389 = vmatpush1.bf16.msra.mxu1 %v7760_v10  ;;  %v563_v9 = vld [vmem:[#allocation2 + $0xb80] sm:$0xff] }
 0x150   :  { %4175 = vmatprep.subr.bf16.mxu0 %v7767_v11  ;;  %4390 = vmatprep.subr.bf16.mxu1 %v7769_v16  ;;  %v567_v10 = vld [vmem:[#allocation2 + $0xba0] sm:$0xff]  ;;  %v564_v11 = vld [vmem:[#allocation2 + $0xb88] sm:$0xff]  ;;  %v7824_v16 = vcombine.low %v556_v3, %v560_v5 }
 0x151   :  { %v7831_v17 = vcombine.high %v563_v9, %v567_v10  ;;  %v7833_v21 = vcombine.high %v564_v11, %v568_v13  ;;  %v7830_v23 = vcombine.low %v563_v9, %v567_v10  ;;  %v7832_v26 = vcombine.low %v564_v11, %v568_v13  ;;  %v615_v5 = vld [vmem:[#allocation2 + $0xd20] sm:$0xff] }
 0x152   :  { %v623_v13 = vld [vmem:[#allocation2 + $0xd60] sm:$0xff] }
 0x153   :  { %4176 = vmatpush1.bf16.msra.mxu0 %v7766_v18  ;;  %4391 = vmatpush1.bf16.msra.mxu1 %v7768_v19  ;;  %v571_v18 = vld [vmem:[#allocation2 + $0xbc0] sm:$0xff] }
 0x154   :  { %4177 = vmatprep.subr.bf16.mxu0 %v7775_v20  ;;  %4392 = vmatprep.subr.bf16.mxu1 %v7777_v24  ;;  %v575_v19 = vld [vmem:[#allocation2 + $0xbe0] sm:$0xff]  ;;  %v572_v20 = vld [vmem:[#allocation2 + $0xbc8] sm:$0xff] }
 0x155   :  { %v579_v24 = vld [vmem:[#allocation2 + $0xc00] sm:$0xff]  ;;  %v7841_v32 = vcombine.high %v572_v20, %v576_v22  ;;  %v7838_v35 = vcombine.low %v571_v18, %v575_v19 }
 0x157   :  { %4178 = vmatpush1.bf16.msra.mxu0 %v7774_v27  ;;  %4393 = vmatpush1.bf16.msra.mxu1 %v7776_v28  ;;  %v7839_v27 = vcombine.high %v571_v18, %v575_v19  ;;  %v583_v28 = vld [vmem:[#allocation2 + $0xc20] sm:$0xff] }
 0x158   :  { %4179 = vmatprep.subr.bf16.mxu0 %v7783_v29  ;;  %4394 = vmatprep.subr.bf16.mxu1 %v7785_v34  ;;  %v580_v29 = vld [vmem:[#allocation2 + $0xc08] sm:$0xff]  ;;  %v179_v34 = vld [vmem:[%s9703_s0 + $0x70] sm:$0xff]  ;;  %v7847_v40 = vcombine.high %v579_v24, %v583_v28 }
 0x159   :  { %v7849_v44 = vcombine.high %v580_v29, %v584_v31  ;;  %v7848_v48 = vcombine.low %v580_v29, %v584_v31  ;;  %v635_v31 = vld [vmem:[#allocation2 + $0xdc0] sm:$0xff] }
 0x15b   :  { %4180 = vmatpush1.bf16.msra.mxu0 %v7782_v36  ;;  %4395 = vmatpush1.bf16.msra.mxu1 %v7784_v38  ;;  %v587_v36 = vld [vmem:[#allocation2 + $0xc40] sm:$0xff] }
 0x15c   :  { %4181 = vmatprep.subr.bf16.mxu0 %v7791_v39  ;;  %4396 = vmatprep.subr.bf16.mxu1 %v7793_v43  ;;  %v591_v38 = vld [vmem:[#allocation2 + $0xc60] sm:$0xff]  ;;  %v7840_v39 = vcombine.low %v572_v20, %v576_v22  ;;  %v172_v43 = vld [vmem:[%s9703_s0 + $0x38] sm:$0xff] }
 0x15d   :  { %v7855_v49 = vcombine.high %v587_v36, %v591_v38  ;;  %v7854_v56 = vcombine.low %v587_v36, %v591_v38  ;;  %v631_v22 = vld [vmem:[#allocation2 + $0xda0] sm:$0xff] }
 0x15f   :  { %4182 = vmatpush1.bf16.msra.mxu0 %v7790_v45  ;;  %4397 = vmatpush1.bf16.msra.mxu1 %v7792_v46  ;;  %v182_v45 = vld [vmem:[%s9703_s0 + $0x88] sm:$0xff]  ;;  %v9575_v46 = vpack.c.bf16 %v179_v34, %v169_v33 }
 0x160   :  { %4183 = vmatprep.subr.bf16.mxu0 %v7799_v47  ;;  %4398 = vmatprep.subr.bf16.mxu1 %v7801_v51  ;;  %v7846_v47 = vcombine.low %v579_v24, %v583_v28  ;;  %v7857_v51 = vcombine.high %v588_v41, %v592_v42  ;;  %v636_v33 = vld [vmem:[#allocation2 + $0xdc8] sm:$0xff]  ;;  %v647_v41 = vld [vmem:[#allocation2 + $0xe20] sm:$0xff] }
 0x161   :  { %v644_v42 = vld [vmem:[#allocation2 + $0xe08] sm:$0xff] }
 0x163   :  { %4184 = vmatpush1.bf16.msra.mxu0 %v7798_v53  ;;  %4399 = vmatpush1.bf16.msra.mxu1 %v7800_v54  ;;  %v596_v53 = vld [vmem:[#allocation2 + $0xc88] sm:$0xff] }
 0x164   :  { %4185 = vmatprep.subr.bf16.mxu0 %v7807_v55  ;;  %4400 = vmatprep.subr.bf16.mxu1 %v7809_v60  ;;  %v600_v54 = vld [vmem:[#allocation2 + $0xca8] sm:$0xff]  ;;  %v9577_v55 = vpack.c.bf16 %v182_v45, %v172_v43  ;;  %v603_v60 = vld [vmem:[#allocation2 + $0xcc0] sm:$0xff] }
 0x165   :  { %v7864_v2 = vcombine.low %v596_v53, %v600_v54  ;;  %v7871_v3 = vcombine.high %v603_v60, %v607_v61  ;;  %v7870_v9 = vcombine.low %v603_v60, %v607_v61  ;;  %v663_v60 = vld [vmem:[#allocation2 + $0xea0] sm:$0xff]  ;;  %v660_v61 = vld [vmem:[#allocation2 + $0xe88] sm:$0xff] }
 0x167   :  { %4186 = vmatpush1.bf16.msra.mxu0 %v7806_v62  ;;  %4401 = vmatpush1.bf16.msra.mxu1 %v7808_v63  ;;  %v604_v62 = vld [vmem:[#allocation2 + $0xcc8] sm:$0xff]  ;;  %v7865_v63 = vcombine.high %v596_v53, %v600_v54 }
 0x168   :  { %4187 = vmatprep.subr.bf16.mxu0 %v7815_v0  ;;  %4402 = vmatprep.subr.bf16.mxu1 %v7817_v4  ;;  %v608_v0 = vld [vmem:[#allocation2 + $0xce8] sm:$0xff]  ;;  %v611_v4 = vld [vmem:[#allocation2 + $0xd00] sm:$0xff] }
 0x169   :  { %v7872_v10 = vcombine.low %v604_v62, %v608_v0  ;;  %v7879_v11 = vcombine.high %v611_v4, %v615_v5  ;;  %v7878_v18 = vcombine.low %v611_v4, %v615_v5  ;;  %v656_v53 = vld [vmem:[#allocation2 + $0xe68] sm:$0xff]  ;;  %v671_v4 = vld [vmem:[#allocation2 + $0xee0] sm:$0xff] }
 0x16a   :  { %v668_v5 = vld [vmem:[#allocation2 + $0xec8] sm:$0xff] }
 0x16b   :  { %4188 = vmatpush1.bf16.msra.mxu0 %v7814_v6  ;;  %4403 = vmatpush1.bf16.msra.mxu1 %v7816_v7  ;;  %v612_v6 = vld [vmem:[#allocation2 + $0xd08] sm:$0xff]  ;;  %v7873_v7 = vcombine.high %v604_v62, %v608_v0 }
 0x16c   :  { %4189 = vmatprep.subr.bf16.mxu0 %v7823_v8  ;;  %4404 = vmatprep.subr.bf16.mxu1 %v7825_v12  ;;  %v616_v8 = vld [vmem:[#allocation2 + $0xd28] sm:$0xff]  ;;  %v619_v12 = vld [vmem:[#allocation2 + $0xd40] sm:$0xff] }
 0x16d   :  { %v7880_v19 = vcombine.low %v612_v6, %v616_v8  ;;  %v7887_v20 = vcombine.high %v619_v12, %v623_v13 }
 0x16f   :  { %4190 = vmatpush1.bf16.msra.mxu0 %v7822_v14  ;;  %4405 = vmatpush1.bf16.msra.mxu1 %v7824_v16  ;;  %v620_v14 = vld [vmem:[#allocation2 + $0xd48] sm:$0xff]  ;;  %v7881_v16 = vcombine.high %v612_v6, %v616_v8 }
 0x170   :  { %4191 = vmatprep.subr.bf16.mxu0 %v7831_v17  ;;  %4406 = vmatprep.subr.bf16.mxu1 %v7833_v21  ;;  %v624_v17 = vld [vmem:[#allocation2 + $0xd68] sm:$0xff]  ;;  %v627_v21 = vld [vmem:[#allocation2 + $0xd80] sm:$0xff] }
 0x171   :  { %v7889_v24 = vcombine.high %v620_v14, %v624_v17  ;;  %v7888_v28 = vcombine.low %v620_v14, %v624_v17  ;;  %v7895_v29 = vcombine.high %v627_v21, %v631_v22  ;;  %v7894_v36 = vcombine.low %v627_v21, %v631_v22  ;;  %v687_v21 = vld [vmem:[#allocation2 + $0xf60] sm:$0xff]  ;;  %v684_v22 = vld [vmem:[#allocation2 + $0xf48] sm:$0xff] }
 0x173   :  { %4192 = vmatpush1.bf16.msra.mxu0 %v7830_v23  ;;  %4407 = vmatpush1.bf16.msra.mxu1 %v7832_v26  ;;  %v628_v23 = vld [vmem:[#allocation2 + $0xd88] sm:$0xff] }
 0x174   :  { %4193 = vmatprep.subr.bf16.mxu0 %v7839_v27  ;;  %4408 = vmatprep.subr.bf16.mxu1 %v7841_v32  ;;  %v632_v26 = vld [vmem:[#allocation2 + $0xda8] sm:$0xff]  ;;  %v7886_v27 = vcombine.low %v619_v12, %v623_v13  ;;  %v639_v32 = vld [vmem:[#allocation2 + $0xde0] sm:$0xff] }
 0x175   :  { %v7897_v34 = vcombine.high %v628_v23, %v632_v26  ;;  %v7896_v38 = vcombine.low %v628_v23, %v632_v26  ;;  %v7902_v45 = vcombine.low %v635_v31, %v639_v32  ;;  %v679_v12 = vld [vmem:[#allocation2 + $0xf20] sm:$0xff]  ;;  %v676_v13 = vld [vmem:[#allocation2 + $0xf08] sm:$0xff] }
 0x177   :  { %4194 = vmatpush1.bf16.msra.mxu0 %v7838_v35  ;;  %4409 = vmatpush1.bf16.msra.mxu1 %v7840_v39  ;;  %v640_v35 = vld [vmem:[#allocation2 + $0xde8] sm:$0xff]  ;;  %v7903_v39 = vcombine.high %v635_v31, %v639_v32  ;;  %v695_v31 = vld [vmem:[#allocation2 + $0xfa0] sm:$0xff] }
 0x178   :  { %4206 = vmatprep.subr.bf16.mxu0 %v7847_v40  ;;  %4421 = vmatprep.subr.bf16.mxu1 %v7849_v44  ;;  %v643_v40 = vld [vmem:[#allocation2 + $0xe00] sm:$0xff]  ;;  %v7905_v43 = vcombine.high %v636_v33, %v640_v35  ;;  %v648_v44 = vld [vmem:[#allocation2 + $0xe28] sm:$0xff] }
 0x179   :  { %v7913_v52 = vcombine.high %v644_v42, %v648_v44  ;;  %v7910_v54 = vcombine.low %v643_v40, %v647_v41  ;;  %v692_v32 = vld [vmem:[#allocation2 + $0xf88] sm:$0xff] }
 0x17a   :  { %4196 = vmatmul.mubr.bf16.vlgmr.msra.gmra.mrb[0].mxu0 %v9575_v46  ;;  %4411 = vmatmul.mubr.bf16.vlgmr.msra.gmra.mrb[0].mxu1 %v9575_v46 }
 0x17b   :  { %4207 = vmatpush1.bf16.msra.mxu0 %v7846_v47  ;;  %4422 = vmatpush1.bf16.msra.mxu1 %v7848_v48  ;;  %v7904_v47 = vcombine.low %v636_v33, %v640_v35  ;;  %v7911_v48 = vcombine.high %v643_v40, %v647_v41  ;;  %v703_v40 = vld [vmem:[#allocation2 + $0xfe0] sm:$0xff]  ;;  %v700_v41 = vld [vmem:[#allocation2 + $0xfc8] sm:$0xff] }
 0x17c   :  { %4208 = vmatprep.subr.bf16.mxu0 %v7855_v49  ;;  %4423 = vmatprep.subr.bf16.mxu1 %v7857_v51  ;;  %v651_v49 = vld [vmem:[#allocation2 + $0xe40] sm:$0xff]  ;;  %v652_v51 = vld [vmem:[#allocation2 + $0xe48] sm:$0xff] }
 0x17d   :  { %4238 = vmatprep.mubr.bf16.mxu0 %v9577_v55  ;;  %4453 = vmatprep.mubr.bf16.mxu1 %v9577_v55  ;;  %v7921_v62 = vcombine.high %v652_v51, %v656_v53  ;;  %v7918_v0 = vcombine.low %v651_v49, %v655_v50 }
 0x17f   :  { %4209 = vmatpush1.bf16.msra.mxu0 %v7854_v56  ;;  %4424 = vmatpush1.bf16.msra.mxu1 %v7856_v57  ;;  %v7912_v56 = vcombine.low %v644_v42, %v648_v44  ;;  %v7919_v57 = vcombine.high %v651_v49, %v655_v50  ;;  %v707_v49 = vld [vmem:[#allocation2 + $0x1000] sm:$0xff] }
 0x180   :  { %4210 = vmatprep.subr.bf16.mxu0 %v7863_v59  ;;  %4425 = vmatprep.subr.bf16.mxu1 %v7865_v63  ;;  %v659_v59 = vld [vmem:[#allocation2 + $0xe80] sm:$0xff]  ;;  %v664_v63 = vld [vmem:[#allocation2 + $0xea8] sm:$0xff] }
 0x181   :  { %v7929_v6 = vcombine.high %v660_v61, %v664_v63  ;;  %v7926_v8 = vcombine.low %v659_v59, %v663_v60  ;;  %v711_v50 = vld [vmem:[#allocation2 + $0x1020] sm:$0xff] }
 0x183   :  { %4211 = vmatpush1.bf16.msra.mxu0 %v7862_v1  ;;  %4426 = vmatpush1.bf16.msra.mxu1 %v7864_v2  ;;  %v7920_v1 = vcombine.low %v652_v51, %v656_v53  ;;  %v7927_v2 = vcombine.high %v659_v59, %v663_v60  ;;  %v708_v51 = vld [vmem:[#allocation2 + $0x1008] sm:$0xff]  ;;  %v7975_v59 = vcombine.high %v707_v49, %v711_v50 }
 0x184   :  { %4212 = vmatprep.subr.bf16.mxu0 %v7871_v3  ;;  %4427 = vmatprep.subr.bf16.mxu1 %v7873_v7  ;;  %v667_v3 = vld [vmem:[#allocation2 + $0xec0] sm:$0xff]  ;;  %v672_v7 = vld [vmem:[#allocation2 + $0xee8] sm:$0xff] }
 0x185   :  { %v7937_v14 = vcombine.high %v668_v5, %v672_v7  ;;  %v7934_v17 = vcombine.low %v667_v3, %v671_v4 }
 0x187   :  { %4213 = vmatpush1.bf16.msra.mxu0 %v7870_v9  ;;  %4428 = vmatpush1.bf16.msra.mxu1 %v7872_v10  ;;  %v7928_v9 = vcombine.low %v660_v61, %v664_v63  ;;  %v7935_v10 = vcombine.high %v667_v3, %v671_v4  ;;  %v715_v61 = vld [vmem:[#allocation2 + $0x1040] sm:$0xff]  ;;  %v716_v63 = vld [vmem:[#allocation2 + $0x1048] sm:$0xff]  ;;  %v184_v3 = vld [vmem:[%s9703_s0 + $0x98] sm:$0xff]  ;;  %v7974_v4 = vcombine.low %v707_v49, %v711_v50 }
 0x188   :  { %4214 = vmatprep.subr.bf16.mxu0 %v7879_v11  ;;  %4429 = vmatprep.subr.bf16.mxu1 %v7881_v16  ;;  %v675_v11 = vld [vmem:[#allocation2 + $0xf00] sm:$0xff]  ;;  %v680_v16 = vld [vmem:[#allocation2 + $0xf28] sm:$0xff] }
 0x189   :  { %v7945_v23 = vcombine.high %v676_v13, %v680_v16  ;;  %v7942_v26 = vcombine.low %v675_v11, %v679_v12  ;;  %v760_v49 = vld [vmem:[#allocation2 + $0x11a8] sm:$0xff] }
 0x18b   :  { %4215 = vmatpush1.bf16.msra.mxu0 %v7878_v18  ;;  %4430 = vmatpush1.bf16.msra.mxu1 %v7880_v19  ;;  %v7936_v18 = vcombine.low %v668_v5, %v672_v7  ;;  %v7943_v19 = vcombine.high %v675_v11, %v679_v12  ;;  %v724_v11 = vld [vmem:[#allocation2 + $0x1088] sm:$0xff] }
 0x18c   :  { %4216 = vmatprep.subr.bf16.mxu0 %v7887_v20  ;;  %4431 = vmatprep.subr.bf16.mxu1 %v7889_v24  ;;  %v683_v20 = vld [vmem:[#allocation2 + $0xf40] sm:$0xff]  ;;  %v688_v24 = vld [vmem:[#allocation2 + $0xf68] sm:$0xff] }
 0x18d   :  { %v7953_v33 = vcombine.high %v684_v22, %v688_v24  ;;  %v7950_v35 = vcombine.low %v683_v20, %v687_v21  ;;  %v728_v12 = vld [vmem:[#allocation2 + $0x10a8] sm:$0xff] }
 0x18f   :  { %4217 = vmatpush1.bf16.msra.mxu0 %v7886_v27  ;;  %4432 = vmatpush1.bf16.msra.mxu1 %v7888_v28  ;;  %v7944_v27 = vcombine.low %v676_v13, %v680_v16  ;;  %v7951_v28 = vcombine.high %v683_v20, %v687_v21  ;;  %v732_v20 = vld [vmem:[#allocation2 + $0x10c8] sm:$0xff] }
 0x190   :  { %4218 = vmatprep.subr.bf16.mxu0 %v7895_v29  ;;  %4433 = vmatprep.subr.bf16.mxu1 %v7897_v34  ;;  %v691_v29 = vld [vmem:[#allocation2 + $0xf80] sm:$0xff]  ;;  %v696_v34 = vld [vmem:[#allocation2 + $0xfa8] sm:$0xff] }
 0x191   :  { %v7961_v42 = vcombine.high %v692_v32, %v696_v34  ;;  %v7958_v44 = vcombine.low %v691_v29, %v695_v31  ;;  %v736_v21 = vld [vmem:[#allocation2 + $0x10e8] sm:$0xff] }
 0x193   :  { %4219 = vmatpush1.bf16.msra.mxu0 %v7894_v36  ;;  %4434 = vmatpush1.bf16.msra.mxu1 %v7896_v38  ;;  %v7952_v36 = vcombine.low %v684_v22, %v688_v24  ;;  %v7959_v38 = vcombine.high %v691_v29, %v695_v31  ;;  %v740_v29 = vld [vmem:[#allocation2 + $0x1108] sm:$0xff] }
 0x194   :  { %4220 = vmatprep.subr.bf16.mxu0 %v7903_v39  ;;  %4435 = vmatprep.subr.bf16.mxu1 %v7905_v43  ;;  %v699_v39 = vld [vmem:[#allocation2 + $0xfc0] sm:$0xff]  ;;  %v704_v43 = vld [vmem:[#allocation2 + $0xfe8] sm:$0xff] }
 0x195   :  { %v7966_v53 = vcombine.low %v699_v39, %v703_v40  ;;  %v744_v31 = vld [vmem:[#allocation2 + $0x1128] sm:$0xff] }
 0x197   :  { %4221 = vmatpush1.bf16.msra.mxu0 %v7902_v45  ;;  %4436 = vmatpush1.bf16.msra.mxu1 %v7904_v47  ;;  %v7960_v45 = vcombine.low %v692_v32, %v696_v34  ;;  %v7967_v47 = vcombine.high %v699_v39, %v703_v40  ;;  %v748_v39 = vld [vmem:[#allocation2 + $0x1148] sm:$0xff] }
 0x198   :  { %4222 = vmatprep.subr.bf16.mxu0 %v7911_v48  ;;  %4437 = vmatprep.subr.bf16.mxu1 %v7913_v52  ;;  %v7969_v48 = vcombine.high %v700_v41, %v704_v43  ;;  %v712_v52 = vld [vmem:[#allocation2 + $0x1028] sm:$0xff] }
 0x199   :  { %v7977_v60 = vcombine.high %v708_v51, %v712_v52  ;;  %v7976_v5 = vcombine.low %v708_v51, %v712_v52  ;;  %v752_v40 = vld [vmem:[#allocation2 + $0x1168] sm:$0xff] }
 0x19a   :  { %v8016_v51 = vcombine.low %v748_v39, %v752_v40 }
 0x19b   :  { %4223 = vmatpush1.bf16.msra.mxu0 %v7910_v54  ;;  %4438 = vmatpush1.bf16.msra.mxu1 %v7912_v56  ;;  %v171_v54 = vld [vmem:[%s9703_s0 + $0x30] sm:$0xff]  ;;  %v181_v56 = vld [vmem:[%s9703_s0 + $0x80] sm:$0xff] }
 0x19c   :  { %4224 = vmatprep.subr.bf16.mxu0 %v7919_v57  ;;  %4439 = vmatprep.subr.bf16.mxu1 %v7921_v62  ;;  %v7968_v57 = vcombine.low %v700_v41, %v704_v43  ;;  %v719_v62 = vld [vmem:[#allocation2 + $0x1060] sm:$0xff] }
 0x19d   :  { %v7982_v13 = vcombine.low %v715_v61, %v719_v62 }
 0x19f   :  { %4225 = vmatpush1.bf16.msra.mxu0 %v7918_v0  ;;  %4440 = vmatpush1.bf16.msra.mxu1 %v7920_v1  ;;  %v9589_v0 = vpack.c.bf16 %v181_v56, %v171_v54  ;;  %v720_v1 = vld [vmem:[#allocation2 + $0x1068] sm:$0xff]  ;;  %v763_v54 = vld [vmem:[#allocation2 + $0x11c0] sm:$0xff] }
 0x1a0   :  { %4226 = vmatprep.subr.bf16.mxu0 %v7927_v2  ;;  %4441 = vmatprep.subr.bf16.mxu1 %v7929_v6  ;;  %v174_v2 = vld [vmem:[%s9703_s0 + $0x48] sm:$0xff]  ;;  %v7983_v6 = vcombine.high %v715_v61, %v719_v62  ;;  %v7985_v7 = vcombine.high %v716_v63, %v720_v1  ;;  %v767_v56 = vld [vmem:[#allocation2 + $0x11e0] sm:$0xff] }
 0x1a1   :  { %v8031_v62 = vcombine.high %v763_v54, %v767_v56 }
 0x1a3   :  { %4227 = vmatpush1.bf16.msra.mxu0 %v7926_v8  ;;  %4442 = vmatpush1.bf16.msra.mxu1 %v7928_v9  ;;  %v723_v8 = vld [vmem:[#allocation2 + $0x1080] sm:$0xff] }
 0x1a4   :  { %4228 = vmatprep.subr.bf16.mxu0 %v7935_v10  ;;  %4443 = vmatprep.subr.bf16.mxu1 %v7937_v14  ;;  %v727_v9 = vld [vmem:[#allocation2 + $0x10a0] sm:$0xff]  ;;  %v9597_v10 = vpack.c.bf16 %v184_v3, %v174_v2  ;;  %v7984_v14 = vcombine.low %v716_v63, %v720_v1  ;;  %v772_v3 = vld [vmem:[#allocation2 + $0x1208] sm:$0xff] }
 0x1a5   :  { %v7991_v16 = vcombine.high %v723_v8, %v727_v9  ;;  %v7990_v22 = vcombine.low %v723_v8, %v727_v9  ;;  %v771_v1 = vld [vmem:[#allocation2 + $0x1200] sm:$0xff] }
 0x1a6   :  { %v775_v2 = vld [vmem:[#allocation2 + $0x1220] sm:$0xff] }
 0x1a7   :  { %4229 = vmatpush1.bf16.msra.mxu0 %v7934_v17  ;;  %4444 = vmatpush1.bf16.msra.mxu1 %v7936_v18  ;;  %v7993_v17 = vcombine.high %v724_v11, %v728_v12  ;;  %v731_v18 = vld [vmem:[#allocation2 + $0x10c0] sm:$0xff] }
 0x1a8   :  { %4230 = vmatprep.subr.bf16.mxu0 %v7943_v19  ;;  %4445 = vmatprep.subr.bf16.mxu1 %v7945_v23  ;;  %v735_v19 = vld [vmem:[#allocation2 + $0x10e0] sm:$0xff]  ;;  %v7992_v23 = vcombine.low %v724_v11, %v728_v12  ;;  %v780_v12 = vld [vmem:[#allocation2 + $0x1248] sm:$0xff] }
 0x1a9   :  { %v7999_v24 = vcombine.high %v731_v18, %v735_v19  ;;  %v7998_v32 = vcombine.low %v731_v18, %v735_v19  ;;  %v779_v9 = vld [vmem:[#allocation2 + $0x1240] sm:$0xff] }
 0x1aa   :  { %v783_v11 = vld [vmem:[#allocation2 + $0x1260] sm:$0xff] }
 0x1ab   :  { %4231 = vmatpush1.bf16.msra.mxu0 %v7942_v26  ;;  %4446 = vmatpush1.bf16.msra.mxu1 %v7944_v27  ;;  %v8001_v26 = vcombine.high %v732_v20, %v736_v21  ;;  %v739_v27 = vld [vmem:[#allocation2 + $0x1100] sm:$0xff] }
 0x1ac   :  { %4232 = vmatprep.subr.bf16.mxu0 %v7951_v28  ;;  %4447 = vmatprep.subr.bf16.mxu1 %v7953_v33  ;;  %v743_v28 = vld [vmem:[#allocation2 + $0x1120] sm:$0xff]  ;;  %v8000_v33 = vcombine.low %v732_v20, %v736_v21  ;;  %v788_v21 = vld [vmem:[#allocation2 + $0x1288] sm:$0xff] }
 0x1ad   :  { %v8007_v34 = vcombine.high %v739_v27, %v743_v28  ;;  %v8006_v41 = vcombine.low %v739_v27, %v743_v28  ;;  %v787_v19 = vld [vmem:[#allocation2 + $0x1280] sm:$0xff] }
 0x1ae   :  { %v791_v20 = vld [vmem:[#allocation2 + $0x12a0] sm:$0xff] }
 0x1af   :  { %4233 = vmatpush1.bf16.msra.mxu0 %v7950_v35  ;;  %4448 = vmatpush1.bf16.msra.mxu1 %v7952_v36  ;;  %v8009_v35 = vcombine.high %v740_v29, %v744_v31  ;;  %v747_v36 = vld [vmem:[#allocation2 + $0x1140] sm:$0xff] }
 0x1b0   :  { %4234 = vmatprep.subr.bf16.mxu0 %v7959_v38  ;;  %4449 = vmatprep.subr.bf16.mxu1 %v7961_v42  ;;  %v751_v38 = vld [vmem:[#allocation2 + $0x1160] sm:$0xff]  ;;  %v8008_v42 = vcombine.low %v740_v29, %v744_v31  ;;  %v796_v31 = vld [vmem:[#allocation2 + $0x12c8] sm:$0xff] }
 0x1b1   :  { %v8015_v43 = vcombine.high %v747_v36, %v751_v38  ;;  %v8014_v50 = vcombine.low %v747_v36, %v751_v38  ;;  %v795_v28 = vld [vmem:[#allocation2 + $0x12c0] sm:$0xff] }
 0x1b2   :  { %v799_v29 = vld [vmem:[#allocation2 + $0x12e0] sm:$0xff] }
 0x1b3   :  { %4235 = vmatpush1.bf16.msra.mxu0 %v7958_v44  ;;  %4450 = vmatpush1.bf16.msra.mxu1 %v7960_v45  ;;  %v8017_v44 = vcombine.high %v748_v39, %v752_v40  ;;  %v755_v45 = vld [vmem:[#allocation2 + $0x1180] sm:$0xff]  ;;  %v804_v40 = vld [vmem:[#allocation2 + $0x1308] sm:$0xff] }
 0x1b4   :  { %4236 = vmatprep.subr.bf16.mxu0 %v7967_v47  ;;  %4451 = vmatprep.subr.bf16.mxu1 %v7969_v48  ;;  %v759_v47 = vld [vmem:[#allocation2 + $0x11a0] sm:$0xff]  ;;  %v756_v48 = vld [vmem:[#allocation2 + $0x1188] sm:$0xff] }
 0x1b5   :  { %v8023_v52 = vcombine.high %v755_v45, %v759_v47  ;;  %v8024_v61 = vcombine.low %v756_v48, %v760_v49  ;;  %v803_v38 = vld [vmem:[#allocation2 + $0x1300] sm:$0xff] }
 0x1b6   :  { %v807_v39 = vld [vmem:[#allocation2 + $0x1320] sm:$0xff] }
 0x1b7   :  { %4237 = vmatpush1.bf16.msra.mxu0 %v7966_v53  ;;  %4452 = vmatpush1.bf16.msra.mxu1 %v7968_v57  ;;  %v8025_v53 = vcombine.high %v756_v48, %v760_v49  ;;  %v764_v57 = vld [vmem:[#allocation2 + $0x11c8] sm:$0xff]  ;;  %v815_v48 = vld [vmem:[#allocation2 + $0x1360] sm:$0xff] }
 0x1b8   :  { %4249 = vmatprep.subr.bf16.mxu0 %v7975_v59  ;;  %4464 = vmatprep.subr.bf16.mxu1 %v7977_v60  ;;  %v768_v59 = vld [vmem:[#allocation2 + $0x11e8] sm:$0xff]  ;;  %v8022_v60 = vcombine.low %v755_v45, %v759_v47  ;;  %v811_v47 = vld [vmem:[#allocation2 + $0x1340] sm:$0xff] }
 0x1b9   :  { %v8033_v63 = vcombine.high %v764_v57, %v768_v59  ;;  %v812_v49 = vld [vmem:[#allocation2 + $0x1348] sm:$0xff] }
 0x1ba   :  { %4239 = vmatmul.mubr.bf16.vlgmr.msra.gmra.mrb[0].mxu0 %v9589_v0  ;;  %4454 = vmatmul.mubr.bf16.vlgmr.msra.gmra.mrb[0].mxu1 %v9589_v0 }
 0x1bb   :  { %4250 = vmatpush1.bf16.msra.mxu0 %v7974_v4  ;;  %4465 = vmatpush1.bf16.msra.mxu1 %v7976_v5  ;;  %v776_v4 = vld [vmem:[#allocation2 + $0x1228] sm:$0xff]  ;;  %v8030_v5 = vcombine.low %v763_v54, %v767_v56  ;;  %v819_v56 = vld [vmem:[#allocation2 + $0x1380] sm:$0xff] }
 0x1bc   :  { %4251 = vmatprep.subr.bf16.mxu0 %v7983_v6  ;;  %4466 = vmatprep.subr.bf16.mxu1 %v7985_v7  ;;  %v8032_v6 = vcombine.low %v764_v57, %v768_v59  ;;  %v8039_v7 = vcombine.high %v771_v1, %v775_v2  ;;  %v8041_v8 = vcombine.high %v772_v3, %v776_v4  ;;  %v823_v57 = vld [vmem:[#allocation2 + $0x13a0] sm:$0xff]  ;;  %v820_v59 = vld [vmem:[#allocation2 + $0x1388] sm:$0xff] }
 0x1bd   :  { %4281 = vmatprep.mubr.bf16.mxu0 %v9597_v10  ;;  %4496 = vmatprep.mubr.bf16.mxu1 %v9597_v10 }
 0x1bf   :  { %4252 = vmatpush1.bf16.msra.mxu0 %v7982_v13  ;;  %4467 = vmatpush1.bf16.msra.mxu1 %v7984_v14  ;;  %v784_v13 = vld [vmem:[#allocation2 + $0x1268] sm:$0xff]  ;;  %v8038_v14 = vcombine.low %v771_v1, %v775_v2  ;;  %v827_v2 = vld [vmem:[#allocation2 + $0x13c0] sm:$0xff] }
 0x1c0   :  { %4253 = vmatprep.subr.bf16.mxu0 %v7991_v16  ;;  %4468 = vmatprep.subr.bf16.mxu1 %v7993_v17  ;;  %v8040_v16 = vcombine.low %v772_v3, %v776_v4  ;;  %v8047_v17 = vcombine.high %v779_v9, %v783_v11  ;;  %v8049_v18 = vcombine.high %v780_v12, %v784_v13  ;;  %v831_v3 = vld [vmem:[#allocation2 + $0x13e0] sm:$0xff]  ;;  %v828_v4 = vld [vmem:[#allocation2 + $0x13c8] sm:$0xff] }
 0x1c3   :  { %4254 = vmatpush1.bf16.msra.mxu0 %v7990_v22  ;;  %4469 = vmatpush1.bf16.msra.mxu1 %v7992_v23  ;;  %v792_v22 = vld [vmem:[#allocation2 + $0x12a8] sm:$0xff]  ;;  %v8046_v23 = vcombine.low %v779_v9, %v783_v11  ;;  %v197_v11 = vld [vmem:[#allocation2 + $0x10] sm:$0xff] }
 0x1c4   :  { %4255 = vmatprep.subr.bf16.mxu0 %v7999_v24  ;;  %4470 = vmatprep.subr.bf16.mxu1 %v8001_v26  ;;  %v8048_v24 = vcombine.low %v780_v12, %v784_v13  ;;  %v8055_v26 = vcombine.high %v787_v19, %v791_v20  ;;  %v8057_v27 = vcombine.high %v788_v21, %v792_v22  ;;  %v201_v12 = vld [vmem:[#allocation2 + $0x30] sm:$0xff]  ;;  %v198_v13 = vld [vmem:[#allocation2 + $0x18] sm:$0xff] }
 0x1c7   :  { %4256 = vmatpush1.bf16.msra.mxu0 %v7998_v32  ;;  %4471 = vmatpush1.bf16.msra.mxu1 %v8000_v33  ;;  %v800_v32 = vld [vmem:[#allocation2 + $0x12e8] sm:$0xff]  ;;  %v8054_v33 = vcombine.low %v787_v19, %v791_v20  ;;  %v7467_v20 = vcombine.high %v197_v11, %v201_v12 }
 0x1c8   :  { %4257 = vmatprep.subr.bf16.mxu0 %v8007_v34  ;;  %4472 = vmatprep.subr.bf16.mxu1 %v8009_v35  ;;  %v8056_v34 = vcombine.low %v788_v21, %v792_v22  ;;  %v8063_v35 = vcombine.high %v795_v28, %v799_v29  ;;  %v8065_v36 = vcombine.high %v796_v31, %v800_v32  ;;  %v205_v22 = vld [vmem:[#allocation2 + $0x50] sm:$0xff] }
 0x1cb   :  { %4258 = vmatpush1.bf16.msra.mxu0 %v8006_v41  ;;  %4473 = vmatpush1.bf16.msra.mxu1 %v8008_v42  ;;  %v808_v41 = vld [vmem:[#allocation2 + $0x1328] sm:$0xff]  ;;  %v8062_v42 = vcombine.low %v795_v28, %v799_v29  ;;  %v7466_v28 = vcombine.low %v197_v11, %v201_v12 }
 0x1cc   :  { %4259 = vmatprep.subr.bf16.mxu0 %v8015_v43  ;;  %4474 = vmatprep.subr.bf16.mxu1 %v8017_v44  ;;  %v8064_v43 = vcombine.low %v796_v31, %v800_v32  ;;  %v8071_v44 = vcombine.high %v803_v38, %v807_v39  ;;  %v8073_v45 = vcombine.high %v804_v40, %v808_v41 }
 0x1cf   :  { %4260 = vmatpush1.bf16.msra.mxu0 %v8014_v50  ;;  %4475 = vmatpush1.bf16.msra.mxu1 %v8016_v51  ;;  %v816_v50 = vld [vmem:[#allocation2 + $0x1368] sm:$0xff]  ;;  %v8070_v51 = vcombine.low %v803_v38, %v807_v39 }
 0x1d0   :  { %4261 = vmatprep.subr.bf16.mxu0 %v8023_v52  ;;  %4476 = vmatprep.subr.bf16.mxu1 %v8025_v53  ;;  %v8072_v52 = vcombine.low %v804_v40, %v808_v41  ;;  %v8079_v53 = vcombine.high %v811_v47, %v815_v48  ;;  %v8081_v54 = vcombine.high %v812_v49, %v816_v50 }
 0x1d3   :  { %4262 = vmatpush1.bf16.msra.mxu0 %v8022_v60  ;;  %4477 = vmatpush1.bf16.msra.mxu1 %v8024_v61  ;;  %v824_v60 = vld [vmem:[#allocation2 + $0x13a8] sm:$0xff]  ;;  %v8078_v61 = vcombine.low %v811_v47, %v815_v48 }
 0x1d4   :  { %4263 = vmatprep.subr.bf16.mxu0 %v8031_v62  ;;  %4478 = vmatprep.subr.bf16.mxu1 %v8033_v63  ;;  %v8080_v62 = vcombine.low %v812_v49, %v816_v50  ;;  %v8087_v63 = vcombine.high %v819_v56, %v823_v57  ;;  %v8089_v1 = vcombine.high %v820_v59, %v824_v60 }
 0x1d7   :  { %4264 = vmatpush1.bf16.msra.mxu0 %v8030_v5  ;;  %4479 = vmatpush1.bf16.msra.mxu1 %v8032_v6  ;;  %v832_v5 = vld [vmem:[#allocation2 + $0x13e8] sm:$0xff]  ;;  %v8086_v6 = vcombine.low %v819_v56, %v823_v57 }
 0x1d8   :  { %4265 = vmatprep.subr.bf16.mxu0 %v8039_v7  ;;  %4480 = vmatprep.subr.bf16.mxu1 %v8041_v8  ;;  %v8088_v7 = vcombine.low %v820_v59, %v824_v60  ;;  %v8095_v8 = vcombine.high %v827_v2, %v831_v3  ;;  %v8097_v9 = vcombine.high %v828_v4, %v832_v5  ;;  %v237_v60 = vld [vmem:[#allocation2 + $0x150] sm:$0xff] }
 0x1d9   :  { %v8096_v19 = vcombine.low %v828_v4, %v832_v5  ;;  %v245_v5 = vld [vmem:[#allocation2 + $0x190] sm:$0xff] }
 0x1db   :  { %4266 = vmatpush1.bf16.msra.mxu0 %v8038_v14  ;;  %4481 = vmatpush1.bf16.msra.mxu1 %v8040_v16  ;;  %v202_v14 = vld [vmem:[#allocation2 + $0x38] sm:$0xff]  ;;  %v8094_v16 = vcombine.low %v827_v2, %v831_v3 }
 0x1dc   :  { %4267 = vmatprep.subr.bf16.mxu0 %v8047_v17  ;;  %4482 = vmatprep.subr.bf16.mxu1 %v8049_v18  ;;  %v173_v17 = vld [vmem:[%s9703_s0 + $0x40] sm:$0xff]  ;;  %v183_v18 = vld [vmem:[%s9703_s0 + $0x90] sm:$0xff]  ;;  %v7469_v21 = vcombine.high %v198_v13, %v202_v14  ;;  %v7468_v29 = vcombine.low %v198_v13, %v202_v14 }
 0x1dd   :  { %v253_v14 = vld [vmem:[#allocation2 + $0x1d0] sm:$0xff] }
 0x1df   :  { %4268 = vmatpush1.bf16.msra.mxu0 %v8046_v23  ;;  %4483 = vmatpush1.bf16.msra.mxu1 %v8048_v24  ;;  %v209_v23 = vld [vmem:[#allocation2 + $0x70] sm:$0xff]  ;;  %v9609_v24 = vpack.c.bf16 %v183_v18, %v173_v17  ;;  %v254_v17 = vld [vmem:[#allocation2 + $0x1d8] sm:$0xff] }
 0x1e0   :  { %4269 = vmatprep.subr.bf16.mxu0 %v8055_v26  ;;  %4484 = vmatprep.subr.bf16.mxu1 %v8057_v27  ;;  %v206_v26 = vld [vmem:[#allocation2 + $0x58] sm:$0xff]  ;;  %v7475_v31 = vcombine.high %v205_v22, %v209_v23  ;;  %v7474_v38 = vcombine.low %v205_v22, %v209_v23  ;;  %v261_v23 = vld [vmem:[#allocation2 + $0x210] sm:$0xff] }
 0x1e1   :  { %v210_v27 = vld [vmem:[#allocation2 + $0x78] sm:$0xff] }
 0x1e2   :  { %v7477_v32 = vcombine.high %v206_v26, %v210_v27  ;;  %v7476_v39 = vcombine.low %v206_v26, %v210_v27  ;;  %v258_v18 = vld [vmem:[#allocation2 + $0x1f8] sm:$0xff]  ;;  %v265_v26 = vld [vmem:[#allocation2 + $0x230] sm:$0xff] }
 0x1e3   :  { %4270 = vmatpush1.bf16.msra.mxu0 %v8054_v33  ;;  %4485 = vmatpush1.bf16.msra.mxu1 %v8056_v34  ;;  %v213_v33 = vld [vmem:[#allocation2 + $0x90] sm:$0xff]  ;;  %v7525_v22 = vcombine.high %v254_v17, %v258_v18  ;;  %v262_v27 = vld [vmem:[#allocation2 + $0x218] sm:$0xff] }
 0x1e4   :  { %4271 = vmatprep.subr.bf16.mxu0 %v8063_v35  ;;  %4486 = vmatprep.subr.bf16.mxu1 %v8065_v36  ;;  %v217_v34 = vld [vmem:[#allocation2 + $0xb0] sm:$0xff]  ;;  %v214_v35 = vld [vmem:[#allocation2 + $0x98] sm:$0xff] }
 0x1e5   :  { %v218_v36 = vld [vmem:[#allocation2 + $0xb8] sm:$0xff]  ;;  %v7483_v40 = vcombine.high %v213_v33, %v217_v34  ;;  %v7482_v47 = vcombine.low %v213_v33, %v217_v34  ;;  %v269_v34 = vld [vmem:[#allocation2 + $0x250] sm:$0xff] }
 0x1e6   :  { %v7485_v41 = vcombine.high %v214_v35, %v218_v36  ;;  %v7484_v48 = vcombine.low %v214_v35, %v218_v36  ;;  %v273_v35 = vld [vmem:[#allocation2 + $0x270] sm:$0xff]  ;;  %v270_v36 = vld [vmem:[#allocation2 + $0x258] sm:$0xff] }
 0x1e7   :  { %4272 = vmatpush1.bf16.msra.mxu0 %v8062_v42  ;;  %4487 = vmatpush1.bf16.msra.mxu1 %v8064_v43  ;;  %v221_v42 = vld [vmem:[#allocation2 + $0xd0] sm:$0xff] }
 0x1e8   :  { %4273 = vmatprep.subr.bf16.mxu0 %v8071_v44  ;;  %4488 = vmatprep.subr.bf16.mxu1 %v8073_v45  ;;  %v225_v43 = vld [vmem:[#allocation2 + $0xf0] sm:$0xff]  ;;  %v222_v44 = vld [vmem:[#allocation2 + $0xd8] sm:$0xff] }
 0x1e9   :  { %v226_v45 = vld [vmem:[#allocation2 + $0xf8] sm:$0xff]  ;;  %v7491_v49 = vcombine.high %v221_v42, %v225_v43  ;;  %v7490_v56 = vcombine.low %v221_v42, %v225_v43  ;;  %v277_v43 = vld [vmem:[#allocation2 + $0x290] sm:$0xff] }
 0x1ea   :  { %v7493_v50 = vcombine.high %v222_v44, %v226_v45  ;;  %v7492_v57 = vcombine.low %v222_v44, %v226_v45  ;;  %v281_v44 = vld [vmem:[#allocation2 + $0x2b0] sm:$0xff]  ;;  %v278_v45 = vld [vmem:[#allocation2 + $0x298] sm:$0xff] }
 0x1eb   :  { %4274 = vmatpush1.bf16.msra.mxu0 %v8070_v51  ;;  %4489 = vmatpush1.bf16.msra.mxu1 %v8072_v52  ;;  %v229_v51 = vld [vmem:[#allocation2 + $0x110] sm:$0xff] }
 0x1ec   :  { %4275 = vmatprep.subr.bf16.mxu0 %v8079_v53  ;;  %4490 = vmatprep.subr.bf16.mxu1 %v8081_v54  ;;  %v233_v52 = vld [vmem:[#allocation2 + $0x130] sm:$0xff]  ;;  %v230_v53 = vld [vmem:[#allocation2 + $0x118] sm:$0xff] }
 0x1ed   :  { %v234_v54 = vld [vmem:[#allocation2 + $0x138] sm:$0xff]  ;;  %v7499_v59 = vcombine.high %v229_v51, %v233_v52 }
 0x1ee   :  { %v7500_v2 = vcombine.low %v230_v53, %v234_v54 }
 0x1ef   :  { %4276 = vmatpush1.bf16.msra.mxu0 %v8078_v61  ;;  %4491 = vmatpush1.bf16.msra.mxu1 %v8080_v62  ;;  %v241_v61 = vld [vmem:[#allocation2 + $0x170] sm:$0xff]  ;;  %v238_v62 = vld [vmem:[#allocation2 + $0x158] sm:$0xff] }
 0x1f0   :  { %4277 = vmatprep.subr.bf16.mxu0 %v8087_v63  ;;  %4492 = vmatprep.subr.bf16.mxu1 %v8089_v1  ;;  %v242_v63 = vld [vmem:[#allocation2 + $0x178] sm:$0xff]  ;;  %v7498_v1 = vcombine.low %v229_v51, %v233_v52  ;;  %v7507_v3 = vcombine.high %v237_v60, %v241_v61  ;;  %v285_v52 = vld [vmem:[#allocation2 + $0x2d0] sm:$0xff] }
 0x1f1   :  { %v7509_v4 = vcombine.high %v238_v62, %v242_v63  ;;  %v7508_v11 = vcombine.low %v238_v62, %v242_v63  ;;  %v297_v62 = vld [vmem:[#allocation2 + $0x330] sm:$0xff]  ;;  %v294_v63 = vld [vmem:[#allocation2 + $0x318] sm:$0xff] }
 0x1f3   :  { %4278 = vmatpush1.bf16.msra.mxu0 %v8086_v6  ;;  %4493 = vmatpush1.bf16.msra.mxu1 %v8088_v7  ;;  %v249_v6 = vld [vmem:[#allocation2 + $0x1b0] sm:$0xff]  ;;  %v246_v7 = vld [vmem:[#allocation2 + $0x198] sm:$0xff] }
 0x1f4   :  { %4279 = vmatprep.subr.bf16.mxu0 %v8095_v8  ;;  %4494 = vmatprep.subr.bf16.mxu1 %v8097_v9  ;;  %v250_v8 = vld [vmem:[#allocation2 + $0x1b8] sm:$0xff]  ;;  %v7506_v9 = vcombine.low %v237_v60, %v241_v61  ;;  %v7515_v12 = vcombine.high %v245_v5, %v249_v6  ;;  %v293_v61 = vld [vmem:[#allocation2 + $0x310] sm:$0xff] }
 0x1f5   :  { %v7517_v13 = vcombine.high %v246_v7, %v250_v8 }
 0x1f7   :  { %4280 = vmatpush1.bf16.msra.mxu0 %v8094_v16  ;;  %4495 = vmatpush1.bf16.msra.mxu1 %v8096_v19  ;;  %v257_v16 = vld [vmem:[#allocation2 + $0x1f0] sm:$0xff]  ;;  %v7514_v19 = vcombine.low %v245_v5, %v249_v6 }
 0x1f8   :  { %4507 = vmatprep.subr.bf16.mxu0 %v7467_v20  ;;  %4722 = vmatprep.subr.bf16.mxu1 %v7469_v21  ;;  %v7516_v20 = vcombine.low %v246_v7, %v250_v8  ;;  %v7523_v21 = vcombine.high %v253_v14, %v257_v16  ;;  %v301_v6 = vld [vmem:[#allocation2 + $0x350] sm:$0xff]  ;;  %v302_v8 = vld [vmem:[#allocation2 + $0x358] sm:$0xff] }
 0x1f9   :  { %v305_v7 = vld [vmem:[#allocation2 + $0x370] sm:$0xff] }
 0x1fa   :  { %4282 = vmatmul.mubr.bf16.vlgmr.msra.gmra.mrb[0].mxu0 %v9609_v24  ;;  %4497 = vmatmul.mubr.bf16.vlgmr.msra.gmra.mrb[0].mxu1 %v9609_v24 }
 0x1fb   :  { %4508 = vmatpush1.bf16.msra.mxu0 %v7466_v28  ;;  %4723 = vmatpush1.bf16.msra.mxu1 %v7468_v29  ;;  %v266_v28 = vld [vmem:[#allocation2 + $0x238] sm:$0xff]  ;;  %v7522_v29 = vcombine.low %v253_v14, %v257_v16  ;;  %v309_v16 = vld [vmem:[#allocation2 + $0x390] sm:$0xff] }
 0x1fc   :  { %4509 = vmatprep.subr.bf16.mxu0 %v7475_v31  ;;  %4724 = vmatprep.subr.bf16.mxu1 %v7477_v32  ;;  %v7524_v31 = vcombine.low %v254_v17, %v258_v18  ;;  %v7531_v32 = vcombine.high %v261_v23, %v265_v26  ;;  %v7533_v33 = vcombine.high %v262_v27, %v266_v28  ;;  %v313_v17 = vld [vmem:[#allocation2 + $0x3b0] sm:$0xff]  ;;  %v310_v18 = vld [vmem:[#allocation2 + $0x398] sm:$0xff] }
 0x1fd   :  { %4539 = vmatprep.mubr.bf16.mxu0 %v9519_v58  ;;  %4754 = vmatprep.mubr.bf16.mxu1 %v9519_v58  ;;  %v7501_v58 = vcombine.high %v230_v53, %v234_v54  ;;  %v289_v53 = vld [vmem:[#allocation2 + $0x2f0] sm:$0xff]  ;;  %v286_v54 = vld [vmem:[#allocation2 + $0x2d8] sm:$0xff] }
 0x1ff   :  { %4510 = vmatpush1.bf16.msra.mxu0 %v7474_v38  ;;  %4725 = vmatpush1.bf16.msra.mxu1 %v7476_v39  ;;  %v274_v38 = vld [vmem:[#allocation2 + $0x278] sm:$0xff]  ;;  %v7530_v39 = vcombine.low %v261_v23, %v265_v26  ;;  %v317_v26 = vld [vmem:[#allocation2 + $0x3d0] sm:$0xff] }
 0x200   :  { %4511 = vmatprep.subr.bf16.mxu0 %v7483_v40  ;;  %4726 = vmatprep.subr.bf16.mxu1 %v7485_v41  ;;  %v7532_v40 = vcombine.low %v262_v27, %v266_v28  ;;  %v7539_v41 = vcombine.high %v269_v34, %v273_v35  ;;  %v7541_v42 = vcombine.high %v270_v36, %v274_v38  ;;  %v321_v27 = vld [vmem:[#allocation2 + $0x3f0] sm:$0xff]  ;;  %v318_v28 = vld [vmem:[#allocation2 + $0x3d8] sm:$0xff] }
 0x203   :  { %4512 = vmatpush1.bf16.msra.mxu0 %v7482_v47  ;;  %4727 = vmatpush1.bf16.msra.mxu1 %v7484_v48  ;;  %v282_v47 = vld [vmem:[#allocation2 + $0x2b8] sm:$0xff]  ;;  %v7538_v48 = vcombine.low %v269_v34, %v273_v35  ;;  %v325_v35 = vld [vmem:[#allocation2 + $0x410] sm:$0xff] }
 0x204   :  { %4513 = vmatprep.subr.bf16.mxu0 %v7491_v49  ;;  %4728 = vmatprep.subr.bf16.mxu1 %v7493_v50  ;;  %v7540_v49 = vcombine.low %v270_v36, %v274_v38  ;;  %v7547_v50 = vcombine.high %v277_v43, %v281_v44  ;;  %v7549_v51 = vcombine.high %v278_v45, %v282_v47  ;;  %v329_v36 = vld [vmem:[#allocation2 + $0x430] sm:$0xff]  ;;  %v326_v38 = vld [vmem:[#allocation2 + $0x418] sm:$0xff] }
 0x207   :  { %4514 = vmatpush1.bf16.msra.mxu0 %v7490_v56  ;;  %4729 = vmatpush1.bf16.msra.mxu1 %v7492_v57  ;;  %v290_v56 = vld [vmem:[#allocation2 + $0x2f8] sm:$0xff]  ;;  %v7546_v57 = vcombine.low %v277_v43, %v281_v44  ;;  %v333_v44 = vld [vmem:[#allocation2 + $0x450] sm:$0xff] }
 0x208   :  { %4515 = vmatprep.subr.bf16.mxu0 %v7499_v59  ;;  %4730 = vmatprep.subr.bf16.mxu1 %v7501_v58  ;;  %v7548_v59 = vcombine.low %v278_v45, %v282_v47  ;;  %v7555_v58 = vcombine.high %v285_v52, %v289_v53  ;;  %v7557_v60 = vcombine.high %v286_v54, %v290_v56  ;;  %v337_v45 = vld [vmem:[#allocation2 + $0x470] sm:$0xff]  ;;  %v334_v47 = vld [vmem:[#allocation2 + $0x458] sm:$0xff] }
 0x20b   :  { %4516 = vmatpush1.bf16.msra.mxu0 %v7498_v1  ;;  %4731 = vmatpush1.bf16.msra.mxu1 %v7500_v2  ;;  %v298_v1 = vld [vmem:[#allocation2 + $0x338] sm:$0xff]  ;;  %v7554_v2 = vcombine.low %v285_v52, %v289_v53  ;;  %v341_v53 = vld [vmem:[#allocation2 + $0x490] sm:$0xff] }
 0x20c   :  { %4517 = vmatprep.subr.bf16.mxu0 %v7507_v3  ;;  %4732 = vmatprep.subr.bf16.mxu1 %v7509_v4  ;;  %v7556_v3 = vcombine.low %v286_v54, %v290_v56  ;;  %v7563_v4 = vcombine.high %v293_v61, %v297_v62  ;;  %v7565_v5 = vcombine.high %v294_v63, %v298_v1  ;;  %v345_v54 = vld [vmem:[#allocation2 + $0x4b0] sm:$0xff]  ;;  %v342_v56 = vld [vmem:[#allocation2 + $0x498] sm:$0xff] }
 0x20f   :  { %4518 = vmatpush1.bf16.msra.mxu0 %v7506_v9  ;;  %4733 = vmatpush1.bf16.msra.mxu1 %v7508_v11  ;;  %v306_v9 = vld [vmem:[#allocation2 + $0x378] sm:$0xff]  ;;  %v7562_v11 = vcombine.low %v293_v61, %v297_v62  ;;  %v349_v62 = vld [vmem:[#allocation2 + $0x4d0] sm:$0xff] }
 0x210   :  { %4519 = vmatprep.subr.bf16.mxu0 %v7515_v12  ;;  %4734 = vmatprep.subr.bf16.mxu1 %v7517_v13  ;;  %v7564_v12 = vcombine.low %v294_v63, %v298_v1  ;;  %v7571_v13 = vcombine.high %v301_v6, %v305_v7  ;;  %v7573_v14 = vcombine.high %v302_v8, %v306_v9  ;;  %v353_v63 = vld [vmem:[#allocation2 + $0x4f0] sm:$0xff]  ;;  %v350_v1 = vld [vmem:[#allocation2 + $0x4d8] sm:$0xff] }
 0x213   :  { %4520 = vmatpush1.bf16.msra.mxu0 %v7514_v19  ;;  %4735 = vmatpush1.bf16.msra.mxu1 %v7516_v20  ;;  %v314_v19 = vld [vmem:[#allocation2 + $0x3b8] sm:$0xff]  ;;  %v7570_v20 = vcombine.low %v301_v6, %v305_v7  ;;  %v357_v6 = vld [vmem:[#allocation2 + $0x510] sm:$0xff] }
 0x214   :  { %4521 = vmatprep.subr.bf16.mxu0 %v7523_v21  ;;  %4736 = vmatprep.subr.bf16.mxu1 %v7525_v22  ;;  %v7572_v21 = vcombine.low %v302_v8, %v306_v9  ;;  %v7579_v22 = vcombine.high %v309_v16, %v313_v17  ;;  %v7581_v23 = vcombine.high %v310_v18, %v314_v19  ;;  %v361_v7 = vld [vmem:[#allocation2 + $0x530] sm:$0xff]  ;;  %v358_v8 = vld [vmem:[#allocation2 + $0x518] sm:$0xff] }
 0x215   :  { %v362_v9 = vld [vmem:[#allocation2 + $0x538] sm:$0xff] }
 0x217   :  { %4522 = vmatpush1.bf16.msra.mxu0 %v7522_v29  ;;  %4737 = vmatpush1.bf16.msra.mxu1 %v7524_v31  ;;  %v322_v29 = vld [vmem:[#allocation2 + $0x3f8] sm:$0xff]  ;;  %v7578_v31 = vcombine.low %v309_v16, %v313_v17  ;;  %v369_v16 = vld [vmem:[#allocation2 + $0x570] sm:$0xff] }
 0x218   :  { %4523 = vmatprep.subr.bf16.mxu0 %v7531_v32  ;;  %4738 = vmatprep.subr.bf16.mxu1 %v7533_v33  ;;  %v7580_v32 = vcombine.low %v310_v18, %v314_v19  ;;  %v7587_v33 = vcombine.high %v317_v26, %v321_v27  ;;  %v7589_v34 = vcombine.high %v318_v28, %v322_v29  ;;  %v366_v17 = vld [vmem:[#allocation2 + $0x558] sm:$0xff] }
 0x219   :  { %v370_v18 = vld [vmem:[#allocation2 + $0x578] sm:$0xff]  ;;  %v7626_v19 = vcombine.low %v357_v6, %v361_v7 }
 0x21b   :  { %4524 = vmatpush1.bf16.msra.mxu0 %v7530_v39  ;;  %4739 = vmatpush1.bf16.msra.mxu1 %v7532_v40  ;;  %v330_v39 = vld [vmem:[#allocation2 + $0x438] sm:$0xff]  ;;  %v7586_v40 = vcombine.low %v317_v26, %v321_v27  ;;  %v377_v26 = vld [vmem:[#allocation2 + $0x5b0] sm:$0xff] }
 0x21c   :  { %4525 = vmatprep.subr.bf16.mxu0 %v7539_v41  ;;  %4740 = vmatprep.subr.bf16.mxu1 %v7541_v42  ;;  %v7588_v41 = vcombine.low %v318_v28, %v322_v29  ;;  %v7595_v42 = vcombine.high %v325_v35, %v329_v36  ;;  %v7597_v43 = vcombine.high %v326_v38, %v330_v39  ;;  %v374_v27 = vld [vmem:[#allocation2 + $0x598] sm:$0xff] }
 0x21d   :  { %v378_v28 = vld [vmem:[#allocation2 + $0x5b8] sm:$0xff] }
 0x21f   :  { %4526 = vmatpush1.bf16.msra.mxu0 %v7538_v48  ;;  %4741 = vmatpush1.bf16.msra.mxu1 %v7540_v49  ;;  %v338_v48 = vld [vmem:[#allocation2 + $0x478] sm:$0xff]  ;;  %v7594_v49 = vcombine.low %v325_v35, %v329_v36  ;;  %v385_v35 = vld [vmem:[#allocation2 + $0x5f0] sm:$0xff] }
 0x220   :  { %4527 = vmatprep.subr.bf16.mxu0 %v7547_v50  ;;  %4742 = vmatprep.subr.bf16.mxu1 %v7549_v51  ;;  %v7596_v50 = vcombine.low %v326_v38, %v330_v39  ;;  %v7603_v51 = vcombine.high %v333_v44, %v337_v45  ;;  %v7605_v52 = vcombine.high %v334_v47, %v338_v48  ;;  %v382_v36 = vld [vmem:[#allocation2 + $0x5d8] sm:$0xff] }
 0x221   :  { %v386_v38 = vld [vmem:[#allocation2 + $0x5f8] sm:$0xff] }
 0x223   :  { %4528 = vmatpush1.bf16.msra.mxu0 %v7546_v57  ;;  %4743 = vmatpush1.bf16.msra.mxu1 %v7548_v59  ;;  %v346_v57 = vld [vmem:[#allocation2 + $0x4b8] sm:$0xff]  ;;  %v7602_v59 = vcombine.low %v333_v44, %v337_v45  ;;  %v393_v44 = vld [vmem:[#allocation2 + $0x630] sm:$0xff] }
 0x224   :  { %4529 = vmatprep.subr.bf16.mxu0 %v7555_v58  ;;  %4744 = vmatprep.subr.bf16.mxu1 %v7557_v60  ;;  %v7604_v58 = vcombine.low %v334_v47, %v338_v48  ;;  %v7611_v60 = vcombine.high %v341_v53, %v345_v54  ;;  %v7613_v61 = vcombine.high %v342_v56, %v346_v57  ;;  %v390_v45 = vld [vmem:[#allocation2 + $0x618] sm:$0xff] }
 0x225   :  { %v394_v47 = vld [vmem:[#allocation2 + $0x638] sm:$0xff] }
 0x227   :  { %4530 = vmatpush1.bf16.msra.mxu0 %v7554_v2  ;;  %4745 = vmatpush1.bf16.msra.mxu1 %v7556_v3  ;;  %v354_v2 = vld [vmem:[#allocation2 + $0x4f8] sm:$0xff]  ;;  %v7610_v3 = vcombine.low %v341_v53, %v345_v54  ;;  %v401_v53 = vld [vmem:[#allocation2 + $0x670] sm:$0xff] }
 0x228   :  { %4531 = vmatprep.subr.bf16.mxu0 %v7563_v4  ;;  %4746 = vmatprep.subr.bf16.mxu1 %v7565_v5  ;;  %v7619_v4 = vcombine.high %v349_v62, %v353_v63  ;;  %v7621_v5 = vcombine.high %v350_v1, %v354_v2  ;;  %v398_v54 = vld [vmem:[#allocation2 + $0x658] sm:$0xff] }
 0x22b   :  { %4532 = vmatpush1.bf16.msra.mxu0 %v7562_v11  ;;  %4747 = vmatpush1.bf16.msra.mxu1 %v7564_v12  ;;  %v7618_v11 = vcombine.low %v349_v62, %v353_v63  ;;  %v7620_v12 = vcombine.low %v350_v1, %v354_v2  ;;  %v409_v62 = vld [vmem:[#allocation2 + $0x6b0] sm:$0xff]  ;;  %v406_v63 = vld [vmem:[#allocation2 + $0x698] sm:$0xff] }
 0x22c   :  { %4533 = vmatprep.subr.bf16.mxu0 %v7571_v13  ;;  %4748 = vmatprep.subr.bf16.mxu1 %v7573_v14  ;;  %v7627_v13 = vcombine.high %v357_v6, %v361_v7  ;;  %v365_v14 = vld [vmem:[#allocation2 + $0x550] sm:$0xff]  ;;  %v410_v1 = vld [vmem:[#allocation2 + $0x6b8] sm:$0xff] }
 0x22d   :  { %v7634_v29 = vcombine.low %v365_v14, %v369_v16  ;;  %v417_v6 = vld [vmem:[#allocation2 + $0x6f0] sm:$0xff]  ;;  %v414_v7 = vld [vmem:[#allocation2 + $0x6d8] sm:$0xff] }
 0x22f   :  { %4534 = vmatpush1.bf16.msra.mxu0 %v7570_v20  ;;  %4749 = vmatpush1.bf16.msra.mxu1 %v7572_v21  ;;  %v7628_v20 = vcombine.low %v358_v8, %v362_v9  ;;  %v7635_v21 = vcombine.high %v365_v14, %v369_v16  ;;  %v425_v14 = vld [vmem:[#allocation2 + $0x730] sm:$0xff]  ;;  %v422_v16 = vld [vmem:[#allocation2 + $0x718] sm:$0xff] }
 0x230   :  { %4535 = vmatprep.subr.bf16.mxu0 %v7579_v22  ;;  %4750 = vmatprep.subr.bf16.mxu1 %v7581_v23  ;;  %v7637_v22 = vcombine.high %v366_v17, %v370_v18  ;;  %v373_v23 = vld [vmem:[#allocation2 + $0x590] sm:$0xff] }
 0x231   :  { %v7642_v39 = vcombine.low %v373_v23, %v377_v26 }
 0x233   :  { %4536 = vmatpush1.bf16.msra.mxu0 %v7578_v31  ;;  %4751 = vmatpush1.bf16.msra.mxu1 %v7580_v32  ;;  %v7636_v31 = vcombine.low %v366_v17, %v370_v18  ;;  %v7643_v32 = vcombine.high %v373_v23, %v377_v26  ;;  %v426_v17 = vld [vmem:[#allocation2 + $0x738] sm:$0xff]  ;;  %v433_v23 = vld [vmem:[#allocation2 + $0x770] sm:$0xff] }
 0x234   :  { %4537 = vmatprep.subr.bf16.mxu0 %v7587_v33  ;;  %4752 = vmatprep.subr.bf16.mxu1 %v7589_v34  ;;  %v7645_v33 = vcombine.high %v374_v27, %v378_v28  ;;  %v381_v34 = vld [vmem:[#allocation2 + $0x5d0] sm:$0xff]  ;;  %v430_v26 = vld [vmem:[#allocation2 + $0x758] sm:$0xff] }
 0x235   :  { %v7650_v48 = vcombine.low %v381_v34, %v385_v35 }
 0x237   :  { %4538 = vmatpush1.bf16.msra.mxu0 %v7586_v40  ;;  %4753 = vmatpush1.bf16.msra.mxu1 %v7588_v41  ;;  %v7644_v40 = vcombine.low %v374_v27, %v378_v28  ;;  %v7651_v41 = vcombine.high %v381_v34, %v385_v35  ;;  %v434_v27 = vld [vmem:[#allocation2 + $0x778] sm:$0xff]  ;;  %v441_v34 = vld [vmem:[#allocation2 + $0x7b0] sm:$0xff] }
 0x238   :  { %4550 = vmatprep.subr.bf16.mxu0 %v7595_v42  ;;  %4765 = vmatprep.subr.bf16.mxu1 %v7597_v43  ;;  %v7653_v42 = vcombine.high %v382_v36, %v386_v38  ;;  %v389_v43 = vld [vmem:[#allocation2 + $0x610] sm:$0xff]  ;;  %v438_v35 = vld [vmem:[#allocation2 + $0x798] sm:$0xff] }
 0x23a   :  { %4540 = vmatmul.mubr.bf16.vlgmr.msra.gmra.mrb[4].mxu0 %v9529_v15  ;;  %4755 = vmatmul.mubr.bf16.vlgmr.msra.gmra.mrb[4].mxu1 %v9529_v15  ;;  %v7612_v15 = vcombine.low %v342_v56, %v346_v57  ;;  %v402_v56 = vld [vmem:[#allocation2 + $0x678] sm:$0xff]  ;;  %v7658_v57 = vcombine.low %v389_v43, %v393_v44 }
 0x23b   :  { %4551 = vmatpush1.bf16.msra.mxu0 %v7594_v49  ;;  %4766 = vmatpush1.bf16.msra.mxu1 %v7596_v50  ;;  %v7652_v49 = vcombine.low %v382_v36, %v386_v38  ;;  %v7659_v50 = vcombine.high %v389_v43, %v393_v44  ;;  %v442_v36 = vld [vmem:[#allocation2 + $0x7b8] sm:$0xff]  ;;  %v449_v43 = vld [vmem:[#allocation2 + $0x7f0] sm:$0xff] }
 0x23c   :  { %4552 = vmatprep.subr.bf16.mxu0 %v7603_v51  ;;  %4767 = vmatprep.subr.bf16.mxu1 %v7605_v52  ;;  %v7661_v51 = vcombine.high %v390_v45, %v394_v47  ;;  %v397_v52 = vld [vmem:[#allocation2 + $0x650] sm:$0xff]  ;;  %v446_v44 = vld [vmem:[#allocation2 + $0x7d8] sm:$0xff] }
 0x23d   :  { %4582 = vmatprep.mubr.bf16.mxu0 %v9537_v25  ;;  %4797 = vmatprep.mubr.bf16.mxu1 %v9537_v25  ;;  %v7629_v25 = vcombine.high %v358_v8, %v362_v9  ;;  %v7666_v2 = vcombine.low %v397_v52, %v401_v53  ;;  %v418_v8 = vld [vmem:[#allocation2 + $0x6f8] sm:$0xff] }
 0x23f   :  { %4553 = vmatpush1.bf16.msra.mxu0 %v7602_v59  ;;  %4768 = vmatpush1.bf16.msra.mxu1 %v7604_v58  ;;  %v7660_v59 = vcombine.low %v390_v45, %v394_v47  ;;  %v7667_v58 = vcombine.high %v397_v52, %v401_v53  ;;  %v450_v45 = vld [vmem:[#allocation2 + $0x7f8] sm:$0xff]  ;;  %v457_v52 = vld [vmem:[#allocation2 + $0x830] sm:$0xff] }
 0x240   :  { %4554 = vmatprep.subr.bf16.mxu0 %v7611_v60  ;;  %4769 = vmatprep.subr.bf16.mxu1 %v7613_v61  ;;  %v7669_v60 = vcombine.high %v398_v54, %v402_v56  ;;  %v405_v61 = vld [vmem:[#allocation2 + $0x690] sm:$0xff]  ;;  %v454_v53 = vld [vmem:[#allocation2 + $0x818] sm:$0xff] }
 0x241   :  { %v7674_v9 = vcombine.low %v405_v61, %v409_v62 }
 0x243   :  { %4555 = vmatpush1.bf16.msra.mxu0 %v7610_v3  ;;  %4770 = vmatpush1.bf16.msra.mxu1 %v7612_v15  ;;  %v7668_v3 = vcombine.low %v398_v54, %v402_v56  ;;  %v7675_v15 = vcombine.high %v405_v61, %v409_v62  ;;  %v458_v54 = vld [vmem:[#allocation2 + $0x838] sm:$0xff]  ;;  %v465_v61 = vld [vmem:[#allocation2 + $0x870] sm:$0xff] }
 0x244   :  { %4556 = vmatprep.subr.bf16.mxu0 %v7619_v4  ;;  %4771 = vmatprep.subr.bf16.mxu1 %v7621_v5  ;;  %v7677_v4 = vcombine.high %v406_v63, %v410_v1  ;;  %v413_v5 = vld [vmem:[#allocation2 + $0x6d0] sm:$0xff]  ;;  %v462_v62 = vld [vmem:[#allocation2 + $0x858] sm:$0xff] }
 0x245   :  { %v7682_v18 = vcombine.low %v413_v5, %v417_v6 }
 0x247   :  { %4557 = vmatpush1.bf16.msra.mxu0 %v7618_v11  ;;  %4772 = vmatpush1.bf16.msra.mxu1 %v7620_v12  ;;  %v7676_v11 = vcombine.low %v406_v63, %v410_v1  ;;  %v7683_v12 = vcombine.high %v413_v5, %v417_v6  ;;  %v466_v63 = vld [vmem:[#allocation2 + $0x878] sm:$0xff]  ;;  %v473_v5 = vld [vmem:[#allocation2 + $0x8b0] sm:$0xff] }
 0x248   :  { %4558 = vmatprep.subr.bf16.mxu0 %v7627_v13  ;;  %4773 = vmatprep.subr.bf16.mxu1 %v7629_v25  ;;  %v7685_v13 = vcombine.high %v414_v7, %v418_v8  ;;  %v421_v25 = vld [vmem:[#allocation2 + $0x710] sm:$0xff]  ;;  %v470_v6 = vld [vmem:[#allocation2 + $0x898] sm:$0xff] }
 0x249   :  { %v7690_v28 = vcombine.low %v421_v25, %v425_v14 }
 0x24b   :  { %4559 = vmatpush1.bf16.msra.mxu0 %v7626_v19  ;;  %4774 = vmatpush1.bf16.msra.mxu1 %v7628_v20  ;;  %v7684_v19 = vcombine.low %v414_v7, %v418_v8  ;;  %v7691_v20 = vcombine.high %v421_v25, %v425_v14  ;;  %v474_v7 = vld [vmem:[#allocation2 + $0x8b8] sm:$0xff]  ;;  %v481_v25 = vld [vmem:[#allocation2 + $0x8f0] sm:$0xff] }
 0x24c   :  { %4560 = vmatprep.subr.bf16.mxu0 %v7635_v21  ;;  %4775 = vmatprep.subr.bf16.mxu1 %v7637_v22  ;;  %v7693_v21 = vcombine.high %v422_v16, %v426_v17  ;;  %v429_v22 = vld [vmem:[#allocation2 + $0x750] sm:$0xff]  ;;  %v478_v14 = vld [vmem:[#allocation2 + $0x8d8] sm:$0xff] }
 0x24d   :  { %v7698_v38 = vcombine.low %v429_v22, %v433_v23 }
 0x24f   :  { %4561 = vmatpush1.bf16.msra.mxu0 %v7634_v29  ;;  %4776 = vmatpush1.bf16.msra.mxu1 %v7636_v31  ;;  %v7692_v29 = vcombine.low %v422_v16, %v426_v17  ;;  %v7699_v31 = vcombine.high %v429_v22, %v433_v23  ;;  %v482_v16 = vld [vmem:[#allocation2 + $0x8f8] sm:$0xff] }
 0x250   :  { %4562 = vmatprep.subr.bf16.mxu0 %v7643_v32  ;;  %4777 = vmatprep.subr.bf16.mxu1 %v7645_v33  ;;  %v7701_v32 = vcombine.high %v430_v26, %v434_v27  ;;  %v437_v33 = vld [vmem:[#allocation2 + $0x790] sm:$0xff]  ;;  %v486_v22 = vld [vmem:[#allocation2 + $0x918] sm:$0xff] }
 0x251   :  { %v7706_v47 = vcombine.low %v437_v33, %v441_v34  ;;  %v490_v23 = vld [vmem:[#allocation2 + $0x938] sm:$0xff] }
 0x253   :  { %4563 = vmatpush1.bf16.msra.mxu0 %v7642_v39  ;;  %4778 = vmatpush1.bf16.msra.mxu1 %v7644_v40  ;;  %v7700_v39 = vcombine.low %v430_v26, %v434_v27  ;;  %v7707_v40 = vcombine.high %v437_v33, %v441_v34  ;;  %v7748_v27 = vcombine.low %v478_v14, %v482_v16  ;;  %v498_v33 = vld [vmem:[#allocation2 + $0x978] sm:$0xff] }
 0x254   :  { %4564 = vmatprep.subr.bf16.mxu0 %v7651_v41  ;;  %4779 = vmatprep.subr.bf16.mxu1 %v7653_v42  ;;  %v7709_v41 = vcombine.high %v438_v35, %v442_v36  ;;  %v445_v42 = vld [vmem:[#allocation2 + $0x7d0] sm:$0xff] }
 0x255   :  { %v7714_v56 = vcombine.low %v445_v42, %v449_v43 }
 0x257   :  { %4565 = vmatpush1.bf16.msra.mxu0 %v7650_v48  ;;  %4780 = vmatpush1.bf16.msra.mxu1 %v7652_v49  ;;  %v7708_v48 = vcombine.low %v438_v35, %v442_v36  ;;  %v7715_v49 = vcombine.high %v445_v42, %v449_v43  ;;  %v7756_v35 = vcombine.low %v486_v22, %v490_v23  ;;  %v506_v42 = vld [vmem:[#allocation2 + $0x9b8] sm:$0xff] }
 0x258   :  { %4566 = vmatprep.subr.bf16.mxu0 %v7659_v50  ;;  %4781 = vmatprep.subr.bf16.mxu1 %v7661_v51  ;;  %v7717_v50 = vcombine.high %v446_v44, %v450_v45  ;;  %v453_v51 = vld [vmem:[#allocation2 + $0x810] sm:$0xff] }
 0x259   :  { %v7722_v1 = vcombine.low %v453_v51, %v457_v52 }
 0x25b   :  { %4567 = vmatpush1.bf16.msra.mxu0 %v7658_v57  ;;  %4782 = vmatpush1.bf16.msra.mxu1 %v7660_v59  ;;  %v7716_v57 = vcombine.low %v446_v44, %v450_v45  ;;  %v7723_v59 = vcombine.high %v453_v51, %v457_v52  ;;  %v514_v51 = vld [vmem:[#allocation2 + $0x9f8] sm:$0xff] }
 0x25c   :  { %4568 = vmatprep.subr.bf16.mxu0 %v7667_v58  ;;  %4783 = vmatprep.subr.bf16.mxu1 %v7669_v60  ;;  %v7725_v58 = vcombine.high %v454_v53, %v458_v54  ;;  %v461_v60 = vld [vmem:[#allocation2 + $0x850] sm:$0xff] }
 0x25d   :  { %v7730_v8 = vcombine.low %v461_v60, %v465_v61 }
 0x25f   :  { %4569 = vmatpush1.bf16.msra.mxu0 %v7666_v2  ;;  %4784 = vmatpush1.bf16.msra.mxu1 %v7668_v3  ;;  %v7724_v2 = vcombine.low %v454_v53, %v458_v54  ;;  %v7731_v3 = vcombine.high %v461_v60, %v465_v61  ;;  %v522_v60 = vld [vmem:[#allocation2 + $0xa38] sm:$0xff] }
 0x260   :  { %4570 = vmatprep.subr.bf16.mxu0 %v7675_v15  ;;  %4785 = vmatprep.subr.bf16.mxu1 %v7677_v4  ;;  %v7733_v15 = vcombine.high %v462_v62, %v466_v63  ;;  %v469_v4 = vld [vmem:[#allocation2 + $0x890] sm:$0xff] }
 0x261   :  { %v7738_v17 = vcombine.low %v469_v4, %v473_v5 }
 0x263   :  { %4571 = vmatpush1.bf16.msra.mxu0 %v7674_v9  ;;  %4786 = vmatpush1.bf16.msra.mxu1 %v7676_v11  ;;  %v7732_v9 = vcombine.low %v462_v62, %v466_v63  ;;  %v7739_v11 = vcombine.high %v469_v4, %v473_v5  ;;  %v530_v4 = vld [vmem:[#allocation2 + $0xa78] sm:$0xff] }
 0x264   :  { %4572 = vmatprep.subr.bf16.mxu0 %v7683_v12  ;;  %4787 = vmatprep.subr.bf16.mxu1 %v7685_v13  ;;  %v7741_v12 = vcombine.high %v470_v6, %v474_v7  ;;  %v477_v13 = vld [vmem:[#allocation2 + $0x8d0] sm:$0xff] }
 0x265   :  { %v7746_v26 = vcombine.low %v477_v13, %v481_v25 }
 0x267   :  { %4573 = vmatpush1.bf16.msra.mxu0 %v7682_v18  ;;  %4788 = vmatpush1.bf16.msra.mxu1 %v7684_v19  ;;  %v7747_v18 = vcombine.high %v477_v13, %v481_v25  ;;  %v7749_v19 = vcombine.high %v478_v14, %v482_v16  ;;  %v538_v13 = vld [vmem:[#allocation2 + $0xab8] sm:$0xff] }
 0x268   :  { %4574 = vmatprep.subr.bf16.mxu0 %v7691_v20  ;;  %4789 = vmatprep.subr.bf16.mxu1 %v7693_v21  ;;  %v485_v20 = vld [vmem:[#allocation2 + $0x910] sm:$0xff] }
 0x269   :  { %v489_v21 = vld [vmem:[#allocation2 + $0x930] sm:$0xff] }
 0x26a   :  { %v7754_v34 = vcombine.low %v485_v20, %v489_v21 }
 0x26b   :  { %4575 = vmatpush1.bf16.msra.mxu0 %v7690_v28  ;;  %4790 = vmatpush1.bf16.msra.mxu1 %v7692_v29  ;;  %v7755_v28 = vcombine.high %v485_v20, %v489_v21  ;;  %v493_v29 = vld [vmem:[#allocation2 + $0x950] sm:$0xff]  ;;  %v546_v20 = vld [vmem:[#allocation2 + $0xaf8] sm:$0xff] }
 0x26c   :  { %4576 = vmatprep.subr.bf16.mxu0 %v7699_v31  ;;  %4791 = vmatprep.subr.bf16.mxu1 %v7701_v32  ;;  %v497_v31 = vld [vmem:[#allocation2 + $0x970] sm:$0xff]  ;;  %v494_v32 = vld [vmem:[#allocation2 + $0x958] sm:$0xff] }
 0x26d   :  { %v7763_v36 = vcombine.high %v493_v29, %v497_v31  ;;  %v7762_v43 = vcombine.low %v493_v29, %v497_v31  ;;  %v7764_v44 = vcombine.low %v494_v32, %v498_v33  ;;  %v554_v29 = vld [vmem:[#allocation2 + $0xb38] sm:$0xff] }
 0x26f   :  { %4577 = vmatpush1.bf16.msra.mxu0 %v7698_v38  ;;  %4792 = vmatpush1.bf16.msra.mxu1 %v7700_v39  ;;  %v7765_v38 = vcombine.high %v494_v32, %v498_v33  ;;  %v501_v39 = vld [vmem:[#allocation2 + $0x990] sm:$0xff] }
 0x270   :  { %4578 = vmatprep.subr.bf16.mxu0 %v7707_v40  ;;  %4793 = vmatprep.subr.bf16.mxu1 %v7709_v41  ;;  %v505_v40 = vld [vmem:[#allocation2 + $0x9b0] sm:$0xff]  ;;  %v502_v41 = vld [vmem:[#allocation2 + $0x998] sm:$0xff] }
 0x271   :  { %v7771_v45 = vcombine.high %v501_v39, %v505_v40  ;;  %v7770_v52 = vcombine.low %v501_v39, %v505_v40  ;;  %v7772_v53 = vcombine.low %v502_v41, %v506_v42  ;;  %v562_v39 = vld [vmem:[#allocation2 + $0xb78] sm:$0xff] }
 0x273   :  { %4579 = vmatpush1.bf16.msra.mxu0 %v7706_v47  ;;  %4794 = vmatpush1.bf16.msra.mxu1 %v7708_v48  ;;  %v7773_v47 = vcombine.high %v502_v41, %v506_v42  ;;  %v509_v48 = vld [vmem:[#allocation2 + $0x9d0] sm:$0xff] }
 0x274   :  { %4580 = vmatprep.subr.bf16.mxu0 %v7715_v49  ;;  %4795 = vmatprep.subr.bf16.mxu1 %v7717_v50  ;;  %v513_v49 = vld [vmem:[#allocation2 + $0x9f0] sm:$0xff]  ;;  %v510_v50 = vld [vmem:[#allocation2 + $0x9d8] sm:$0xff] }
 0x275   :  { %v7779_v54 = vcombine.high %v509_v48, %v513_v49  ;;  %v7778_v61 = vcombine.low %v509_v48, %v513_v49  ;;  %v7780_v62 = vcombine.low %v510_v50, %v514_v51  ;;  %v570_v48 = vld [vmem:[#allocation2 + $0xbb8] sm:$0xff] }
 0x277   :  { %4581 = vmatpush1.bf16.msra.mxu0 %v7714_v56  ;;  %4796 = vmatpush1.bf16.msra.mxu1 %v7716_v57  ;;  %v7781_v56 = vcombine.high %v510_v50, %v514_v51  ;;  %v517_v57 = vld [vmem:[#allocation2 + $0xa10] sm:$0xff] }
 0x278   :  { %4593 = vmatprep.subr.bf16.mxu0 %v7723_v59  ;;  %4808 = vmatprep.subr.bf16.mxu1 %v7725_v58  ;;  %v521_v59 = vld [vmem:[#allocation2 + $0xa30] sm:$0xff]  ;;  %v518_v58 = vld [vmem:[#allocation2 + $0xa18] sm:$0xff] }
 0x279   :  { %v7787_v63 = vcombine.high %v517_v57, %v521_v59  ;;  %v7786_v5 = vcombine.low %v517_v57, %v521_v59  ;;  %v578_v57 = vld [vmem:[#allocation2 + $0xbf8] sm:$0xff] }
 0x27a   :  { %4583 = vmatmul.mubr.bf16.vlgmr.msra.gmra.mrb[4].mxu0 %v9555_v30  ;;  %4798 = vmatmul.mubr.bf16.vlgmr.msra.gmra.mrb[4].mxu1 %v9555_v30  ;;  %v7740_v30 = vcombine.low %v470_v6, %v474_v7  ;;  %v7788_v6 = vcombine.low %v518_v58, %v522_v60 }
 0x27b   :  { %4594 = vmatpush1.bf16.msra.mxu0 %v7722_v1  ;;  %4809 = vmatpush1.bf16.msra.mxu1 %v7724_v2  ;;  %v7789_v1 = vcombine.high %v518_v58, %v522_v60  ;;  %v525_v2 = vld [vmem:[#allocation2 + $0xa50] sm:$0xff] }
 0x27c   :  { %4595 = vmatprep.subr.bf16.mxu0 %v7731_v3  ;;  %4810 = vmatprep.subr.bf16.mxu1 %v7733_v15  ;;  %v529_v3 = vld [vmem:[#allocation2 + $0xa70] sm:$0xff]  ;;  %v526_v15 = vld [vmem:[#allocation2 + $0xa58] sm:$0xff] }
 0x27d   :  { %4625 = vmatprep.mubr.bf16.mxu0 %v9557_v37  ;;  %4840 = vmatprep.mubr.bf16.mxu1 %v9557_v37  ;;  %v7757_v37 = vcombine.high %v486_v22, %v490_v23  ;;  %v7795_v7 = vcombine.high %v525_v2, %v529_v3  ;;  %v7794_v25 = vcombine.low %v525_v2, %v529_v3  ;;  %v586_v2 = vld [vmem:[#allocation2 + $0xc38] sm:$0xff] }
 0x27e   :  { %v7796_v14 = vcombine.low %v526_v15, %v530_v4 }
 0x27f   :  { %4596 = vmatpush1.bf16.msra.mxu0 %v7730_v8  ;;  %4811 = vmatpush1.bf16.msra.mxu1 %v7732_v9  ;;  %v7797_v8 = vcombine.high %v526_v15, %v530_v4  ;;  %v533_v9 = vld [vmem:[#allocation2 + $0xa90] sm:$0xff] }
 0x280   :  { %4597 = vmatprep.subr.bf16.mxu0 %v7739_v11  ;;  %4812 = vmatprep.subr.bf16.mxu1 %v7741_v12  ;;  %v537_v11 = vld [vmem:[#allocation2 + $0xab0] sm:$0xff]  ;;  %v534_v12 = vld [vmem:[#allocation2 + $0xa98] sm:$0xff] }
 0x281   :  { %v7803_v16 = vcombine.high %v533_v9, %v537_v11  ;;  %v7802_v21 = vcombine.low %v533_v9, %v537_v11  ;;  %v7804_v22 = vcombine.low %v534_v12, %v538_v13  ;;  %v594_v9 = vld [vmem:[#allocation2 + $0xc78] sm:$0xff] }
 0x283   :  { %4598 = vmatpush1.bf16.msra.mxu0 %v7738_v17  ;;  %4813 = vmatpush1.bf16.msra.mxu1 %v7740_v30  ;;  %v7805_v17 = vcombine.high %v534_v12, %v538_v13  ;;  %v541_v30 = vld [vmem:[#allocation2 + $0xad0] sm:$0xff] }
 0x284   :  { %4599 = vmatprep.subr.bf16.mxu0 %v7747_v18  ;;  %4814 = vmatprep.subr.bf16.mxu1 %v7749_v19  ;;  %v545_v18 = vld [vmem:[#allocation2 + $0xaf0] sm:$0xff]  ;;  %v542_v19 = vld [vmem:[#allocation2 + $0xad8] sm:$0xff] }
 0x285   :  { %v7811_v23 = vcombine.high %v541_v30, %v545_v18  ;;  %v7810_v31 = vcombine.low %v541_v30, %v545_v18  ;;  %v7812_v32 = vcombine.low %v542_v19, %v546_v20  ;;  %v602_v30 = vld [vmem:[#allocation2 + $0xcb8] sm:$0xff] }
 0x287   :  { %4600 = vmatpush1.bf16.msra.mxu0 %v7746_v26  ;;  %4815 = vmatpush1.bf16.msra.mxu1 %v7748_v27  ;;  %v7813_v26 = vcombine.high %v542_v19, %v546_v20  ;;  %v549_v27 = vld [vmem:[#allocation2 + $0xb10] sm:$0xff] }
 0x288   :  { %4601 = vmatprep.subr.bf16.mxu0 %v7755_v28  ;;  %4816 = vmatprep.subr.bf16.mxu1 %v7757_v37  ;;  %v553_v28 = vld [vmem:[#allocation2 + $0xb30] sm:$0xff]  ;;  %v550_v37 = vld [vmem:[#allocation2 + $0xb18] sm:$0xff] }
 0x289   :  { %v7819_v33 = vcombine.high %v549_v27, %v553_v28  ;;  %v7818_v40 = vcombine.low %v549_v27, %v553_v28  ;;  %v7820_v41 = vcombine.low %v550_v37, %v554_v29  ;;  %v610_v27 = vld [vmem:[#allocation2 + $0xcf8] sm:$0xff]  ;;  %v837_v28 = vlaneseq }
 0x28b   :  { %4602 = vmatpush1.bf16.msra.mxu0 %v7754_v34  ;;  %4817 = vmatpush1.bf16.msra.mxu1 %v7756_v35  ;;  %v7821_v34 = vcombine.high %v550_v37, %v554_v29  ;;  %v557_v35 = vld [vmem:[#allocation2 + $0xb50] sm:$0xff] }
 0x28c   :  { %4603 = vmatprep.subr.bf16.mxu0 %v7763_v36  ;;  %4818 = vmatprep.subr.bf16.mxu1 %v7765_v38  ;;  %v561_v36 = vld [vmem:[#allocation2 + $0xb70] sm:$0xff]  ;;  %v558_v38 = vld [vmem:[#allocation2 + $0xb58] sm:$0xff] }
 0x28d   :  { %v7827_v42 = vcombine.high %v557_v35, %v561_v36  ;;  %v7826_v49 = vcombine.low %v557_v35, %v561_v36  ;;  %v7828_v50 = vcombine.low %v558_v38, %v562_v39  ;;  %v618_v35 = vld [vmem:[#allocation2 + $0xd38] sm:$0xff]  ;;  %v9627_v36 = vshrl.u32 %v837_v28, 7 }
 0x28f   :  { %4604 = vmatpush1.bf16.msra.mxu0 %v7762_v43  ;;  %4819 = vmatpush1.bf16.msra.mxu1 %v7764_v44  ;;  %v7829_v43 = vcombine.high %v558_v38, %v562_v39  ;;  %v565_v44 = vld [vmem:[#allocation2 + $0xb90] sm:$0xff] }
 0x290   :  { %4605 = vmatprep.subr.bf16.mxu0 %v7771_v45  ;;  %4820 = vmatprep.subr.bf16.mxu1 %v7773_v47  ;;  %v569_v45 = vld [vmem:[#allocation2 + $0xbb0] sm:$0xff]  ;;  %v566_v47 = vld [vmem:[#allocation2 + $0xb98] sm:$0xff] }
 0x291   :  { %v7835_v51 = vcombine.high %v565_v44, %v569_v45  ;;  %v7834_v59 = vcombine.low %v565_v44, %v569_v45  ;;  %v7836_v58 = vcombine.low %v566_v47, %v570_v48  ;;  %v622_v44 = vld [vmem:[#allocation2 + $0xd58] sm:$0xff] }
 0x292   :  { %v626_v45 = vld [vmem:[#allocation2 + $0xd78] sm:$0xff] }
 0x293   :  { %4606 = vmatpush1.bf16.msra.mxu0 %v7770_v52  ;;  %4821 = vmatpush1.bf16.msra.mxu1 %v7772_v53  ;;  %v7837_v52 = vcombine.high %v566_v47, %v570_v48  ;;  %v573_v53 = vld [vmem:[#allocation2 + $0xbd0] sm:$0xff]  ;;  %v835_v48 = vld [vmem:[#allocation4] sm:$0xff] }
 0x294   :  { %4607 = vmatprep.subr.bf16.mxu0 %v7779_v54  ;;  %4822 = vmatprep.subr.bf16.mxu1 %v7781_v56  ;;  %v577_v54 = vld [vmem:[#allocation2 + $0xbf0] sm:$0xff]  ;;  %v574_v56 = vld [vmem:[#allocation2 + $0xbd8] sm:$0xff] }
 0x295   :  { %v7843_v60 = vcombine.high %v573_v53, %v577_v54  ;;  %v7842_v3 = vcombine.low %v573_v53, %v577_v54  ;;  %v7844_v15 = vcombine.low %v574_v56, %v578_v57  ;;  %v7893_v54 = vcombine.high %v622_v44, %v626_v45 }
 0x297   :  { %4608 = vmatpush1.bf16.msra.mxu0 %v7778_v61  ;;  %4823 = vmatpush1.bf16.msra.mxu1 %v7780_v62  ;;  %v7845_v61 = vcombine.high %v574_v56, %v578_v57  ;;  %v581_v62 = vld [vmem:[#allocation2 + $0xc10] sm:$0xff] }
 0x298   :  { %4609 = vmatprep.subr.bf16.mxu0 %v7787_v63  ;;  %4824 = vmatprep.subr.bf16.mxu1 %v7789_v1  ;;  %v585_v63 = vld [vmem:[#allocation2 + $0xc30] sm:$0xff]  ;;  %v582_v1 = vld [vmem:[#allocation2 + $0xc18] sm:$0xff] }
 0x299   :  { %v7851_v4 = vcombine.high %v581_v62, %v585_v63  ;;  %v7850_v11 = vcombine.low %v581_v62, %v585_v63  ;;  %v7852_v12 = vcombine.low %v582_v1, %v586_v2  ;;  %v629_v56 = vld [vmem:[#allocation2 + $0xd90] sm:$0xff] }
 0x29a   :  { %v633_v57 = vld [vmem:[#allocation2 + $0xdb0] sm:$0xff] }
 0x29b   :  { %4610 = vmatpush1.bf16.msra.mxu0 %v7786_v5  ;;  %4825 = vmatpush1.bf16.msra.mxu1 %v7788_v6  ;;  %v7853_v5 = vcombine.high %v582_v1, %v586_v2  ;;  %v589_v6 = vld [vmem:[#allocation2 + $0xc50] sm:$0xff]  ;;  %v7892_v2 = vcombine.low %v622_v44, %v626_v45 }
 0x29c   :  { %4611 = vmatprep.subr.bf16.mxu0 %v7795_v7  ;;  %4826 = vmatprep.subr.bf16.mxu1 %v7797_v8  ;;  %v593_v7 = vld [vmem:[#allocation2 + $0xc70] sm:$0xff]  ;;  %v590_v8 = vld [vmem:[#allocation2 + $0xc58] sm:$0xff] }
 0x29d   :  { %v7859_v13 = vcombine.high %v589_v6, %v593_v7  ;;  %v7858_v18 = vcombine.low %v589_v6, %v593_v7  ;;  %v7860_v19 = vcombine.low %v590_v8, %v594_v9  ;;  %v641_v6 = vld [vmem:[#allocation2 + $0xdf0] sm:$0xff] }
 0x29f   :  { %4612 = vmatpush1.bf16.msra.mxu0 %v7794_v25  ;;  %4827 = vmatpush1.bf16.msra.mxu1 %v7796_v14  ;;  %v7861_v25 = vcombine.high %v590_v8, %v594_v9  ;;  %v597_v14 = vld [vmem:[#allocation2 + $0xc90] sm:$0xff] }
 0x2a0   :  { %4613 = vmatprep.subr.bf16.mxu0 %v7803_v16  ;;  %4828 = vmatprep.subr.bf16.mxu1 %v7805_v17  ;;  %v601_v16 = vld [vmem:[#allocation2 + $0xcb0] sm:$0xff]  ;;  %v598_v17 = vld [vmem:[#allocation2 + $0xc98] sm:$0xff] }
 0x2a1   :  { %v7867_v20 = vcombine.high %v597_v14, %v601_v16  ;;  %v7866_v37 = vcombine.low %v597_v14, %v601_v16 }
 0x2a3   :  { %4614 = vmatpush1.bf16.msra.mxu0 %v7802_v21  ;;  %4829 = vmatpush1.bf16.msra.mxu1 %v7804_v22  ;;  %v7869_v21 = vcombine.high %v598_v17, %v602_v30  ;;  %v605_v22 = vld [vmem:[#allocation2 + $0xcd0] sm:$0xff] }
 0x2a4   :  { %4615 = vmatprep.subr.bf16.mxu0 %v7811_v23  ;;  %4830 = vmatprep.subr.bf16.mxu1 %v7813_v26  ;;  %v609_v23 = vld [vmem:[#allocation2 + $0xcf0] sm:$0xff]  ;;  %v606_v26 = vld [vmem:[#allocation2 + $0xcd8] sm:$0xff] }
 0x2a5   :  { %v7875_v29 = vcombine.high %v605_v22, %v609_v23  ;;  %v7874_v38 = vcombine.low %v605_v22, %v609_v23  ;;  %v7876_v39 = vcombine.low %v606_v26, %v610_v27 }
 0x2a7   :  { %4616 = vmatpush1.bf16.msra.mxu0 %v7810_v31  ;;  %4831 = vmatpush1.bf16.msra.mxu1 %v7812_v32  ;;  %v7877_v31 = vcombine.high %v606_v26, %v610_v27  ;;  %v613_v32 = vld [vmem:[#allocation2 + $0xd10] sm:$0xff] }
 0x2a8   :  { %4617 = vmatprep.subr.bf16.mxu0 %v7819_v33  ;;  %4832 = vmatprep.subr.bf16.mxu1 %v7821_v34  ;;  %v617_v33 = vld [vmem:[#allocation2 + $0xd30] sm:$0xff]  ;;  %v614_v34 = vld [vmem:[#allocation2 + $0xd18] sm:$0xff] }
 0x2a9   :  { %v7882_v47 = vcombine.low %v613_v32, %v617_v33 }
 0x2ab   :  { %4618 = vmatpush1.bf16.msra.mxu0 %v7818_v40  ;;  %4833 = vmatpush1.bf16.msra.mxu1 %v7820_v41  ;;  %v7885_v40 = vcombine.high %v614_v34, %v618_v35  ;;  %v621_v41 = vld [vmem:[#allocation2 + $0xd50] sm:$0xff] }
 0x2ac   :  { %4619 = vmatprep.subr.bf16.mxu0 %v7827_v42  ;;  %4834 = vmatprep.subr.bf16.mxu1 %v7829_v43  ;;  %v625_v42 = vld [vmem:[#allocation2 + $0xd70] sm:$0xff]  ;;  %v839_v43 = vsub.s32 0, %v9627_v36 }
 0x2ad   :  { %v7891_v53 = vcombine.high %v621_v41, %v625_v42  ;;  %v7890_v63 = vcombine.low %v621_v41, %v625_v42 }
 0x2af   :  { %4620 = vmatpush1.bf16.msra.mxu0 %v7826_v49  ;;  %4835 = vmatpush1.bf16.msra.mxu1 %v7828_v50  ;;  %v847_v49 = vsub.s32 2, %v9627_v36  ;;  %v843_v50 = vsub.s32 1, %v9627_v36 }
 0x2b0   :  { %4621 = vmatprep.subr.bf16.mxu0 %v7835_v51  ;;  %4836 = vmatprep.subr.bf16.mxu1 %v7837_v52  ;;  %v7884_v51 = vcombine.low %v614_v34, %v618_v35  ;;  %v851_v52 = vsub.s32 3, %v9627_v36  ;;  %v646_v35 = vld [vmem:[#allocation2 + $0xe18] sm:$0xff] }
 0x2b1   :  { %v844_v62 = vrot.slane %v835_v48, %v843_v50 }
 0x2b2   :  { %v852_v1 = vrot.slane %v835_v48, %v851_v52 }
 0x2b3   :  { %4622 = vmatpush1.bf16.msra.mxu0 %v7834_v59  ;;  %4837 = vmatpush1.bf16.msra.mxu1 %v7836_v58  ;;  %v840_v59 = vrot.slane %v835_v48, %v839_v43  ;;  %v630_v58 = vld [vmem:[#allocation2 + $0xd98] sm:$0xff] }
 0x2b4   :  { %4623 = vmatprep.subr.bf16.mxu0 %v7843_v60  ;;  %4838 = vmatprep.subr.bf16.mxu1 %v7845_v61  ;;  %v634_v60 = vld [vmem:[#allocation2 + $0xdb8] sm:$0xff]  ;;  %v848_v61 = vrot.slane %v835_v48, %v847_v49 }
 0x2b7   :  { %4624 = vmatpush1.bf16.msra.mxu0 %v7842_v3  ;;  %4839 = vmatpush1.bf16.msra.mxu1 %v7844_v15  ;;  %v7899_v3 = vcombine.high %v629_v56, %v633_v57 }
 0x2b8   :  { %4636 = vmatprep.subr.bf16.mxu0 %v7851_v4  ;;  %4851 = vmatprep.subr.bf16.mxu1 %v7853_v5  ;;  %v7901_v4 = vcombine.high %v630_v58, %v634_v60  ;;  %v637_v5 = vld [vmem:[#allocation2 + $0xdd0] sm:$0xff] }
 0x2b9   :  { %v7907_v22 = vcombine.high %v637_v5, %v641_v6  ;;  %v7906_v28 = vcombine.low %v637_v5, %v641_v6 }
 0x2ba   :  { %4626 = vmatmul.mubr.bf16.vlgmr.msra.gmra.mrb[4].mxu0 %v9575_v46  ;;  %4841 = vmatmul.mubr.bf16.vlgmr.msra.gmra.mrb[4].mxu1 %v9575_v46  ;;  %v7868_v46 = vcombine.low %v598_v17, %v602_v30  ;;  %v7898_v17 = vcombine.low %v629_v56, %v633_v57  ;;  %v7900_v30 = vcombine.low %v630_v58, %v634_v60  ;;  %v657_v56 = vld [vmem:[#allocation2 + $0xe70] sm:$0xff]  ;;  %v658_v58 = vld [vmem:[#allocation2 + $0xe78] sm:$0xff] }
 0x2bb   :  { %4637 = vmatpush1.bf16.msra.mxu0 %v7850_v11  ;;  %4852 = vmatpush1.bf16.msra.mxu1 %v7852_v12  ;;  %v638_v11 = vld [vmem:[#allocation2 + $0xdd8] sm:$0xff] }
 0x2bc   :  { %4638 = vmatprep.subr.bf16.mxu0 %v7859_v13  ;;  %4853 = vmatprep.subr.bf16.mxu1 %v7861_v25  ;;  %v642_v12 = vld [vmem:[#allocation2 + $0xdf8] sm:$0xff] }
 0x2bd   :  { %4668 = vmatprep.mubr.bf16.mxu0 %v9577_v55  ;;  %4883 = vmatprep.mubr.bf16.mxu1 %v9577_v55  ;;  %v7883_v55 = vcombine.high %v613_v32, %v617_v33  ;;  %v7908_v34 = vcombine.low %v638_v11, %v642_v12 }
 0x2bf   :  { %4639 = vmatpush1.bf16.msra.mxu0 %v7858_v18  ;;  %4854 = vmatpush1.bf16.msra.mxu1 %v7860_v19 }
 0x2c0   :  { %4640 = vmatprep.subr.bf16.mxu0 %v7867_v20  ;;  %4855 = vmatprep.subr.bf16.mxu1 %v7869_v21 }
 0x2c3   :  { %4641 = vmatpush1.bf16.msra.mxu0 %v7866_v37  ;;  %4856 = vmatpush1.bf16.msra.mxu1 %v7868_v46  ;;  %v7909_v37 = vcombine.high %v638_v11, %v642_v12  ;;  %v645_v46 = vld [vmem:[#allocation2 + $0xe10] sm:$0xff]  ;;  %v670_v11 = vld [vmem:[#allocation2 + $0xed8] sm:$0xff] }
 0x2c4   :  { %4642 = vmatprep.subr.bf16.mxu0 %v7875_v29  ;;  %4857 = vmatprep.subr.bf16.mxu1 %v7877_v31  ;;  %v649_v29 = vld [vmem:[#allocation2 + $0xe30] sm:$0xff]  ;;  %v674_v12 = vld [vmem:[#allocation2 + $0xef8] sm:$0xff] }
 0x2c5   :  { %v7914_v60 = vcombine.low %v645_v46, %v649_v29 }
 0x2c7   :  { %4643 = vmatpush1.bf16.msra.mxu0 %v7874_v38  ;;  %4858 = vmatpush1.bf16.msra.mxu1 %v7876_v39  ;;  %v650_v38 = vld [vmem:[#allocation2 + $0xe38] sm:$0xff] }
 0x2c8   :  { %4644 = vmatprep.subr.bf16.mxu0 %v7883_v55  ;;  %4859 = vmatprep.subr.bf16.mxu1 %v7885_v40 }
 0x2cb   :  { %4645 = vmatpush1.bf16.msra.mxu0 %v7882_v47  ;;  %4860 = vmatpush1.bf16.msra.mxu1 %v7884_v51  ;;  %v7915_v47 = vcombine.high %v645_v46, %v649_v29 }
 0x2cc   :  { %4646 = vmatprep.subr.bf16.mxu0 %v7891_v53  ;;  %4861 = vmatprep.subr.bf16.mxu1 %v7893_v54  ;;  %v7917_v53 = vcombine.high %v646_v35, %v650_v38  ;;  %v653_v54 = vld [vmem:[#allocation2 + $0xe50] sm:$0xff] }
 0x2cd   :  { %v4283_v15 = vpop.f32.mrb[0].mxu0  ;;  %v4498_v8 = vpop.f32.mrb[0].mxu1 }
 0x2ce   :  { %v8511_v7 = vadd.f32 %v4283_v15, %v840_v59  ;;  %v4285_v9 = vpop.f32.mrb[1].mxu0  ;;  %v8515_v13 = vadd.f32 %v4498_v8, %v848_v61  ;;  %v4500_v14 = vpop.f32.mrb[1].mxu1  ;;  %v666_v15 = vld [vmem:[#allocation2 + $0xeb8] sm:$0xff]  ;;  %v669_v8 = vld [vmem:[#allocation2 + $0xed0] sm:$0xff] }
 0x2cf   :  { %v8512_v25 = vadd.f32 %v4285_v9, %v844_v62  ;;  %v4287_v16 = vpop.f32.mrb[2].mxu0  ;;  %4647 = vmatpush1.bf16.msra.mxu0 %v7890_v63  ;;  %v8516_v18 = vadd.f32 %v4500_v14, %v852_v1  ;;  %v4502_v20 = vpop.f32.mrb[2].mxu1  ;;  %4862 = vmatpush1.bf16.msra.mxu1 %v7892_v2  ;;  %v665_v2 = vld [vmem:[#allocation2 + $0xeb0] sm:$0xff] }
 0x2d0   :  { %v8513_v19 = vadd.f32 %v4287_v16, %v840_v59  ;;  %v4289_v21 = vpop.f32.mrb[3].mxu0  ;;  %4648 = vmatprep.subr.bf16.mxu0 %v7899_v3  ;;  %v8517_v23 = vadd.f32 %v4502_v20, %v848_v61  ;;  %v4504_v27 = vpop.f32.mrb[3].mxu1  ;;  %4863 = vmatprep.subr.bf16.mxu1 %v7901_v4  ;;  %v4937_v31 = vmax.f32 %v8511_v7, 0.0  ;;  %v4939_v39 = vmax.f32 %v8515_v13, 0.0  ;;  %v654_v59 = vld [vmem:[#allocation2 + $0xe58] sm:$0xff]  ;;  %v673_v9 = vld [vmem:[#allocation2 + $0xef0] sm:$0xff] }
 0x2d1   :  { %v8514_v26 = vadd.f32 %v4289_v21, %v844_v62  ;;  %v8518_v33 = vadd.f32 %v4504_v27, %v852_v1  ;;  %v4938_v55 = vmax.f32 %v8512_v25, 0.0  ;;  %v4940_v42 = vmax.f32 %v8516_v18, 0.0  ;;  %v661_v1 = vld [vmem:[#allocation2 + $0xe90] sm:$0xff]  ;;  %v662_v3 = vld [vmem:[#allocation2 + $0xe98] sm:$0xff] }
 0x2d2   :  { %v4945_v32 = vmax.f32 %v8513_v19, 0.0  ;;  %v4947_v40 = vmax.f32 %v8517_v23, 0.0  ;;  %v7916_v61 = vcombine.low %v646_v35, %v650_v38  ;;  %v7923_v62 = vcombine.high %v653_v54, %v657_v56  ;;  %v678_v18 = vld [vmem:[#allocation2 + $0xf18] sm:$0xff]  ;;  %v689_v27 = vld [vmem:[#allocation2 + $0xf70] sm:$0xff] }
 0x2d3   :  { %v4946_v41 = vmax.f32 %v8514_v26, 0.0  ;;  %4649 = vmatpush1.bf16.msra.mxu0 %v7898_v17  ;;  %v4948_v45 = vmax.f32 %v8518_v33, 0.0  ;;  %4864 = vmatpush1.bf16.msra.mxu1 %v7900_v30  ;;  %v7925_v63 = vcombine.high %v654_v59, %v658_v58  ;;  %v7922_v4 = vcombine.low %v653_v54, %v657_v56  ;;  %v677_v17 = vld [vmem:[#allocation2 + $0xf10] sm:$0xff]  ;;  %v682_v19 = vld [vmem:[#allocation2 + $0xf38] sm:$0xff] }
 0x2d4   :  { %v9641_v44 = vpack.c.bf16 %v4945_v32, %v4937_v31  ;;  %4650 = vmatprep.subr.bf16.mxu0 %v7907_v22  ;;  %v9643_v48 = vpack.c.bf16 %v4947_v40, %v4939_v39  ;;  %4865 = vmatprep.subr.bf16.mxu1 %v7909_v37  ;;  %v7924_v5 = vcombine.low %v654_v59, %v658_v58  ;;  %v681_v30 = vld [vmem:[#allocation2 + $0xf30] sm:$0xff]  ;;  %v690_v37 = vld [vmem:[#allocation2 + $0xf78] sm:$0xff] }
 0x2d5   :  { %v9645_v51 = vpack.c.bf16 %v4946_v41, %v4938_v55  ;;  %v9647_v57 = vpack.c.bf16 %v4948_v45, %v4940_v42  ;;  %v7931_v6 = vcombine.high %v661_v1, %v665_v2  ;;  %v7933_v7 = vcombine.high %v662_v3, %v666_v15  ;;  %v685_v26 = vld [vmem:[#allocation2 + $0xf50] sm:$0xff]  ;;  %v694_v35 = vld [vmem:[#allocation2 + $0xf98] sm:$0xff] }
 0x2d6   :  { %v7930_v13 = vcombine.low %v661_v1, %v665_v2  ;;  %v7932_v25 = vcombine.low %v662_v3, %v666_v15  ;;  %v7939_v14 = vcombine.high %v669_v8, %v673_v9  ;;  %v7941_v16 = vcombine.high %v670_v11, %v674_v12  ;;  %v693_v33 = vld [vmem:[#allocation2 + $0xf90] sm:$0xff]  ;;  %v698_v38 = vld [vmem:[#allocation2 + $0xfb8] sm:$0xff] }
 0x2d7   :  { %4651 = vmatpush1.bf16.msra.mxu0 %v7906_v28  ;;  %4866 = vmatpush1.bf16.msra.mxu1 %v7908_v34  ;;  %v7938_v20 = vcombine.low %v669_v8, %v673_v9  ;;  %v7940_v21 = vcombine.low %v670_v11, %v674_v12  ;;  %v7947_v22 = vcombine.high %v677_v17, %v681_v30  ;;  %v686_v28 = vld [vmem:[#allocation2 + $0xf58] sm:$0xff]  ;;  %v697_v34 = vld [vmem:[#allocation2 + $0xfb0] sm:$0xff] }
 0x2d8   :  { %4652 = vmatprep.subr.bf16.mxu0 %v7915_v47  ;;  %4867 = vmatprep.subr.bf16.mxu1 %v7917_v53  ;;  %v7949_v23 = vcombine.high %v678_v18, %v682_v19  ;;  %v7946_v46 = vcombine.low %v677_v17, %v681_v30  ;;  %v7948_v29 = vcombine.low %v678_v18, %v682_v19  ;;  %v701_v42 = vld [vmem:[#allocation2 + $0xfd0] sm:$0xff]  ;;  %v702_v47 = vld [vmem:[#allocation2 + $0xfd8] sm:$0xff] }
 0x2d9   :  { %v7955_v31 = vcombine.high %v685_v26, %v689_v27  ;;  %v7957_v32 = vcombine.high %v686_v28, %v690_v37  ;;  %v7954_v39 = vcombine.low %v685_v26, %v689_v27  ;;  %v7956_v55 = vcombine.low %v686_v28, %v690_v37  ;;  %v705_v45 = vld [vmem:[#allocation2 + $0xff0] sm:$0xff]  ;;  %v706_v53 = vld [vmem:[#allocation2 + $0xff8] sm:$0xff] }
 0x2da   :  { %v7963_v40 = vcombine.high %v693_v33, %v697_v34  ;;  %v7965_v41 = vcombine.high %v694_v35, %v698_v38  ;;  %v7962_v54 = vcombine.low %v693_v33, %v697_v34  ;;  %v7964_v56 = vcombine.low %v694_v35, %v698_v38  ;;  %v741_v37 = vld [vmem:[#allocation2 + $0x1110] sm:$0xff] }
 0x2db   :  { %4653 = vmatpush1.bf16.msra.mxu0 %v7914_v60  ;;  %4868 = vmatpush1.bf16.msra.mxu1 %v7916_v61  ;;  %v7971_v59 = vcombine.high %v701_v42, %v705_v45  ;;  %v7973_v58 = vcombine.high %v702_v47, %v706_v53  ;;  %v709_v60 = vld [vmem:[#allocation2 + $0x1010] sm:$0xff]  ;;  %v7970_v1 = vcombine.low %v701_v42, %v705_v45 }
 0x2dc   :  { %4654 = vmatprep.subr.bf16.mxu0 %v7923_v62  ;;  %4869 = vmatprep.subr.bf16.mxu1 %v7925_v63  ;;  %v713_v61 = vld [vmem:[#allocation2 + $0x1030] sm:$0xff]  ;;  %v710_v62 = vld [vmem:[#allocation2 + $0x1018] sm:$0xff]  ;;  %v7972_v2 = vcombine.low %v702_v47, %v706_v53 }
 0x2dd   :  { %v714_v63 = vld [vmem:[#allocation2 + $0x1038] sm:$0xff]  ;;  %v7979_v3 = vcombine.high %v709_v60, %v713_v61  ;;  %v7978_v8 = vcombine.low %v709_v60, %v713_v61  ;;  %v749_v35 = vld [vmem:[#allocation2 + $0x1150] sm:$0xff] }
 0x2de   :  { %v7981_v15 = vcombine.high %v710_v62, %v714_v63  ;;  %v7980_v9 = vcombine.low %v710_v62, %v714_v63  ;;  %v753_v38 = vld [vmem:[#allocation2 + $0x1170] sm:$0xff] }
 0x2df   :  { %4655 = vmatpush1.bf16.msra.mxu0 %v7922_v4  ;;  %4870 = vmatpush1.bf16.msra.mxu1 %v7924_v5  ;;  %v717_v4 = vld [vmem:[#allocation2 + $0x1050] sm:$0xff]  ;;  %v8019_v42 = vcombine.high %v749_v35, %v753_v38 }
 0x2e0   :  { %4656 = vmatprep.subr.bf16.mxu0 %v7931_v6  ;;  %4871 = vmatprep.subr.bf16.mxu1 %v7933_v7  ;;  %v721_v5 = vld [vmem:[#allocation2 + $0x1070] sm:$0xff]  ;;  %v718_v6 = vld [vmem:[#allocation2 + $0x1058] sm:$0xff] }
 0x2e1   :  { %v722_v7 = vld [vmem:[#allocation2 + $0x1078] sm:$0xff]  ;;  %v7987_v11 = vcombine.high %v717_v4, %v721_v5  ;;  %v7986_v17 = vcombine.low %v717_v4, %v721_v5  ;;  %v757_v47 = vld [vmem:[#allocation2 + $0x1190] sm:$0xff] }
 0x2e2   :  { %v7989_v12 = vcombine.high %v718_v6, %v722_v7  ;;  %v7988_v30 = vcombine.low %v718_v6, %v722_v7  ;;  %v761_v53 = vld [vmem:[#allocation2 + $0x11b0] sm:$0xff] }
 0x2e3   :  { %4657 = vmatpush1.bf16.msra.mxu0 %v7930_v13  ;;  %4872 = vmatpush1.bf16.msra.mxu1 %v7932_v25  ;;  %v725_v13 = vld [vmem:[#allocation2 + $0x1090] sm:$0xff]  ;;  %v8027_v60 = vcombine.high %v757_v47, %v761_v53 }
 0x2e4   :  { %4658 = vmatprep.subr.bf16.mxu0 %v7939_v14  ;;  %4873 = vmatprep.subr.bf16.mxu1 %v7941_v16  ;;  %v729_v25 = vld [vmem:[#allocation2 + $0x10b0] sm:$0xff]  ;;  %v726_v14 = vld [vmem:[#allocation2 + $0x1098] sm:$0xff] }
 0x2e5   :  { %v730_v16 = vld [vmem:[#allocation2 + $0x10b8] sm:$0xff]  ;;  %v7995_v18 = vcombine.high %v725_v13, %v729_v25  ;;  %v7994_v26 = vcombine.low %v725_v13, %v729_v25  ;;  %v765_v62 = vld [vmem:[#allocation2 + $0x11d0] sm:$0xff] }
 0x2e6   :  { %v7997_v19 = vcombine.high %v726_v14, %v730_v16  ;;  %v769_v63 = vld [vmem:[#allocation2 + $0x11f0] sm:$0xff] }
 0x2e7   :  { %4659 = vmatpush1.bf16.msra.mxu0 %v7938_v20  ;;  %4874 = vmatpush1.bf16.msra.mxu1 %v7940_v21  ;;  %v733_v20 = vld [vmem:[#allocation2 + $0x10d0] sm:$0xff]  ;;  %v8035_v4 = vcombine.high %v765_v62, %v769_v63 }
 0x2e8   :  { %4660 = vmatprep.subr.bf16.mxu0 %v7947_v22  ;;  %4875 = vmatprep.subr.bf16.mxu1 %v7949_v23  ;;  %v737_v21 = vld [vmem:[#allocation2 + $0x10f0] sm:$0xff]  ;;  %v734_v22 = vld [vmem:[#allocation2 + $0x10d8] sm:$0xff] }
 0x2e9   :  { %v738_v23 = vld [vmem:[#allocation2 + $0x10f8] sm:$0xff]  ;;  %v8003_v27 = vcombine.high %v733_v20, %v737_v21  ;;  %v773_v6 = vld [vmem:[#allocation2 + $0x1210] sm:$0xff] }
 0x2ea   :  { %v8005_v28 = vcombine.high %v734_v22, %v738_v23  ;;  %v8004_v33 = vcombine.low %v734_v22, %v738_v23  ;;  %v777_v7 = vld [vmem:[#allocation2 + $0x1230] sm:$0xff] }
 0x2eb   :  { %4661 = vmatpush1.bf16.msra.mxu0 %v7946_v46  ;;  %4876 = vmatpush1.bf16.msra.mxu1 %v7948_v29  ;;  %v745_v46 = vld [vmem:[#allocation2 + $0x1130] sm:$0xff]  ;;  %v742_v29 = vld [vmem:[#allocation2 + $0x1118] sm:$0xff]  ;;  %v8043_v13 = vcombine.high %v773_v6, %v777_v7 }
 0x2ec   :  { %4662 = vmatprep.subr.bf16.mxu0 %v7955_v31  ;;  %4877 = vmatprep.subr.bf16.mxu1 %v7957_v32  ;;  %v746_v31 = vld [vmem:[#allocation2 + $0x1138] sm:$0xff]  ;;  %v8002_v32 = vcombine.low %v733_v20, %v737_v21  ;;  %v8011_v34 = vcombine.high %v741_v37, %v745_v46  ;;  %v789_v22 = vld [vmem:[#allocation2 + $0x1290] sm:$0xff] }
 0x2ed   :  { %v793_v23 = vld [vmem:[#allocation2 + $0x12b0] sm:$0xff] }
 0x2ef   :  { %4663 = vmatpush1.bf16.msra.mxu0 %v7954_v39  ;;  %4878 = vmatpush1.bf16.msra.mxu1 %v7956_v55  ;;  %v750_v39 = vld [vmem:[#allocation2 + $0x1158] sm:$0xff] }
 0x2f0   :  { %4664 = vmatprep.subr.bf16.mxu0 %v7963_v40  ;;  %4879 = vmatprep.subr.bf16.mxu1 %v7965_v41  ;;  %v754_v55 = vld [vmem:[#allocation2 + $0x1178] sm:$0xff]  ;;  %v8010_v40 = vcombine.low %v741_v37, %v745_v46  ;;  %v8012_v41 = vcombine.low %v742_v29, %v746_v31  ;;  %v8059_v37 = vcombine.high %v789_v22, %v793_v23 }
 0x2f1   :  { %v8021_v45 = vcombine.high %v750_v39, %v754_v55 }
 0x2f3   :  { %4665 = vmatpush1.bf16.msra.mxu0 %v7962_v54  ;;  %4880 = vmatpush1.bf16.msra.mxu1 %v7964_v56  ;;  %v758_v54 = vld [vmem:[#allocation2 + $0x1198] sm:$0xff] }
 0x2f4   :  { %4666 = vmatprep.subr.bf16.mxu0 %v7971_v59  ;;  %4881 = vmatprep.subr.bf16.mxu1 %v7973_v58  ;;  %v762_v56 = vld [vmem:[#allocation2 + $0x11b8] sm:$0xff]  ;;  %v8018_v59 = vcombine.low %v749_v35, %v753_v38  ;;  %v8020_v58 = vcombine.low %v750_v39, %v754_v55  ;;  %v805_v39 = vld [vmem:[#allocation2 + $0x1310] sm:$0xff] }
 0x2f5   :  { %v8029_v61 = vcombine.high %v758_v54, %v762_v56  ;;  %v809_v55 = vld [vmem:[#allocation2 + $0x1330] sm:$0xff] }
 0x2f7   :  { %4667 = vmatpush1.bf16.msra.mxu0 %v7970_v1  ;;  %4882 = vmatpush1.bf16.msra.mxu1 %v7972_v2  ;;  %v766_v1 = vld [vmem:[#allocation2 + $0x11d8] sm:$0xff] }
 0x2f8   :  { %4679 = vmatprep.subr.bf16.mxu0 %v7979_v3  ;;  %4894 = vmatprep.subr.bf16.mxu1 %v7981_v15  ;;  %v770_v2 = vld [vmem:[#allocation2 + $0x11f8] sm:$0xff]  ;;  %v8026_v3 = vcombine.low %v757_v47, %v761_v53  ;;  %v8028_v15 = vcombine.low %v758_v54, %v762_v56  ;;  %v8075_v47 = vcombine.high %v805_v39, %v809_v55  ;;  %v813_v54 = vld [vmem:[#allocation2 + $0x1350] sm:$0xff] }
 0x2f9   :  { %v8037_v5 = vcombine.high %v766_v1, %v770_v2  ;;  %v817_v56 = vld [vmem:[#allocation2 + $0x1370] sm:$0xff] }
 0x2fa   :  { %4669 = vmatmul.mubr.bf16.vlgmr.msra.gmra.mrb[4].mxu0 %v9589_v0  ;;  %4884 = vmatmul.mubr.bf16.vlgmr.msra.gmra.mrb[4].mxu1 %v9589_v0  ;;  %v7996_v0 = vcombine.low %v726_v14, %v730_v16  ;;  %v781_v14 = vld [vmem:[#allocation2 + $0x1250] sm:$0xff] }
 0x2fb   :  { %4680 = vmatpush1.bf16.msra.mxu0 %v7978_v8  ;;  %4895 = vmatpush1.bf16.msra.mxu1 %v7980_v9  ;;  %v774_v8 = vld [vmem:[#allocation2 + $0x1218] sm:$0xff]  ;;  %v785_v16 = vld [vmem:[#allocation2 + $0x1270] sm:$0xff] }
 0x2fc   :  { %4681 = vmatprep.subr.bf16.mxu0 %v7987_v11  ;;  %4896 = vmatprep.subr.bf16.mxu1 %v7989_v12  ;;  %v778_v9 = vld [vmem:[#allocation2 + $0x1238] sm:$0xff]  ;;  %v8034_v11 = vcombine.low %v765_v62, %v769_v63  ;;  %v8036_v12 = vcombine.low %v766_v1, %v770_v2  ;;  %v8051_v20 = vcombine.high %v781_v14, %v785_v16  ;;  %v821_v1 = vld [vmem:[#allocation2 + $0x1390] sm:$0xff] }
 0x2fd   :  { %4711 = vmatprep.mubr.bf16.mxu0 %v9597_v10  ;;  %4926 = vmatprep.mubr.bf16.mxu1 %v9597_v10  ;;  %v8013_v10 = vcombine.high %v742_v29, %v746_v31  ;;  %v8045_v25 = vcombine.high %v774_v8, %v778_v9  ;;  %v797_v29 = vld [vmem:[#allocation2 + $0x12d0] sm:$0xff]  ;;  %v8083_v62 = vcombine.high %v813_v54, %v817_v56 }
 0x2fe   :  { %v801_v31 = vld [vmem:[#allocation2 + $0x12f0] sm:$0xff] }
 0x2ff   :  { %4682 = vmatpush1.bf16.msra.mxu0 %v7986_v17  ;;  %4897 = vmatpush1.bf16.msra.mxu1 %v7988_v30  ;;  %v782_v17 = vld [vmem:[#allocation2 + $0x1258] sm:$0xff]  ;;  %v8067_v35 = vcombine.high %v797_v29, %v801_v31  ;;  %v825_v2 = vld [vmem:[#allocation2 + $0x13b0] sm:$0xff] }
 0x300   :  { %4683 = vmatprep.subr.bf16.mxu0 %v7995_v18  ;;  %4898 = vmatprep.subr.bf16.mxu1 %v7997_v19  ;;  %v786_v30 = vld [vmem:[#allocation2 + $0x1278] sm:$0xff]  ;;  %v8042_v18 = vcombine.low %v773_v6, %v777_v7  ;;  %v8044_v19 = vcombine.low %v774_v8, %v778_v9  ;;  %v8091_v6 = vcombine.high %v821_v1, %v825_v2  ;;  %v829_v8 = vld [vmem:[#allocation2 + $0x13d0] sm:$0xff] }
 0x301   :  { %v8053_v21 = vcombine.high %v782_v17, %v786_v30  ;;  %v833_v9 = vld [vmem:[#allocation2 + $0x13f0] sm:$0xff] }
 0x303   :  { %4684 = vmatpush1.bf16.msra.mxu0 %v7994_v26  ;;  %4899 = vmatpush1.bf16.msra.mxu1 %v7996_v0  ;;  %v790_v26 = vld [vmem:[#allocation2 + $0x1298] sm:$0xff] }
 0x304   :  { %4685 = vmatprep.subr.bf16.mxu0 %v8003_v27  ;;  %4900 = vmatprep.subr.bf16.mxu1 %v8005_v28  ;;  %v794_v0 = vld [vmem:[#allocation2 + $0x12b8] sm:$0xff]  ;;  %v8050_v27 = vcombine.low %v781_v14, %v785_v16  ;;  %v8052_v28 = vcombine.low %v782_v17, %v786_v30  ;;  %v8099_v14 = vcombine.high %v829_v8, %v833_v9 }
 0x305   :  { %v8061_v46 = vcombine.high %v790_v26, %v794_v0  ;;  %v8098_v17 = vcombine.low %v829_v8, %v833_v9  ;;  %v8707_v8 = vld [vmem:[#allocation6 + $0x160] ss:$16 sps:$4 sm:$0xff]   ;;  %v8710_v9 = vld [vmem:[#allocation6 + $0x168] ss:$16 sps:$4 sm:$0xff]  }
 0x307   :  { %4686 = vmatpush1.bf16.msra.mxu0 %v8002_v32  ;;  %4901 = vmatpush1.bf16.msra.mxu1 %v8004_v33  ;;  %v798_v32 = vld [vmem:[#allocation2 + $0x12d8] sm:$0xff] }
 0x308   :  { %4687 = vmatprep.subr.bf16.mxu0 %v8011_v34  ;;  %4902 = vmatprep.subr.bf16.mxu1 %v8013_v10  ;;  %v802_v33 = vld [vmem:[#allocation2 + $0x12f8] sm:$0xff]  ;;  %v8058_v34 = vcombine.low %v789_v22, %v793_v23  ;;  %v8060_v10 = vcombine.low %v790_v26, %v794_v0  ;;  %v8652_v23 = vld [vmem:[#allocation6 + $0x2c] ss:$16 sps:$4 sm:$0xff]   ;;  %v8650_v0 = vld [vmem:[#allocation6 + $0x28] ss:$16 sps:$4 sm:$0xff]  }
 0x309   :  { %v8069_v38 = vcombine.high %v798_v32, %v802_v33  ;;  %v8649_v22 = vld [vmem:[#allocation6 + $0x24] ss:$16 sps:$4 sm:$0xff]   ;;  %v8647_v26 = vld [vmem:[#allocation6 + $0x20] ss:$16 sps:$4 sm:$0xff]  }
 0x30b   :  { %4688 = vmatpush1.bf16.msra.mxu0 %v8010_v40  ;;  %4903 = vmatpush1.bf16.msra.mxu1 %v8012_v41  ;;  %v806_v40 = vld [vmem:[#allocation2 + $0x1318] sm:$0xff] }
 0x30c   :  { %4689 = vmatprep.subr.bf16.mxu0 %v8019_v42  ;;  %4904 = vmatprep.subr.bf16.mxu1 %v8021_v45  ;;  %v810_v41 = vld [vmem:[#allocation2 + $0x1338] sm:$0xff]  ;;  %v8066_v42 = vcombine.low %v797_v29, %v801_v31  ;;  %v8068_v45 = vcombine.low %v798_v32, %v802_v33  ;;  %v8662_v32 = vld [vmem:[#allocation6 + $0x68] ss:$16 sps:$4 sm:$0xff]  }
 0x30d   :  { %v8077_v53 = vcombine.high %v806_v40, %v810_v41  ;;  %v8661_v29 = vld [vmem:[#allocation6 + $0x64] ss:$16 sps:$4 sm:$0xff]   ;;  %v8659_v31 = vld [vmem:[#allocation6 + $0x60] ss:$16 sps:$4 sm:$0xff]  }
 0x30e   :  { %v8667_v33 = vld [vmem:[#allocation6 + $0x84] ss:$16 sps:$4 sm:$0xff]  }
 0x30f   :  { %4690 = vmatpush1.bf16.msra.mxu0 %v8018_v59  ;;  %4905 = vmatpush1.bf16.msra.mxu1 %v8020_v58  ;;  %v814_v59 = vld [vmem:[#allocation2 + $0x1358] sm:$0xff] }
 0x310   :  { %4691 = vmatprep.subr.bf16.mxu0 %v8027_v60  ;;  %4906 = vmatprep.subr.bf16.mxu1 %v8029_v61  ;;  %v818_v58 = vld [vmem:[#allocation2 + $0x1378] sm:$0xff]  ;;  %v8074_v60 = vcombine.low %v805_v39, %v809_v55  ;;  %v8076_v61 = vcombine.low %v806_v40, %v810_v41  ;;  %v8674_v55 = vld [vmem:[#allocation6 + $0xa8] ss:$16 sps:$4 sm:$0xff]   ;;  %v8682_v41 = vld [vmem:[#allocation6 + $0xcc] ss:$16 sps:$4 sm:$0xff]  }
 0x311   :  { %v8085_v63 = vcombine.high %v814_v59, %v818_v58  ;;  %v8671_v39 = vld [vmem:[#allocation6 + $0xa0] ss:$16 sps:$4 sm:$0xff]   ;;  %v8679_v40 = vld [vmem:[#allocation6 + $0xc4] ss:$16 sps:$4 sm:$0xff]  }
 0x313   :  { %4692 = vmatpush1.bf16.msra.mxu0 %v8026_v3  ;;  %4907 = vmatpush1.bf16.msra.mxu1 %v8028_v15  ;;  %v822_v3 = vld [vmem:[#allocation2 + $0x1398] sm:$0xff] }
 0x314   :  { %4693 = vmatprep.subr.bf16.mxu0 %v8035_v4  ;;  %4908 = vmatprep.subr.bf16.mxu1 %v8037_v5  ;;  %v826_v15 = vld [vmem:[#allocation2 + $0x13b8] sm:$0xff]  ;;  %v8082_v4 = vcombine.low %v813_v54, %v817_v56  ;;  %v8084_v5 = vcombine.low %v814_v59, %v818_v58  ;;  %v8686_v56 = vld [vmem:[#allocation6 + $0xe8] ss:$16 sps:$4 sm:$0xff]   ;;  %v8694_v58 = vld [vmem:[#allocation6 + $0x10c] ss:$16 sps:$4 sm:$0xff]  }
 0x315   :  { %v8093_v7 = vcombine.high %v822_v3, %v826_v15  ;;  %v8683_v54 = vld [vmem:[#allocation6 + $0xe0] ss:$16 sps:$4 sm:$0xff]   ;;  %v8691_v59 = vld [vmem:[#allocation6 + $0x104] ss:$16 sps:$4 sm:$0xff]  }
 0x317   :  { %4694 = vmatpush1.bf16.msra.mxu0 %v8034_v11  ;;  %4909 = vmatpush1.bf16.msra.mxu1 %v8036_v12  ;;  %v830_v11 = vld [vmem:[#allocation2 + $0x13d8] sm:$0xff] }
 0x318   :  { %4695 = vmatprep.subr.bf16.mxu0 %v8043_v13  ;;  %4910 = vmatprep.subr.bf16.mxu1 %v8045_v25  ;;  %v834_v12 = vld [vmem:[#allocation2 + $0x13f8] sm:$0xff]  ;;  %v8090_v13 = vcombine.low %v821_v1, %v825_v2  ;;  %v8092_v25 = vcombine.low %v822_v3, %v826_v15  ;;  %v8698_v2 = vld [vmem:[#allocation6 + $0x128] ss:$16 sps:$4 sm:$0xff]   ;;  %v8706_v15 = vld [vmem:[#allocation6 + $0x14c] ss:$16 sps:$4 sm:$0xff]  }
 0x319   :  { %v8101_v16 = vcombine.high %v830_v11, %v834_v12  ;;  %v8100_v30 = vcombine.low %v830_v11, %v834_v12  ;;  %v8695_v1 = vld [vmem:[#allocation6 + $0x120] ss:$16 sps:$4 sm:$0xff]   ;;  %v8703_v3 = vld [vmem:[#allocation6 + $0x144] ss:$16 sps:$4 sm:$0xff]   ;;  %v8718_v12 = vld [vmem:[#allocation6 + $0x18c] ss:$16 sps:$4 sm:$0xff]  }
 0x31a   :  { %v8715_v11 = vld [vmem:[#allocation6 + $0x184] ss:$16 sps:$4 sm:$0xff]  }
 0x31b   :  { %4696 = vmatpush1.bf16.msra.mxu0 %v8042_v18  ;;  %4911 = vmatpush1.bf16.msra.mxu1 %v8044_v19  ;;  %v8643_v18 = vld [vmem:[#allocation6 + $0x4] ss:$16 sps:$4 sm:$0xff]   ;;  %v8646_v19 = vld [vmem:[#allocation6 + $0xc] ss:$16 sps:$4 sm:$0xff]  }
 0x31c   :  { %4697 = vmatprep.subr.bf16.mxu0 %v8051_v20  ;;  %4912 = vmatprep.subr.bf16.mxu1 %v8053_v21  ;;  %v8641_v20 = vld [vmem:[#allocation6] ss:$16 sps:$4 sm:$0xff]   ;;  %v8644_v21 = vld [vmem:[#allocation6 + $0x8] ss:$16 sps:$4 sm:$0xff]  }
 0x31f   :  { %4698 = vmatpush1.bf16.msra.mxu0 %v8050_v27  ;;  %4913 = vmatpush1.bf16.msra.mxu1 %v8052_v28  ;;  %v8655_v27 = vld [vmem:[#allocation6 + $0x44] ss:$16 sps:$4 sm:$0xff]   ;;  %v8658_v28 = vld [vmem:[#allocation6 + $0x4c] ss:$16 sps:$4 sm:$0xff]  }
 0x320   :  { %4699 = vmatprep.subr.bf16.mxu0 %v8059_v37  ;;  %4914 = vmatprep.subr.bf16.mxu1 %v8061_v46  ;;  %v8653_v37 = vld [vmem:[#allocation6 + $0x40] ss:$16 sps:$4 sm:$0xff]   ;;  %v8656_v46 = vld [vmem:[#allocation6 + $0x48] ss:$16 sps:$4 sm:$0xff]  }
 0x323   :  { %4700 = vmatpush1.bf16.msra.mxu0 %v8058_v34  ;;  %4915 = vmatpush1.bf16.msra.mxu1 %v8060_v10  ;;  %v8670_v34 = vld [vmem:[#allocation6 + $0x8c] ss:$16 sps:$4 sm:$0xff]   ;;  %v8668_v10 = vld [vmem:[#allocation6 + $0x88] ss:$16 sps:$4 sm:$0xff]  }
 0x324   :  { %4701 = vmatprep.subr.bf16.mxu0 %v8067_v35  ;;  %4916 = vmatprep.subr.bf16.mxu1 %v8069_v38  ;;  %v8673_v35 = vld [vmem:[#allocation6 + $0xa4] ss:$16 sps:$4 sm:$0xff]   ;;  %v8676_v38 = vld [vmem:[#allocation6 + $0xac] ss:$16 sps:$4 sm:$0xff]  }
 0x327   :  { %4702 = vmatpush1.bf16.msra.mxu0 %v8066_v42  ;;  %4917 = vmatpush1.bf16.msra.mxu1 %v8068_v45  ;;  %v8677_v42 = vld [vmem:[#allocation6 + $0xc0] ss:$16 sps:$4 sm:$0xff]   ;;  %v8680_v45 = vld [vmem:[#allocation6 + $0xc8] ss:$16 sps:$4 sm:$0xff]  }
 0x328   :  { %4703 = vmatprep.subr.bf16.mxu0 %v8075_v47  ;;  %4918 = vmatprep.subr.bf16.mxu1 %v8077_v53  ;;  %v8685_v47 = vld [vmem:[#allocation6 + $0xe4] ss:$16 sps:$4 sm:$0xff]   ;;  %v8688_v53 = vld [vmem:[#allocation6 + $0xec] ss:$16 sps:$4 sm:$0xff]  }
 0x32b   :  { %4704 = vmatpush1.bf16.msra.mxu0 %v8074_v60  ;;  %4919 = vmatpush1.bf16.msra.mxu1 %v8076_v61  ;;  %v8689_v60 = vld [vmem:[#allocation6 + $0x100] ss:$16 sps:$4 sm:$0xff]   ;;  %v8692_v61 = vld [vmem:[#allocation6 + $0x108] ss:$16 sps:$4 sm:$0xff]  }
 0x32c   :  { %4705 = vmatprep.subr.bf16.mxu0 %v8083_v62  ;;  %4920 = vmatprep.subr.bf16.mxu1 %v8085_v63  ;;  %v8697_v62 = vld [vmem:[#allocation6 + $0x124] ss:$16 sps:$4 sm:$0xff]   ;;  %v8700_v63 = vld [vmem:[#allocation6 + $0x12c] ss:$16 sps:$4 sm:$0xff]  }
 0x32f   :  { %4706 = vmatpush1.bf16.msra.mxu0 %v8082_v4  ;;  %4921 = vmatpush1.bf16.msra.mxu1 %v8084_v5  ;;  %v8701_v4 = vld [vmem:[#allocation6 + $0x140] ss:$16 sps:$4 sm:$0xff]   ;;  %v8704_v5 = vld [vmem:[#allocation6 + $0x148] ss:$16 sps:$4 sm:$0xff]  }
 0x330   :  { %4707 = vmatprep.subr.bf16.mxu0 %v8091_v6  ;;  %4922 = vmatprep.subr.bf16.mxu1 %v8093_v7  ;;  %v8709_v6 = vld [vmem:[#allocation6 + $0x164] ss:$16 sps:$4 sm:$0xff]   ;;  %v8712_v7 = vld [vmem:[#allocation6 + $0x16c] ss:$16 sps:$4 sm:$0xff]  }
 0x333   :  { %4708 = vmatpush1.bf16.msra.mxu0 %v8090_v13  ;;  %4923 = vmatpush1.bf16.msra.mxu1 %v8092_v25  ;;  %v8713_v13 = vld [vmem:[#allocation6 + $0x180] ss:$16 sps:$4 sm:$0xff]   ;;  %v8716_v25 = vld [vmem:[#allocation6 + $0x188] ss:$16 sps:$4 sm:$0xff]  }
 0x334   :  { %4709 = vmatprep.subr.bf16.mxu0 %v8099_v14  ;;  %4924 = vmatprep.subr.bf16.mxu1 %v8101_v16  ;;  %v8721_v14 = vld [vmem:[#allocation6 + $0x1a4] ss:$16 sps:$4 sm:$0xff]   ;;  %v8724_v16 = vld [vmem:[#allocation6 + $0x1ac] ss:$16 sps:$4 sm:$0xff]  }
 0x337   :  { %4710 = vmatpush1.bf16.msra.mxu0 %v8098_v17  ;;  %4925 = vmatpush1.bf16.msra.mxu1 %v8100_v30  ;;  %v8719_v17 = vld [vmem:[#allocation6 + $0x1a0] ss:$16 sps:$4 sm:$0xff]   ;;  %v8722_v30 = vld [vmem:[#allocation6 + $0x1a8] ss:$16 sps:$4 sm:$0xff]  }
 0x338   :  { %6519 = vmatprep.subr.bf16.mxu0 %v8643_v18  ;;  %6691 = vmatprep.subr.bf16.mxu1 %v8646_v19  ;;  %v8727_v18 = vld [vmem:[#allocation6 + $0x1c4] ss:$16 sps:$4 sm:$0xff]   ;;  %v8730_v19 = vld [vmem:[#allocation6 + $0x1cc] ss:$16 sps:$4 sm:$0xff]  }
 0x33a   :  { %4712 = vmatmul.mubr.bf16.vlgmr.msra.gmra.mrb[4].mxu0 %v9609_v24  ;;  %4927 = vmatmul.mubr.bf16.vlgmr.msra.gmra.mrb[4].mxu1 %v9609_v24  ;;  %v8664_v24 = vld [vmem:[#allocation6 + $0x6c] ss:$16 sps:$4 sm:$0xff]  }
 0x33b   :  { %6520 = vmatpush1.bf16.msra.mxu0 %v8641_v20  ;;  %6551 = vmatprep.mubr.bf16.mxu0 %v9645_v51  ;;  %v8725_v20 = vld [vmem:[#allocation6 + $0x1c0] ss:$16 sps:$4 sm:$0xff]  }
 0x33c   :  { %6692 = vmatpush1.bf16.msra.mxu1 %v8644_v21  ;;  %6723 = vmatprep.mubr.bf16.mxu1 %v9645_v51  ;;  %v8665_v51 = vld [vmem:[#allocation6 + $0x80] ss:$16 sps:$4 sm:$0xff]   ;;  %v8728_v21 = vld [vmem:[#allocation6 + $0x1c8] ss:$16 sps:$4 sm:$0xff]  }
 0x33d   :  { %6521 = vmatprep.subr.bf16.mxu0 %v8649_v22  ;;  %6693 = vmatprep.subr.bf16.mxu1 %v8652_v23  ;;  %v8733_v22 = vld [vmem:[#allocation6 + $0x1e4] ss:$16 sps:$4 sm:$0xff]   ;;  %v8736_v23 = vld [vmem:[#allocation6 + $0x1ec] ss:$16 sps:$4 sm:$0xff]  }
 0x33f   :  { %6522 = vmatpush1.bf16.msra.mxu0 %v8647_v26  ;;  %v8731_v26 = vld [vmem:[#allocation6 + $0x1e0] ss:$16 sps:$4 sm:$0xff]  }
 0x340   :  { %6694 = vmatpush1.bf16.msra.mxu1 %v8650_v0  ;;  %6523 = vmatprep.subr.bf16.mxu0 %v8655_v27  ;;  %v8734_v0 = vld [vmem:[#allocation6 + $0x1e8] ss:$16 sps:$4 sm:$0xff]   ;;  %v8739_v27 = vld [vmem:[#allocation6 + $0x204] ss:$16 sps:$4 sm:$0xff]  }
 0x341   :  { %6695 = vmatprep.subr.bf16.mxu1 %v8658_v28  ;;  %v8742_v28 = vld [vmem:[#allocation6 + $0x20c] ss:$16 sps:$4 sm:$0xff]  }
 0x343   :  { %6524 = vmatpush1.bf16.msra.mxu0 %v8653_v37  ;;  %v8737_v37 = vld [vmem:[#allocation6 + $0x200] ss:$16 sps:$4 sm:$0xff]  }
 0x344   :  { %6696 = vmatpush1.bf16.msra.mxu1 %v8656_v46  ;;  %6525 = vmatprep.subr.bf16.mxu0 %v8661_v29  ;;  %v8740_v46 = vld [vmem:[#allocation6 + $0x208] ss:$16 sps:$4 sm:$0xff]   ;;  %v8745_v29 = vld [vmem:[#allocation6 + $0x224] ss:$16 sps:$4 sm:$0xff]  }
 0x345   :  { %6697 = vmatprep.subr.bf16.mxu1 %v8664_v24  ;;  %v8748_v24 = vld [vmem:[#allocation6 + $0x22c] ss:$16 sps:$4 sm:$0xff]  }
 0x347   :  { %6526 = vmatpush1.bf16.msra.mxu0 %v8659_v31  ;;  %v8743_v31 = vld [vmem:[#allocation6 + $0x220] ss:$16 sps:$4 sm:$0xff]  }
 0x348   :  { %6698 = vmatpush1.bf16.msra.mxu1 %v8662_v32  ;;  %6527 = vmatprep.subr.bf16.mxu0 %v8667_v33  ;;  %v8746_v32 = vld [vmem:[#allocation6 + $0x228] ss:$16 sps:$4 sm:$0xff]   ;;  %v8751_v33 = vld [vmem:[#allocation6 + $0x244] ss:$16 sps:$4 sm:$0xff]  }
 0x349   :  { %6699 = vmatprep.subr.bf16.mxu1 %v8670_v34  ;;  %v8754_v34 = vld [vmem:[#allocation6 + $0x24c] ss:$16 sps:$4 sm:$0xff]  }
 0x34b   :  { %6528 = vmatpush1.bf16.msra.mxu0 %v8665_v51  ;;  %v8749_v51 = vld [vmem:[#allocation6 + $0x240] ss:$16 sps:$4 sm:$0xff]  }
 0x34c   :  { %6700 = vmatpush1.bf16.msra.mxu1 %v8668_v10  ;;  %6529 = vmatprep.subr.bf16.mxu0 %v8673_v35  ;;  %v8752_v10 = vld [vmem:[#allocation6 + $0x248] ss:$16 sps:$4 sm:$0xff]   ;;  %v8757_v35 = vld [vmem:[#allocation6 + $0x264] ss:$16 sps:$4 sm:$0xff]  }
 0x34d   :  { %6701 = vmatprep.subr.bf16.mxu1 %v8676_v38  ;;  %v8755_v38 = vld [vmem:[#allocation6 + $0x260] ss:$16 sps:$4 sm:$0xff]  }
 0x34f   :  { %6530 = vmatpush1.bf16.msra.mxu0 %v8671_v39  ;;  %v8758_v39 = vld [vmem:[#allocation6 + $0x268] ss:$16 sps:$4 sm:$0xff]  }
 0x350   :  { %6702 = vmatpush1.bf16.msra.mxu1 %v8674_v55  ;;  %6531 = vmatprep.subr.bf16.mxu0 %v8679_v40  ;;  %v8763_v55 = vld [vmem:[#allocation6 + $0x284] ss:$16 sps:$4 sm:$0xff]   ;;  %v8766_v40 = vld [vmem:[#allocation6 + $0x28c] ss:$16 sps:$4 sm:$0xff]  }
 0x351   :  { %6703 = vmatprep.subr.bf16.mxu1 %v8682_v41  ;;  %v8764_v41 = vld [vmem:[#allocation6 + $0x288] ss:$16 sps:$4 sm:$0xff]  }
 0x353   :  { %6532 = vmatpush1.bf16.msra.mxu0 %v8677_v42  ;;  %v8769_v42 = vld [vmem:[#allocation6 + $0x2a4] ss:$16 sps:$4 sm:$0xff]  }
 0x354   :  { %6704 = vmatpush1.bf16.msra.mxu1 %v8680_v45  ;;  %6533 = vmatprep.subr.bf16.mxu0 %v8685_v47  ;;  %v8772_v45 = vld [vmem:[#allocation6 + $0x2ac] ss:$16 sps:$4 sm:$0xff]   ;;  %v8767_v47 = vld [vmem:[#allocation6 + $0x2a0] ss:$16 sps:$4 sm:$0xff]  }
 0x355   :  { %6705 = vmatprep.subr.bf16.mxu1 %v8688_v53  ;;  %v8770_v53 = vld [vmem:[#allocation6 + $0x2a8] ss:$16 sps:$4 sm:$0xff]  }
 0x357   :  { %6534 = vmatpush1.bf16.msra.mxu0 %v8683_v54  ;;  %v8775_v54 = vld [vmem:[#allocation6 + $0x2c4] ss:$16 sps:$4 sm:$0xff]  }
 0x358   :  { %6706 = vmatpush1.bf16.msra.mxu1 %v8686_v56  ;;  %6535 = vmatprep.subr.bf16.mxu0 %v8691_v59  ;;  %v8778_v56 = vld [vmem:[#allocation6 + $0x2cc] ss:$16 sps:$4 sm:$0xff]   ;;  %v8773_v59 = vld [vmem:[#allocation6 + $0x2c0] ss:$16 sps:$4 sm:$0xff]  }
 0x359   :  { %6707 = vmatprep.subr.bf16.mxu1 %v8694_v58  ;;  %v8776_v58 = vld [vmem:[#allocation6 + $0x2c8] ss:$16 sps:$4 sm:$0xff]  }
 0x35b   :  { %6536 = vmatpush1.bf16.msra.mxu0 %v8689_v60  ;;  %v8781_v60 = vld [vmem:[#allocation6 + $0x2e4] ss:$16 sps:$4 sm:$0xff]  }
 0x35c   :  { %6708 = vmatpush1.bf16.msra.mxu1 %v8692_v61  ;;  %6537 = vmatprep.subr.bf16.mxu0 %v8697_v62  ;;  %v8784_v61 = vld [vmem:[#allocation6 + $0x2ec] ss:$16 sps:$4 sm:$0xff]   ;;  %v8779_v62 = vld [vmem:[#allocation6 + $0x2e0] ss:$16 sps:$4 sm:$0xff]  }
 0x35d   :  { %6709 = vmatprep.subr.bf16.mxu1 %v8700_v63  ;;  %v8782_v63 = vld [vmem:[#allocation6 + $0x2e8] ss:$16 sps:$4 sm:$0xff]  }
 0x35f   :  { %6538 = vmatpush1.bf16.msra.mxu0 %v8695_v1  ;;  %v8787_v1 = vld [vmem:[#allocation6 + $0x304] ss:$16 sps:$4 sm:$0xff]  }
 0x360   :  { %6710 = vmatpush1.bf16.msra.mxu1 %v8698_v2  ;;  %6539 = vmatprep.subr.bf16.mxu0 %v8703_v3  ;;  %v8790_v2 = vld [vmem:[#allocation6 + $0x30c] ss:$16 sps:$4 sm:$0xff]   ;;  %v8785_v3 = vld [vmem:[#allocation6 + $0x300] ss:$16 sps:$4 sm:$0xff]  }
 0x361   :  { %6711 = vmatprep.subr.bf16.mxu1 %v8706_v15  ;;  %v8788_v15 = vld [vmem:[#allocation6 + $0x308] ss:$16 sps:$4 sm:$0xff]  }
 0x363   :  { %6540 = vmatpush1.bf16.msra.mxu0 %v8701_v4  ;;  %v8793_v4 = vld [vmem:[#allocation6 + $0x324] ss:$16 sps:$4 sm:$0xff]  }
 0x364   :  { %6712 = vmatpush1.bf16.msra.mxu1 %v8704_v5  ;;  %6541 = vmatprep.subr.bf16.mxu0 %v8709_v6  ;;  %v8796_v5 = vld [vmem:[#allocation6 + $0x32c] ss:$16 sps:$4 sm:$0xff]   ;;  %v8791_v6 = vld [vmem:[#allocation6 + $0x320] ss:$16 sps:$4 sm:$0xff]  }
 0x365   :  { %6713 = vmatprep.subr.bf16.mxu1 %v8712_v7  ;;  %v8794_v7 = vld [vmem:[#allocation6 + $0x328] ss:$16 sps:$4 sm:$0xff]  }
 0x367   :  { %6542 = vmatpush1.bf16.msra.mxu0 %v8707_v8  ;;  %v8799_v8 = vld [vmem:[#allocation6 + $0x344] ss:$16 sps:$4 sm:$0xff]  }
 0x368   :  { %6714 = vmatpush1.bf16.msra.mxu1 %v8710_v9  ;;  %6543 = vmatprep.subr.bf16.mxu0 %v8715_v11  ;;  %v8802_v9 = vld [vmem:[#allocation6 + $0x34c] ss:$16 sps:$4 sm:$0xff]   ;;  %v8797_v11 = vld [vmem:[#allocation6 + $0x340] ss:$16 sps:$4 sm:$0xff]  }
 0x369   :  { %6715 = vmatprep.subr.bf16.mxu1 %v8718_v12  ;;  %v8800_v12 = vld [vmem:[#allocation6 + $0x348] ss:$16 sps:$4 sm:$0xff]  }
 0x36b   :  { %6544 = vmatpush1.bf16.msra.mxu0 %v8713_v13  ;;  %v8805_v13 = vld [vmem:[#allocation6 + $0x364] ss:$16 sps:$4 sm:$0xff]  }
 0x36c   :  { %6716 = vmatpush1.bf16.msra.mxu1 %v8716_v25  ;;  %6545 = vmatprep.subr.bf16.mxu0 %v8721_v14  ;;  %v8808_v25 = vld [vmem:[#allocation6 + $0x36c] ss:$16 sps:$4 sm:$0xff]   ;;  %v8803_v14 = vld [vmem:[#allocation6 + $0x360] ss:$16 sps:$4 sm:$0xff]  }
 0x36d   :  { %6717 = vmatprep.subr.bf16.mxu1 %v8724_v16  ;;  %v8806_v16 = vld [vmem:[#allocation6 + $0x368] ss:$16 sps:$4 sm:$0xff]  }
 0x36f   :  { %6546 = vmatpush1.bf16.msra.mxu0 %v8719_v17  ;;  %v8811_v17 = vld [vmem:[#allocation6 + $0x384] ss:$16 sps:$4 sm:$0xff]  }
 0x370   :  { %6718 = vmatpush1.bf16.msra.mxu1 %v8722_v30  ;;  %6547 = vmatprep.subr.bf16.mxu0 %v8727_v18  ;;  %v8814_v30 = vld [vmem:[#allocation6 + $0x38c] ss:$16 sps:$4 sm:$0xff]   ;;  %v8809_v18 = vld [vmem:[#allocation6 + $0x380] ss:$16 sps:$4 sm:$0xff]  }
 0x371   :  { %6719 = vmatprep.subr.bf16.mxu1 %v8730_v19  ;;  %v8812_v19 = vld [vmem:[#allocation6 + $0x388] ss:$16 sps:$4 sm:$0xff]  }
 0x373   :  { %6548 = vmatpush1.bf16.msra.mxu0 %v8725_v20  ;;  %v8817_v20 = vld [vmem:[#allocation6 + $0x3a4] ss:$16 sps:$4 sm:$0xff]  }
 0x374   :  { %6720 = vmatpush1.bf16.msra.mxu1 %v8728_v21  ;;  %6549 = vmatprep.subr.bf16.mxu0 %v8733_v22  ;;  %v8820_v21 = vld [vmem:[#allocation6 + $0x3ac] ss:$16 sps:$4 sm:$0xff]   ;;  %v8815_v22 = vld [vmem:[#allocation6 + $0x3a0] ss:$16 sps:$4 sm:$0xff]  }
 0x375   :  { %6721 = vmatprep.subr.bf16.mxu1 %v8736_v23  ;;  %v8818_v23 = vld [vmem:[#allocation6 + $0x3a8] ss:$16 sps:$4 sm:$0xff]  }
 0x377   :  { %6550 = vmatpush1.bf16.msra.mxu0 %v8731_v26  ;;  %v8823_v26 = vld [vmem:[#allocation6 + $0x3c4] ss:$16 sps:$4 sm:$0xff]  }
 0x378   :  { %6722 = vmatpush1.bf16.msra.mxu1 %v8734_v0  ;;  %6562 = vmatprep.subr.bf16.mxu0 %v8739_v27  ;;  %v8826_v0 = vld [vmem:[#allocation6 + $0x3cc] ss:$16 sps:$4 sm:$0xff]   ;;  %v8821_v27 = vld [vmem:[#allocation6 + $0x3c0] ss:$16 sps:$4 sm:$0xff]  }
 0x379   :  { %6734 = vmatprep.subr.bf16.mxu1 %v8742_v28  ;;  %v8824_v28 = vld [vmem:[#allocation6 + $0x3c8] ss:$16 sps:$4 sm:$0xff]  }
 0x37a   :  { %6552 = vmatmul.mubr.bf16.vlgmr.msra.gmra.mrb[8].mxu0 %v9641_v44 }
 0x37b   :  { %6724 = vmatmul.mubr.bf16.vlgmr.msra.gmra.mrb[8].mxu1 %v9641_v44  ;;  %6563 = vmatpush1.bf16.msra.mxu0 %v8737_v37  ;;  %v8760_v44 = vld [vmem:[#allocation6 + $0x26c] ss:$16 sps:$4 sm:$0xff]   ;;  %v8829_v37 = vld [vmem:[#allocation6 + $0x3e4] ss:$16 sps:$4 sm:$0xff]  }
 0x37c   :  { %6594 = vmatprep.mubr.bf16.mxu0 %v9647_v57  ;;  %6735 = vmatpush1.bf16.msra.mxu1 %v8740_v46  ;;  %v8832_v46 = vld [vmem:[#allocation6 + $0x3ec] ss:$16 sps:$4 sm:$0xff]  }
 0x37d   :  { %6766 = vmatprep.mubr.bf16.mxu1 %v9647_v57  ;;  %6564 = vmatprep.subr.bf16.mxu0 %v8745_v29  ;;  %v8761_v57 = vld [vmem:[#allocation6 + $0x280] ss:$16 sps:$4 sm:$0xff]  }
 0x37e   :  { %6736 = vmatprep.subr.bf16.mxu1 %v8748_v24  ;;  %v8827_v29 = vld [vmem:[#allocation6 + $0x3e0] ss:$16 sps:$4 sm:$0xff]   ;;  %v8830_v24 = vld [vmem:[#allocation6 + $0x3e8] ss:$16 sps:$4 sm:$0xff]  }
 0x37f   :  { %6565 = vmatpush1.bf16.msra.mxu0 %v8743_v31  ;;  %v8835_v31 = vld [vmem:[#allocation6 + $0x404] ss:$16 sps:$4 sm:$0xff]  }
 0x380   :  { %6737 = vmatpush1.bf16.msra.mxu1 %v8746_v32  ;;  %6566 = vmatprep.subr.bf16.mxu0 %v8751_v33  ;;  %v8838_v32 = vld [vmem:[#allocation6 + $0x40c] ss:$16 sps:$4 sm:$0xff]   ;;  %v8833_v33 = vld [vmem:[#allocation6 + $0x400] ss:$16 sps:$4 sm:$0xff]  }
 0x381   :  { %6738 = vmatprep.subr.bf16.mxu1 %v8754_v34  ;;  %v8836_v34 = vld [vmem:[#allocation6 + $0x408] ss:$16 sps:$4 sm:$0xff]  }
 0x383   :  { %6567 = vmatpush1.bf16.msra.mxu0 %v8749_v51  ;;  %v8841_v51 = vld [vmem:[#allocation6 + $0x424] ss:$16 sps:$4 sm:$0xff]  }
 0x384   :  { %6739 = vmatpush1.bf16.msra.mxu1 %v8752_v10  ;;  %6568 = vmatprep.subr.bf16.mxu0 %v8757_v35  ;;  %v8844_v10 = vld [vmem:[#allocation6 + $0x42c] ss:$16 sps:$4 sm:$0xff]   ;;  %v8839_v35 = vld [vmem:[#allocation6 + $0x420] ss:$16 sps:$4 sm:$0xff]  }
 0x385   :  { %6740 = vmatprep.subr.bf16.mxu1 %v8760_v44  ;;  %v8842_v44 = vld [vmem:[#allocation6 + $0x428] ss:$16 sps:$4 sm:$0xff]  }
 0x387   :  { %6569 = vmatpush1.bf16.msra.mxu0 %v8755_v38  ;;  %v8847_v38 = vld [vmem:[#allocation6 + $0x444] ss:$16 sps:$4 sm:$0xff]  }
 0x388   :  { %6741 = vmatpush1.bf16.msra.mxu1 %v8758_v39  ;;  %6570 = vmatprep.subr.bf16.mxu0 %v8763_v55  ;;  %v8850_v39 = vld [vmem:[#allocation6 + $0x44c] ss:$16 sps:$4 sm:$0xff]   ;;  %v8845_v55 = vld [vmem:[#allocation6 + $0x440] ss:$16 sps:$4 sm:$0xff]  }
 0x389   :  { %6742 = vmatprep.subr.bf16.mxu1 %v8766_v40  ;;  %v8848_v40 = vld [vmem:[#allocation6 + $0x448] ss:$16 sps:$4 sm:$0xff]  }
 0x38b   :  { %6571 = vmatpush1.bf16.msra.mxu0 %v8761_v57  ;;  %v8853_v57 = vld [vmem:[#allocation6 + $0x464] ss:$16 sps:$4 sm:$0xff]  }
 0x38c   :  { %6743 = vmatpush1.bf16.msra.mxu1 %v8764_v41  ;;  %6572 = vmatprep.subr.bf16.mxu0 %v8769_v42  ;;  %v8856_v41 = vld [vmem:[#allocation6 + $0x46c] ss:$16 sps:$4 sm:$0xff]   ;;  %v8851_v42 = vld [vmem:[#allocation6 + $0x460] ss:$16 sps:$4 sm:$0xff]  }
 0x38d   :  { %6744 = vmatprep.subr.bf16.mxu1 %v8772_v45  ;;  %v8859_v45 = vld [vmem:[#allocation6 + $0x484] ss:$16 sps:$4 sm:$0xff]  }
 0x38f   :  { %6573 = vmatpush1.bf16.msra.mxu0 %v8767_v47  ;;  %v8862_v47 = vld [vmem:[#allocation6 + $0x48c] ss:$16 sps:$4 sm:$0xff]  }
 0x390   :  { %6745 = vmatpush1.bf16.msra.mxu1 %v8770_v53  ;;  %6574 = vmatprep.subr.bf16.mxu0 %v8775_v54  ;;  %v8857_v53 = vld [vmem:[#allocation6 + $0x480] ss:$16 sps:$4 sm:$0xff]   ;;  %v8860_v54 = vld [vmem:[#allocation6 + $0x488] ss:$16 sps:$4 sm:$0xff]  }
 0x391   :  { %6746 = vmatprep.subr.bf16.mxu1 %v8778_v56  ;;  %v8865_v56 = vld [vmem:[#allocation6 + $0x4a4] ss:$16 sps:$4 sm:$0xff]  }
 0x393   :  { %6575 = vmatpush1.bf16.msra.mxu0 %v8773_v59  ;;  %v8868_v59 = vld [vmem:[#allocation6 + $0x4ac] ss:$16 sps:$4 sm:$0xff]  }
 0x394   :  { %6747 = vmatpush1.bf16.msra.mxu1 %v8776_v58  ;;  %6576 = vmatprep.subr.bf16.mxu0 %v8781_v60  ;;  %v8863_v58 = vld [vmem:[#allocation6 + $0x4a0] ss:$16 sps:$4 sm:$0xff]   ;;  %v8866_v60 = vld [vmem:[#allocation6 + $0x4a8] ss:$16 sps:$4 sm:$0xff]  }
 0x395   :  { %6748 = vmatprep.subr.bf16.mxu1 %v8784_v61  ;;  %v8871_v61 = vld [vmem:[#allocation6 + $0x4c4] ss:$16 sps:$4 sm:$0xff]  }
 0x397   :  { %6577 = vmatpush1.bf16.msra.mxu0 %v8779_v62  ;;  %v8874_v62 = vld [vmem:[#allocation6 + $0x4cc] ss:$16 sps:$4 sm:$0xff]  }
 0x398   :  { %6749 = vmatpush1.bf16.msra.mxu1 %v8782_v63  ;;  %6578 = vmatprep.subr.bf16.mxu0 %v8787_v1  ;;  %v8869_v63 = vld [vmem:[#allocation6 + $0x4c0] ss:$16 sps:$4 sm:$0xff]   ;;  %v8872_v1 = vld [vmem:[#allocation6 + $0x4c8] ss:$16 sps:$4 sm:$0xff]  }
 0x399   :  { %6750 = vmatprep.subr.bf16.mxu1 %v8790_v2  ;;  %v8877_v2 = vld [vmem:[#allocation6 + $0x4e4] ss:$16 sps:$4 sm:$0xff]  }
 0x39b   :  { %6579 = vmatpush1.bf16.msra.mxu0 %v8785_v3  ;;  %v8880_v3 = vld [vmem:[#allocation6 + $0x4ec] ss:$16 sps:$4 sm:$0xff]  }
 0x39c   :  { %6751 = vmatpush1.bf16.msra.mxu1 %v8788_v15  ;;  %6580 = vmatprep.subr.bf16.mxu0 %v8793_v4  ;;  %v8875_v15 = vld [vmem:[#allocation6 + $0x4e0] ss:$16 sps:$4 sm:$0xff]   ;;  %v8878_v4 = vld [vmem:[#allocation6 + $0x4e8] ss:$16 sps:$4 sm:$0xff]  }
 0x39d   :  { %6752 = vmatprep.subr.bf16.mxu1 %v8796_v5  ;;  %v8883_v5 = vld [vmem:[#allocation6 + $0x504] ss:$16 sps:$4 sm:$0xff]  }
 0x39f   :  { %6581 = vmatpush1.bf16.msra.mxu0 %v8791_v6  ;;  %v8886_v6 = vld [vmem:[#allocation6 + $0x50c] ss:$16 sps:$4 sm:$0xff]  }
 0x3a0   :  { %6753 = vmatpush1.bf16.msra.mxu1 %v8794_v7  ;;  %6582 = vmatprep.subr.bf16.mxu0 %v8799_v8  ;;  %v8881_v7 = vld [vmem:[#allocation6 + $0x500] ss:$16 sps:$4 sm:$0xff]   ;;  %v8884_v8 = vld [vmem:[#allocation6 + $0x508] ss:$16 sps:$4 sm:$0xff]  }
 0x3a1   :  { %6754 = vmatprep.subr.bf16.mxu1 %v8802_v9  ;;  %v8889_v9 = vld [vmem:[#allocation6 + $0x524] ss:$16 sps:$4 sm:$0xff]  }
 0x3a3   :  { %6583 = vmatpush1.bf16.msra.mxu0 %v8797_v11  ;;  %v8892_v11 = vld [vmem:[#allocation6 + $0x52c] ss:$16 sps:$4 sm:$0xff]  }
 0x3a4   :  { %6755 = vmatpush1.bf16.msra.mxu1 %v8800_v12  ;;  %6584 = vmatprep.subr.bf16.mxu0 %v8805_v13  ;;  %v8887_v12 = vld [vmem:[#allocation6 + $0x520] ss:$16 sps:$4 sm:$0xff]   ;;  %v8890_v13 = vld [vmem:[#allocation6 + $0x528] ss:$16 sps:$4 sm:$0xff]  }
 0x3a5   :  { %6756 = vmatprep.subr.bf16.mxu1 %v8808_v25  ;;  %v8895_v25 = vld [vmem:[#allocation6 + $0x544] ss:$16 sps:$4 sm:$0xff]  }
 0x3a7   :  { %6585 = vmatpush1.bf16.msra.mxu0 %v8803_v14  ;;  %v8898_v14 = vld [vmem:[#allocation6 + $0x54c] ss:$16 sps:$4 sm:$0xff]  }
 0x3a8   :  { %6757 = vmatpush1.bf16.msra.mxu1 %v8806_v16  ;;  %6586 = vmatprep.subr.bf16.mxu0 %v8811_v17  ;;  %v8893_v16 = vld [vmem:[#allocation6 + $0x540] ss:$16 sps:$4 sm:$0xff]   ;;  %v8896_v17 = vld [vmem:[#allocation6 + $0x548] ss:$16 sps:$4 sm:$0xff]  }
 0x3a9   :  { %6758 = vmatprep.subr.bf16.mxu1 %v8814_v30  ;;  %v8901_v30 = vld [vmem:[#allocation6 + $0x564] ss:$16 sps:$4 sm:$0xff]  }
 0x3ab   :  { %6587 = vmatpush1.bf16.msra.mxu0 %v8809_v18  ;;  %v8904_v18 = vld [vmem:[#allocation6 + $0x56c] ss:$16 sps:$4 sm:$0xff]  }
 0x3ac   :  { %6759 = vmatpush1.bf16.msra.mxu1 %v8812_v19  ;;  %6588 = vmatprep.subr.bf16.mxu0 %v8817_v20  ;;  %v8899_v19 = vld [vmem:[#allocation6 + $0x560] ss:$16 sps:$4 sm:$0xff]   ;;  %v8902_v20 = vld [vmem:[#allocation6 + $0x568] ss:$16 sps:$4 sm:$0xff]  }
 0x3ad   :  { %6760 = vmatprep.subr.bf16.mxu1 %v8820_v21  ;;  %v8907_v21 = vld [vmem:[#allocation6 + $0x584] ss:$16 sps:$4 sm:$0xff]  }
 0x3af   :  { %6589 = vmatpush1.bf16.msra.mxu0 %v8815_v22  ;;  %v8910_v22 = vld [vmem:[#allocation6 + $0x58c] ss:$16 sps:$4 sm:$0xff]  }
 0x3b0   :  { %6761 = vmatpush1.bf16.msra.mxu1 %v8818_v23  ;;  %6590 = vmatprep.subr.bf16.mxu0 %v8823_v26  ;;  %v8905_v23 = vld [vmem:[#allocation6 + $0x580] ss:$16 sps:$4 sm:$0xff]   ;;  %v8908_v26 = vld [vmem:[#allocation6 + $0x588] ss:$16 sps:$4 sm:$0xff]  }
 0x3b1   :  { %6762 = vmatprep.subr.bf16.mxu1 %v8826_v0  ;;  %v8913_v0 = vld [vmem:[#allocation6 + $0x5a4] ss:$16 sps:$4 sm:$0xff]  }
 0x3b3   :  { %6591 = vmatpush1.bf16.msra.mxu0 %v8821_v27  ;;  %v8916_v27 = vld [vmem:[#allocation6 + $0x5ac] ss:$16 sps:$4 sm:$0xff]  }
 0x3b4   :  { %6763 = vmatpush1.bf16.msra.mxu1 %v8824_v28  ;;  %6592 = vmatprep.subr.bf16.mxu0 %v8829_v37  ;;  %v8911_v28 = vld [vmem:[#allocation6 + $0x5a0] ss:$16 sps:$4 sm:$0xff]   ;;  %v8914_v37 = vld [vmem:[#allocation6 + $0x5a8] ss:$16 sps:$4 sm:$0xff]  }
 0x3b5   :  { %6764 = vmatprep.subr.bf16.mxu1 %v8832_v46  ;;  %v8919_v46 = vld [vmem:[#allocation6 + $0x5c4] ss:$16 sps:$4 sm:$0xff]  }
 0x3b7   :  { %6593 = vmatpush1.bf16.msra.mxu0 %v8827_v29  ;;  %v8922_v29 = vld [vmem:[#allocation6 + $0x5cc] ss:$16 sps:$4 sm:$0xff]  }
 0x3b8   :  { %6765 = vmatpush1.bf16.msra.mxu1 %v8830_v24  ;;  %6605 = vmatprep.subr.bf16.mxu0 %v8835_v31  ;;  %v8917_v24 = vld [vmem:[#allocation6 + $0x5c0] ss:$16 sps:$4 sm:$0xff]   ;;  %v8920_v31 = vld [vmem:[#allocation6 + $0x5c8] ss:$16 sps:$4 sm:$0xff]  }
 0x3b9   :  { %6777 = vmatprep.subr.bf16.mxu1 %v8838_v32  ;;  %v8925_v32 = vld [vmem:[#allocation6 + $0x5e4] ss:$16 sps:$4 sm:$0xff]  }
 0x3ba   :  { %6595 = vmatmul.mubr.bf16.vlgmr.msra.gmra.mrb[8].mxu0 %v9643_v48 }
 0x3bb   :  { %6767 = vmatmul.mubr.bf16.vlgmr.msra.gmra.mrb[8].mxu1 %v9643_v48  ;;  %6606 = vmatpush1.bf16.msra.mxu0 %v8833_v33  ;;  %v8854_v48 = vld [vmem:[#allocation6 + $0x468] ss:$16 sps:$4 sm:$0xff]   ;;  %v8928_v33 = vld [vmem:[#allocation6 + $0x5ec] ss:$16 sps:$4 sm:$0xff]  }
 0x3bc   :  { %6778 = vmatpush1.bf16.msra.mxu1 %v8836_v34  ;;  %6607 = vmatprep.subr.bf16.mxu0 %v8841_v51  ;;  %v8923_v34 = vld [vmem:[#allocation6 + $0x5e0] ss:$16 sps:$4 sm:$0xff]   ;;  %v8926_v51 = vld [vmem:[#allocation6 + $0x5e8] ss:$16 sps:$4 sm:$0xff]  }
 0x3bd   :  { %6779 = vmatprep.subr.bf16.mxu1 %v8844_v10  ;;  %v8931_v10 = vld [vmem:[#allocation6 + $0x604] ss:$16 sps:$4 sm:$0xff]  }
 0x3bf   :  { %6608 = vmatpush1.bf16.msra.mxu0 %v8839_v35  ;;  %v8934_v35 = vld [vmem:[#allocation6 + $0x60c] ss:$16 sps:$4 sm:$0xff]  }
 0x3c0   :  { %6780 = vmatpush1.bf16.msra.mxu1 %v8842_v44  ;;  %6609 = vmatprep.subr.bf16.mxu0 %v8847_v38  ;;  %v855_v44 = vsub.s32 4, %v9627_v36  ;;  %v863_v38 = vsub.s32 6, %v9627_v36 }
 0x3c1   :  { %6781 = vmatprep.subr.bf16.mxu1 %v8850_v39  ;;  %v859_v39 = vsub.s32 5, %v9627_v36 }
 0x3c3   :  { %6610 = vmatpush1.bf16.msra.mxu0 %v8845_v55  ;;  %v867_v55 = vsub.s32 7, %v9627_v36 }
 0x3c4   :  { %6782 = vmatpush1.bf16.msra.mxu1 %v8848_v40  ;;  %6611 = vmatprep.subr.bf16.mxu0 %v8853_v57  ;;  %v9073_v40 = vld [vmem:[#allocation4] sm:$0xff] }
 0x3c5   :  { %6783 = vmatprep.subr.bf16.mxu1 %v8856_v41  ;;  %v856_v57 = vrot.slane %v9073_v40, %v855_v44  ;;  %v864_v41 = vrot.slane %v9073_v40, %v863_v38  ;;  %v8967_v44 = vld [vmem:[#allocation6 + $0x6c4] ss:$16 sps:$4 sm:$0xff]   ;;  %v8970_v38 = vld [vmem:[#allocation6 + $0x6cc] ss:$16 sps:$4 sm:$0xff]  }
 0x3c7   :  { %6612 = vmatpush1.bf16.msra.mxu0 %v8851_v42  ;;  %v860_v42 = vrot.slane %v9073_v40, %v859_v39  ;;  %v8965_v39 = vld [vmem:[#allocation6 + $0x6c0] ss:$16 sps:$4 sm:$0xff]  }
 0x3c8   :  { %6784 = vmatpush1.bf16.msra.mxu1 %v8854_v48  ;;  %6613 = vmatprep.subr.bf16.mxu0 %v8859_v45  ;;  %v868_v48 = vrot.slane %v9073_v40, %v867_v55  ;;  %v8968_v55 = vld [vmem:[#allocation6 + $0x6c8] ss:$16 sps:$4 sm:$0xff]   ;;  %v8973_v40 = vld [vmem:[#allocation6 + $0x6e4] ss:$16 sps:$4 sm:$0xff]  }
 0x3c9   :  { %6785 = vmatprep.subr.bf16.mxu1 %v8862_v47 }
 0x3cb   :  { %6614 = vmatpush1.bf16.msra.mxu0 %v8857_v53 }
 0x3cc   :  { %6786 = vmatpush1.bf16.msra.mxu1 %v8860_v54  ;;  %6615 = vmatprep.subr.bf16.mxu0 %v8865_v56 }
 0x3cd   :  { %6787 = vmatprep.subr.bf16.mxu1 %v8868_v59 }
 0x3cf   :  { %6616 = vmatpush1.bf16.msra.mxu0 %v8863_v58 }
 0x3d0   :  { %6788 = vmatpush1.bf16.msra.mxu1 %v8866_v60  ;;  %6617 = vmatprep.subr.bf16.mxu0 %v8871_v61 }
 0x3d1   :  { %6789 = vmatprep.subr.bf16.mxu1 %v8874_v62 }
 0x3d3   :  { %6618 = vmatpush1.bf16.msra.mxu0 %v8869_v63 }
 0x3d4   :  { %6790 = vmatpush1.bf16.msra.mxu1 %v8872_v1  ;;  %6619 = vmatprep.subr.bf16.mxu0 %v8877_v2 }
 0x3d5   :  { %6791 = vmatprep.subr.bf16.mxu1 %v8880_v3 }
 0x3d7   :  { %6620 = vmatpush1.bf16.msra.mxu0 %v8875_v15 }
 0x3d8   :  { %6792 = vmatpush1.bf16.msra.mxu1 %v8878_v4  ;;  %6621 = vmatprep.subr.bf16.mxu0 %v8883_v5 }
 0x3d9   :  { %6793 = vmatprep.subr.bf16.mxu1 %v8886_v6 }
 0x3db   :  { %6622 = vmatpush1.bf16.msra.mxu0 %v8881_v7 }
 0x3dc   :  { %6794 = vmatpush1.bf16.msra.mxu1 %v8884_v8  ;;  %6623 = vmatprep.subr.bf16.mxu0 %v8889_v9 }
 0x3dd   :  { %6795 = vmatprep.subr.bf16.mxu1 %v8892_v11 }
 0x3df   :  { %6624 = vmatpush1.bf16.msra.mxu0 %v8887_v12 }
 0x3e0   :  { %6796 = vmatpush1.bf16.msra.mxu1 %v8890_v13  ;;  %6625 = vmatprep.subr.bf16.mxu0 %v8895_v25 }
 0x3e1   :  { %6797 = vmatprep.subr.bf16.mxu1 %v8898_v14 }
 0x3e3   :  { %6626 = vmatpush1.bf16.msra.mxu0 %v8893_v16 }
 0x3e4   :  { %6798 = vmatpush1.bf16.msra.mxu1 %v8896_v17  ;;  %6627 = vmatprep.subr.bf16.mxu0 %v8901_v30  ;;  %v8929_v17 = vld [vmem:[#allocation6 + $0x600] ss:$16 sps:$4 sm:$0xff]   ;;  %v8932_v30 = vld [vmem:[#allocation6 + $0x608] ss:$16 sps:$4 sm:$0xff]  }
 0x3e5   :  { %6799 = vmatprep.subr.bf16.mxu1 %v8904_v18 }
 0x3e7   :  { %6628 = vmatpush1.bf16.msra.mxu0 %v8899_v19  ;;  %v8937_v19 = vld [vmem:[#allocation6 + $0x624] ss:$16 sps:$4 sm:$0xff]  }
 0x3e8   :  { %6800 = vmatpush1.bf16.msra.mxu1 %v8902_v20  ;;  %6629 = vmatprep.subr.bf16.mxu0 %v8907_v21  ;;  %v8940_v20 = vld [vmem:[#allocation6 + $0x62c] ss:$16 sps:$4 sm:$0xff]   ;;  %v8935_v21 = vld [vmem:[#allocation6 + $0x620] ss:$16 sps:$4 sm:$0xff]  }
 0x3e9   :  { %6801 = vmatprep.subr.bf16.mxu1 %v8910_v22  ;;  %v8938_v22 = vld [vmem:[#allocation6 + $0x628] ss:$16 sps:$4 sm:$0xff]  }
 0x3eb   :  { %6630 = vmatpush1.bf16.msra.mxu0 %v8905_v23  ;;  %v8943_v23 = vld [vmem:[#allocation6 + $0x644] ss:$16 sps:$4 sm:$0xff]  }
 0x3ec   :  { %6802 = vmatpush1.bf16.msra.mxu1 %v8908_v26  ;;  %6631 = vmatprep.subr.bf16.mxu0 %v8913_v0  ;;  %v8946_v26 = vld [vmem:[#allocation6 + $0x64c] ss:$16 sps:$4 sm:$0xff]   ;;  %v8941_v0 = vld [vmem:[#allocation6 + $0x640] ss:$16 sps:$4 sm:$0xff]  }
 0x3ed   :  { %6803 = vmatprep.subr.bf16.mxu1 %v8916_v27  ;;  %v8944_v27 = vld [vmem:[#allocation6 + $0x648] ss:$16 sps:$4 sm:$0xff]  }
 0x3ef   :  { %6632 = vmatpush1.bf16.msra.mxu0 %v8911_v28  ;;  %v8949_v28 = vld [vmem:[#allocation6 + $0x664] ss:$16 sps:$4 sm:$0xff]  }
 0x3f0   :  { %6804 = vmatpush1.bf16.msra.mxu1 %v8914_v37  ;;  %6633 = vmatprep.subr.bf16.mxu0 %v8919_v46  ;;  %v8952_v37 = vld [vmem:[#allocation6 + $0x66c] ss:$16 sps:$4 sm:$0xff]   ;;  %v8947_v46 = vld [vmem:[#allocation6 + $0x660] ss:$16 sps:$4 sm:$0xff]  }
 0x3f1   :  { %6805 = vmatprep.subr.bf16.mxu1 %v8922_v29  ;;  %v8950_v29 = vld [vmem:[#allocation6 + $0x668] ss:$16 sps:$4 sm:$0xff]  }
 0x3f3   :  { %6634 = vmatpush1.bf16.msra.mxu0 %v8917_v24  ;;  %v8955_v24 = vld [vmem:[#allocation6 + $0x684] ss:$16 sps:$4 sm:$0xff]  }
 0x3f4   :  { %6806 = vmatpush1.bf16.msra.mxu1 %v8920_v31  ;;  %6635 = vmatprep.subr.bf16.mxu0 %v8925_v32  ;;  %v8958_v31 = vld [vmem:[#allocation6 + $0x68c] ss:$16 sps:$4 sm:$0xff]   ;;  %v8953_v32 = vld [vmem:[#allocation6 + $0x680] ss:$16 sps:$4 sm:$0xff]  }
 0x3f5   :  { %6807 = vmatprep.subr.bf16.mxu1 %v8928_v33  ;;  %v8956_v33 = vld [vmem:[#allocation6 + $0x688] ss:$16 sps:$4 sm:$0xff]  }
 0x3f7   :  { %6636 = vmatpush1.bf16.msra.mxu0 %v8923_v34  ;;  %v8961_v34 = vld [vmem:[#allocation6 + $0x6a4] ss:$16 sps:$4 sm:$0xff]  }
 0x3f8   :  { %6808 = vmatpush1.bf16.msra.mxu1 %v8926_v51  ;;  %6648 = vmatprep.subr.bf16.mxu0 %v8931_v10  ;;  %v8964_v51 = vld [vmem:[#allocation6 + $0x6ac] ss:$16 sps:$4 sm:$0xff]   ;;  %v8959_v10 = vld [vmem:[#allocation6 + $0x6a0] ss:$16 sps:$4 sm:$0xff]  }
 0x3f9   :  { %6820 = vmatprep.subr.bf16.mxu1 %v8934_v35  ;;  %v8962_v35 = vld [vmem:[#allocation6 + $0x6a8] ss:$16 sps:$4 sm:$0xff]  }
 0x40d   :  { %v4713_v45 = vpop.f32.mrb[4].mxu0  ;;  %v4928_v53 = vpop.f32.mrb[4].mxu1 }
 0x40e   :  { %v8519_v47 = vadd.f32 %v4713_v45, %v856_v57  ;;  %v4715_v54 = vpop.f32.mrb[5].mxu0  ;;  %v8523_v56 = vadd.f32 %v4928_v53, %v864_v41  ;;  %v4930_v58 = vpop.f32.mrb[5].mxu1  ;;  %v8982_v45 = vld [vmem:[#allocation6 + $0x70c] ss:$16 sps:$4 sm:$0xff]   ;;  %v8980_v53 = vld [vmem:[#allocation6 + $0x708] ss:$16 sps:$4 sm:$0xff]  }
 0x40f   :  { %v8520_v59 = vadd.f32 %v4715_v54, %v860_v42  ;;  %v4717_v60 = vpop.f32.mrb[6].mxu0  ;;  %v8524_v61 = vadd.f32 %v4930_v58, %v868_v48  ;;  %v4932_v63 = vpop.f32.mrb[6].mxu1  ;;  %v8985_v54 = vld [vmem:[#allocation6 + $0x724] ss:$16 sps:$4 sm:$0xff]   ;;  %v8986_v58 = vld [vmem:[#allocation6 + $0x728] ss:$16 sps:$4 sm:$0xff]  }
 0x410   :  { %v8521_v62 = vadd.f32 %v4717_v60, %v856_v57  ;;  %v4719_v1 = vpop.f32.mrb[7].mxu0  ;;  %v8525_v2 = vadd.f32 %v4932_v63, %v864_v41  ;;  %v4934_v15 = vpop.f32.mrb[7].mxu1  ;;  %v4941_v4 = vmax.f32 %v8519_v47, 0.0  ;;  %v4943_v7 = vmax.f32 %v8523_v56, 0.0  ;;  %v8976_v57 = vld [vmem:[#allocation6 + $0x6ec] ss:$16 sps:$4 sm:$0xff]  }
 0x411   :  { %v8522_v3 = vadd.f32 %v4719_v1, %v860_v42  ;;  %v8526_v6 = vadd.f32 %v4934_v15, %v868_v48  ;;  %v4942_v8 = vmax.f32 %v8520_v59, 0.0  ;;  %v4944_v12 = vmax.f32 %v8524_v61, 0.0  ;;  %v8971_v41 = vld [vmem:[#allocation6 + $0x6e0] ss:$16 sps:$4 sm:$0xff]   ;;  %v8974_v42 = vld [vmem:[#allocation6 + $0x6e8] ss:$16 sps:$4 sm:$0xff]  }
 0x412   :  { %v4949_v5 = vmax.f32 %v8521_v62, 0.0  ;;  %v4951_v9 = vmax.f32 %v8525_v2, 0.0  ;;  %v8979_v48 = vld [vmem:[#allocation6 + $0x704] ss:$16 sps:$4 sm:$0xff]   ;;  %v8977_v47 = vld [vmem:[#allocation6 + $0x700] ss:$16 sps:$4 sm:$0xff]  }
 0x413   :  { %v4950_v11 = vmax.f32 %v8522_v3, 0.0  ;;  %v4952_v25 = vmax.f32 %v8526_v6, 0.0  ;;  %v8988_v56 = vld [vmem:[#allocation6 + $0x72c] ss:$16 sps:$4 sm:$0xff]   ;;  %v8983_v59 = vld [vmem:[#allocation6 + $0x720] ss:$16 sps:$4 sm:$0xff]  }
 0x414   :  { %v4957_v13 = vpack.c.bf16 %v4949_v5, %v4941_v4  ;;  %v9667_v14 = vpack.c.bf16 %v4951_v9, %v4943_v7  ;;  %v8991_v60 = vld [vmem:[#allocation6 + $0x744] ss:$16 sps:$4 sm:$0xff]   ;;  %v8994_v61 = vld [vmem:[#allocation6 + $0x74c] ss:$16 sps:$4 sm:$0xff]   ;;  %v8989_v62 = vld [vmem:[#allocation6 + $0x740] ss:$16 sps:$4 sm:$0xff]  }
 0x415   :  { %v4958_v16 = vpack.c.bf16 %v4950_v11, %v4942_v8  ;;  %v4960_v18 = vpack.c.bf16 %v4952_v25, %v4944_v12  ;;  %v8992_v63 = vld [vmem:[#allocation6 + $0x748] ss:$16 sps:$4 sm:$0xff]   ;;  %v8997_v1 = vld [vmem:[#allocation6 + $0x764] ss:$16 sps:$4 sm:$0xff]   ;;  %v9000_v2 = vld [vmem:[#allocation6 + $0x76c] ss:$16 sps:$4 sm:$0xff]  }
 0x416   :  { %v8995_v3 = vld [vmem:[#allocation6 + $0x760] ss:$16 sps:$4 sm:$0xff]   ;;  %v8998_v15 = vld [vmem:[#allocation6 + $0x768] ss:$16 sps:$4 sm:$0xff]   ;;  %v9003_v4 = vld [vmem:[#allocation6 + $0x784] ss:$16 sps:$4 sm:$0xff]  }
 0x417   :  { %6637 = vmatprep.mubr.bf16.mxu0 %v4958_v16  ;;  %6809 = vmatprep.mubr.bf16.mxu1 %v4958_v16  ;;  %v9006_v5 = vld [vmem:[#allocation6 + $0x78c] ss:$16 sps:$4 sm:$0xff]   ;;  %v9001_v6 = vld [vmem:[#allocation6 + $0x780] ss:$16 sps:$4 sm:$0xff]   ;;  %v9004_v7 = vld [vmem:[#allocation6 + $0x788] ss:$16 sps:$4 sm:$0xff]  }
 0x418   :  { %6638 = vmatmul.mubr.bf16.vlgmr.msra.gmra.mrb[8].mxu0 %v4957_v13  ;;  %6810 = vmatmul.mubr.bf16.vlgmr.msra.gmra.mrb[8].mxu1 %v4957_v13  ;;  %v9009_v8 = vld [vmem:[#allocation6 + $0x7a4] ss:$16 sps:$4 sm:$0xff]   ;;  %v9012_v9 = vld [vmem:[#allocation6 + $0x7ac] ss:$16 sps:$4 sm:$0xff]   ;;  %v9007_v11 = vld [vmem:[#allocation6 + $0x7a0] ss:$16 sps:$4 sm:$0xff]  }
 0x419   :  { %6649 = vmatpush1.bf16.msra.mxu0 %v8929_v17  ;;  %6821 = vmatpush1.bf16.msra.mxu1 %v8932_v30  ;;  %v9010_v12 = vld [vmem:[#allocation6 + $0x7a8] ss:$16 sps:$4 sm:$0xff]   ;;  %v9015_v13 = vld [vmem:[#allocation6 + $0x7c4] ss:$16 sps:$4 sm:$0xff]   ;;  %v9018_v25 = vld [vmem:[#allocation6 + $0x7cc] ss:$16 sps:$4 sm:$0xff]  }
 0x41a   :  { %6680 = vmatprep.mubr.bf16.mxu0 %v4960_v18  ;;  %6852 = vmatprep.mubr.bf16.mxu1 %v4960_v18  ;;  %v9013_v16 = vld [vmem:[#allocation6 + $0x7c0] ss:$16 sps:$4 sm:$0xff]   ;;  %v9016_v17 = vld [vmem:[#allocation6 + $0x7c8] ss:$16 sps:$4 sm:$0xff]   ;;  %v9021_v30 = vld [vmem:[#allocation6 + $0x7e4] ss:$16 sps:$4 sm:$0xff]  }
 0x41b   :  { %6650 = vmatprep.subr.bf16.mxu0 %v8937_v19  ;;  %6822 = vmatprep.subr.bf16.mxu1 %v8940_v20  ;;  %v9024_v18 = vld [vmem:[#allocation6 + $0x7ec] ss:$16 sps:$4 sm:$0xff]   ;;  %v9019_v19 = vld [vmem:[#allocation6 + $0x7e0] ss:$16 sps:$4 sm:$0xff]   ;;  %v9022_v20 = vld [vmem:[#allocation6 + $0x7e8] ss:$16 sps:$4 sm:$0xff]  }
 0x41d   :  { %6651 = vmatpush1.bf16.msra.mxu0 %v8935_v21  ;;  %6823 = vmatpush1.bf16.msra.mxu1 %v8938_v22  ;;  %v9025_v21 = vld [vmem:[#allocation9 + $0x40] sm:$0xff]  }
 0x41e   :  { %6652 = vmatprep.subr.bf16.mxu0 %v8943_v23  ;;  %6824 = vmatprep.subr.bf16.mxu1 %v8946_v26  ;;  %v9026_v22 = vld [vmem:[#allocation9 + $0xc0] sm:$0xff]  }
 0x41f   :  { %v9027_v23 = vld [vmem:[#allocation9] sm:$0xff]  }
 0x420   :  { %v9028_v26 = vld [vmem:[#allocation9 + $0x80] sm:$0xff]  }
 0x421   :  { %6653 = vmatpush1.bf16.msra.mxu0 %v8941_v0  ;;  %6825 = vmatpush1.bf16.msra.mxu1 %v8944_v27  ;;  %v9029_v0 = vld [vmem:[#allocation9 + $0x48] sm:$0xff]  }
 0x422   :  { %6654 = vmatprep.subr.bf16.mxu0 %v8949_v28  ;;  %6826 = vmatprep.subr.bf16.mxu1 %v8952_v37  ;;  %v9030_v27 = vld [vmem:[#allocation9 + $0xc8] sm:$0xff]  }
 0x423   :  { %v9031_v28 = vld [vmem:[#allocation9 + $0x8] sm:$0xff]  }
 0x424   :  { %v9032_v37 = vld [vmem:[#allocation9 + $0x88] sm:$0xff]  }
 0x425   :  { %6655 = vmatpush1.bf16.msra.mxu0 %v8947_v46  ;;  %6827 = vmatpush1.bf16.msra.mxu1 %v8950_v29  ;;  %v9033_v46 = vld [vmem:[#allocation9 + $0x50] sm:$0xff]  }
 0x426   :  { %6656 = vmatprep.subr.bf16.mxu0 %v8955_v24  ;;  %6828 = vmatprep.subr.bf16.mxu1 %v8958_v31  ;;  %v9034_v29 = vld [vmem:[#allocation9 + $0xd0] sm:$0xff]  }
 0x427   :  { %v9035_v24 = vld [vmem:[#allocation9 + $0x10] sm:$0xff]  }
 0x428   :  { %v9036_v31 = vld [vmem:[#allocation9 + $0x90] sm:$0xff]  }
 0x429   :  { %6657 = vmatpush1.bf16.msra.mxu0 %v8953_v32  ;;  %6829 = vmatpush1.bf16.msra.mxu1 %v8956_v33  ;;  %v9037_v32 = vld [vmem:[#allocation9 + $0x58] sm:$0xff]  }
 0x42a   :  { %6658 = vmatprep.subr.bf16.mxu0 %v8961_v34  ;;  %6830 = vmatprep.subr.bf16.mxu1 %v8964_v51  ;;  %v9038_v33 = vld [vmem:[#allocation9 + $0xd8] sm:$0xff]   ;;  %v9041_v51 = vld [vmem:[#allocation9 + $0x60] sm:$0xff]  }
 0x42b   :  { %v9039_v34 = vld [vmem:[#allocation9 + $0x18] sm:$0xff]  }
 0x42d   :  { %6659 = vmatpush1.bf16.msra.mxu0 %v8959_v10  ;;  %6831 = vmatpush1.bf16.msra.mxu1 %v8962_v35  ;;  %v9042_v10 = vld [vmem:[#allocation9 + $0xe0] sm:$0xff]  }
 0x42e   :  { %6660 = vmatprep.subr.bf16.mxu0 %v8967_v44  ;;  %6832 = vmatprep.subr.bf16.mxu1 %v8970_v38  ;;  %v9043_v35 = vld [vmem:[#allocation9 + $0x20] sm:$0xff]   ;;  %v9045_v38 = vld [vmem:[#allocation9 + $0x68] sm:$0xff]  }
 0x42f   :  { %v9044_v44 = vld [vmem:[#allocation9 + $0xa0] sm:$0xff]  }
 0x431   :  { %6661 = vmatpush1.bf16.msra.mxu0 %v8965_v39  ;;  %6833 = vmatpush1.bf16.msra.mxu1 %v8968_v55  ;;  %v9046_v39 = vld [vmem:[#allocation9 + $0xe8] sm:$0xff]  }
 0x432   :  { %6662 = vmatprep.subr.bf16.mxu0 %v8973_v40  ;;  %6834 = vmatprep.subr.bf16.mxu1 %v8976_v57  ;;  %v9047_v55 = vld [vmem:[#allocation9 + $0x28] sm:$0xff]   ;;  %v9049_v57 = vld [vmem:[#allocation9 + $0x70] sm:$0xff]  }
 0x433   :  { %v9048_v40 = vld [vmem:[#allocation9 + $0xa8] sm:$0xff]  }
 0x435   :  { %6663 = vmatpush1.bf16.msra.mxu0 %v8971_v41  ;;  %6835 = vmatpush1.bf16.msra.mxu1 %v8974_v42  ;;  %v9050_v41 = vld [vmem:[#allocation9 + $0xf0] sm:$0xff]  }
 0x436   :  { %6664 = vmatprep.subr.bf16.mxu0 %v8979_v48  ;;  %6836 = vmatprep.subr.bf16.mxu1 %v8982_v45  ;;  %v9051_v42 = vld [vmem:[#allocation9 + $0x30] sm:$0xff]   ;;  %v9053_v45 = vld [vmem:[#allocation9 + $0x78] sm:$0xff]  }
 0x437   :  { %v9052_v48 = vld [vmem:[#allocation9 + $0xb0] sm:$0xff]  }
 0x439   :  { %6665 = vmatpush1.bf16.msra.mxu0 %v8977_v47  ;;  %6837 = vmatpush1.bf16.msra.mxu1 %v8980_v53  ;;  %v9054_v47 = vld [vmem:[#allocation9 + $0xf8] sm:$0xff]  }
 0x43a   :  { %6666 = vmatprep.subr.bf16.mxu0 %v8985_v54  ;;  %6838 = vmatprep.subr.bf16.mxu1 %v8988_v56  ;;  %v9055_v53 = vld [vmem:[#allocation9 + $0x38] sm:$0xff]   ;;  %v9322_v56 = vmov 0.0  }
 0x43b   :  { %v9056_v54 = vld [vmem:[#allocation9 + $0xb8] sm:$0xff]  }
 0x43d   :  { %6667 = vmatpush1.bf16.msra.mxu0 %v8983_v59  ;;  %6839 = vmatpush1.bf16.msra.mxu1 %v8986_v58  ;;  %v5217_v59 = vld [vmem:[#allocation7] sm:$0xf] }
 0x43e   :  { %6668 = vmatprep.subr.bf16.mxu0 %v8991_v60  ;;  %6840 = vmatprep.subr.bf16.mxu1 %v8994_v61  ;;  %v5222_v58 = vrot.slane %v5217_v59, %v839_v43  ;;  %v5230_v60 = vrot.slane %v5217_v59, %v847_v49  ;;  %v5226_v61 = vrot.slane %v5217_v59, %v843_v50 }
 0x441   :  { %6669 = vmatpush1.bf16.msra.mxu0 %v8989_v62  ;;  %6841 = vmatpush1.bf16.msra.mxu1 %v8992_v63  ;;  %v5234_v62 = vrot.slane %v5217_v59, %v851_v52 }
 0x442   :  { %6670 = vmatprep.subr.bf16.mxu0 %v8997_v1  ;;  %6842 = vmatprep.subr.bf16.mxu1 %v9000_v2 }
 0x445   :  { %6671 = vmatpush1.bf16.msra.mxu0 %v8995_v3  ;;  %6843 = vmatpush1.bf16.msra.mxu1 %v8998_v15 }
 0x446   :  { %6672 = vmatprep.subr.bf16.mxu0 %v9003_v4  ;;  %6844 = vmatprep.subr.bf16.mxu1 %v9006_v5 }
 0x449   :  { %6673 = vmatpush1.bf16.msra.mxu0 %v9001_v6  ;;  %6845 = vmatpush1.bf16.msra.mxu1 %v9004_v7 }
 0x44a   :  { %6674 = vmatprep.subr.bf16.mxu0 %v9009_v8  ;;  %6846 = vmatprep.subr.bf16.mxu1 %v9012_v9 }
 0x44d   :  { %6675 = vmatpush1.bf16.msra.mxu0 %v9007_v11  ;;  %6847 = vmatpush1.bf16.msra.mxu1 %v9010_v12 }
 0x44e   :  { %6676 = vmatprep.subr.bf16.mxu0 %v9015_v13  ;;  %6848 = vmatprep.subr.bf16.mxu1 %v9018_v25 }
 0x451   :  { %6677 = vmatpush1.bf16.msra.mxu0 %v9013_v16  ;;  %6849 = vmatpush1.bf16.msra.mxu1 %v9016_v17 }
 0x452   :  { %6678 = vmatprep.subr.bf16.mxu0 %v9021_v30  ;;  %6850 = vmatprep.subr.bf16.mxu1 %v9024_v18 }
 0x455   :  { %6679 = vmatpush1.bf16.msra.mxu0 %v9019_v19  ;;  %6851 = vmatpush1.bf16.msra.mxu1 %v9022_v20 }
 0x456   :  { %8409 = vmatprep.subr.bf16.mxu0 %v9025_v21  ;;  %8431 = vmatprep.subr.bf16.mxu1 %v9026_v22 }
 0x458   :  { %6681 = vmatmul.mubr.bf16.vlgmr.msra.gmra.mrb[8].mxu0 %v9667_v14  ;;  %6853 = vmatmul.mubr.bf16.vlgmr.msra.gmra.mrb[8].mxu1 %v9667_v14  ;;  %v9040_v14 = vld [vmem:[#allocation9 + $0x98] sm:$0xff]  }
 0x459   :  { %8410 = vmatpush3.bf16.msra.mxu0 %v9027_v23  ;;  %8432 = vmatpush3.bf16.msra.mxu1 %v9028_v26  ;;  %v9057_v23 = vld [vmem:[#allocation12] sm:$0xff]   ;;  %v9058_v26 = vld [vmem:[#allocation12 + $0x8] sm:$0xff]  }
 0x45a   :  { %8411 = vmatprep.subr.bf16.mxu0 %v9029_v0  ;;  %8433 = vmatprep.subr.bf16.mxu1 %v9030_v27  ;;  %v9059_v0 = vld [vmem:[#allocation12 + $0x10] sm:$0xff]   ;;  %v9060_v27 = vld [vmem:[#allocation12 + $0x18] sm:$0xff]  }
 0x45d   :  { %8412 = vmatpush3.bf16.msra.mxu0 %v9031_v28  ;;  %8434 = vmatpush3.bf16.msra.mxu1 %v9032_v37  ;;  %v9061_v28 = vld [vmem:[#allocation12 + $0x20] sm:$0xff]   ;;  %v9062_v37 = vld [vmem:[#allocation12 + $0x28] sm:$0xff]  }
 0x45e   :  { %8413 = vmatprep.subr.bf16.mxu0 %v9033_v46  ;;  %8435 = vmatprep.subr.bf16.mxu1 %v9034_v29  ;;  %v9063_v46 = vld [vmem:[#allocation12 + $0x30] sm:$0xff]   ;;  %v9064_v29 = vld [vmem:[#allocation12 + $0x38] sm:$0xff]  }
 0x461   :  { %8414 = vmatpush3.bf16.msra.mxu0 %v9035_v24  ;;  %8436 = vmatpush3.bf16.msra.mxu1 %v9036_v31  ;;  %v9065_v24 = vld [vmem:[#allocation15] sm:$0xff]   ;;  %v9066_v31 = vld [vmem:[#allocation15 + $0x8] sm:$0xff]  }
 0x462   :  { %8415 = vmatprep.subr.bf16.mxu0 %v9037_v32  ;;  %8437 = vmatprep.subr.bf16.mxu1 %v9038_v33  ;;  %v9067_v32 = vld [vmem:[#allocation15 + $0x10] sm:$0xff]   ;;  %v9068_v33 = vld [vmem:[#allocation15 + $0x18] sm:$0xff]  }
 0x465   :  { %8416 = vmatpush3.bf16.msra.mxu0 %v9039_v34  ;;  %8438 = vmatpush3.bf16.msra.mxu1 %v9040_v14  ;;  %v9069_v34 = vld [vmem:[#allocation15 + $0x20] sm:$0xff]   ;;  %v9070_v14 = vld [vmem:[#allocation15 + $0x28] sm:$0xff]  }
 0x466   :  { %8417 = vmatprep.subr.bf16.mxu0 %v9041_v51  ;;  %8439 = vmatprep.subr.bf16.mxu1 %v9042_v10 }
 0x469   :  { %8418 = vmatpush3.bf16.msra.mxu0 %v9043_v35  ;;  %8440 = vmatpush3.bf16.msra.mxu1 %v9044_v44  ;;  %v8358_v35 = vld [vmem:[#allocation10] ss:$0 sm:$0xff] }
 0x46a   :  { %8419 = vmatprep.subr.bf16.mxu0 %v9045_v38  ;;  %8441 = vmatprep.subr.bf16.mxu1 %v9046_v39 }
 0x46d   :  { %8420 = vmatpush3.bf16.msra.mxu0 %v9047_v55  ;;  %8442 = vmatpush3.bf16.msra.mxu1 %v9048_v40 }
 0x46e   :  { %8421 = vmatprep.subr.bf16.mxu0 %v9049_v57  ;;  %8443 = vmatprep.subr.bf16.mxu1 %v9050_v41 }
 0x471   :  { %8422 = vmatpush3.bf16.msra.mxu0 %v9051_v42  ;;  %8444 = vmatpush3.bf16.msra.mxu1 %v9052_v48 }
 0x472   :  { %8423 = vmatprep.subr.bf16.mxu0 %v9053_v45  ;;  %8445 = vmatprep.subr.bf16.mxu1 %v9054_v47 }
 0x475   :  { %8424 = vmatpush3.bf16.msra.mxu0 %v9055_v53  ;;  %8446 = vmatpush3.bf16.msra.mxu1 %v9056_v54 }
 0x476   :  { %8471 = vmatprep.subr.bf16.mxu0 %v9322_v56  ;;  %8491 = vmatprep.subr.bf16.mxu1 %v9322_v56 }
 0x52b   :  { %v6682_v63 = vpop.f32.mrb[8].mxu0  ;;  %v6854_v1 = vpop.f32.mrb[8].mxu1 }
 0x52c   :  { %v8527_v2 = vadd.f32 %v6682_v63, %v5222_v58  ;;  %v8531_v3 = vadd.f32 %v6854_v1, %v5230_v60  ;;  %v6684_v15 = vpop.f32.mrb[9].mxu0  ;;  %v6856_v4 = vpop.f32.mrb[9].mxu1  ;;  %v9072_v63 = vld [vmem:[#allocation15 + $0x38] sm:$0xff]  }
 0x52d   :  { %v8528_v5 = vadd.f32 %v6684_v15, %v5226_v61  ;;  %v8532_v6 = vadd.f32 %v6856_v4, %v5234_v62  ;;  %v6686_v7 = vpop.f32.mrb[10].mxu0  ;;  %v6858_v8 = vpop.f32.mrb[10].mxu1  ;;  %v8391_v1 = vld [vmem:[#allocation13] ss:$0 sm:$0xff] }
 0x52e   :  { %v8529_v43 = vadd.f32 %v6686_v7, %v5222_v58  ;;  %v8533_v9 = vadd.f32 %v6858_v8, %v5230_v60  ;;  %v6688_v11 = vpop.f32.mrb[11].mxu0  ;;  %v6860_v49 = vpop.f32.mrb[11].mxu1  ;;  %v6863_v50 = vmax.f32 %v8527_v2, 0.0  ;;  %v6865_v25 = vmax.f32 %v8531_v3, 0.0 }
 0x52f   :  { %v8530_v12 = vadd.f32 %v6688_v11, %v5226_v61  ;;  %v8534_v13 = vadd.f32 %v6860_v49, %v5234_v62  ;;  %v6864_v16 = vmax.f32 %v8528_v5, 0.0  ;;  %v6866_v17 = vmax.f32 %v8532_v6, 0.0  ;;  %v9071_v62 = vld [vmem:[#allocation15 + $0x30] sm:$0xff]  }
 0x530   :  { %v6867_v36 = vmax.f32 %v8529_v43, 0.0  ;;  %v6869_v52 = vmax.f32 %v8533_v9, 0.0  ;;  %v8400_v9 = vld [vmem:[#allocation16] ss:$0 sm:$0xff] }
 0x531   :  { %v6868_v30 = vmax.f32 %v8530_v12, 0.0  ;;  %v6870_v18 = vmax.f32 %v8534_v13, 0.0 }
 0x532   :  { %v6871_v19 = vpack.c.bf16 %v6867_v36, %v6863_v50  ;;  %v6873_v20 = vpack.c.bf16 %v6869_v52, %v6865_v25 }
 0x533   :  { %v6872_v21 = vpack.c.bf16 %v6868_v30, %v6864_v16  ;;  %v6874_v22 = vpack.c.bf16 %v6870_v18, %v6866_v17 }
 0x535   :  { %7170 = vmatprep.mubr.bf16.mxu0 %v6872_v21  ;;  %7211 = vmatprep.mubr.bf16.mxu1 %v6874_v22 }
 0x536   :  { %7171 = vmatmul.mubr.bf16.vlgmr.msra.gmra.mrb[12].mxu0 %v6871_v19  ;;  %7212 = vmatmul.mubr.bf16.vlgmr.msra.gmra.mrb[12].mxu1 %v6873_v20 }
 0x537   :  { %8472 = vmatpush3.bf16.msra.mxu0 %v9057_v23  ;;  %8487 = vmatprep.mubr.msk.bf16.mxu0 %vm9323_vm0, %v9322_v56 }
 0x538   :  { %8473 = vmatprep.subr.bf16.mxu0 %v9322_v56  ;;  %8507 = vmatprep.mubr.msk.bf16.mxu1 %vm9323_vm0, %v9322_v56 }
 0x539   :  { %8492 = vmatpush3.bf16.msra.mxu1 %v9065_v24 }
 0x53a   :  { %8493 = vmatprep.subr.bf16.mxu1 %v9322_v56 }
 0x53b   :  { %8474 = vmatpush3.bf16.msra.mxu0 %v9058_v26 }
 0x53c   :  { %8475 = vmatprep.subr.bf16.mxu0 %v9322_v56 }
 0x53d   :  { %8494 = vmatpush3.bf16.msra.mxu1 %v9066_v31 }
 0x53e   :  { %8495 = vmatprep.subr.bf16.mxu1 %v9322_v56 }
 0x53f   :  { %8476 = vmatpush3.bf16.msra.mxu0 %v9059_v0 }
 0x540   :  { %8477 = vmatprep.subr.bf16.mxu0 %v9322_v56 }
 0x541   :  { %8496 = vmatpush3.bf16.msra.mxu1 %v9067_v32 }
 0x542   :  { %8497 = vmatprep.subr.bf16.mxu1 %v9322_v56 }
 0x543   :  { %8478 = vmatpush3.bf16.msra.mxu0 %v9060_v27 }
 0x544   :  { %8479 = vmatprep.subr.bf16.mxu0 %v9322_v56 }
 0x545   :  { %8498 = vmatpush3.bf16.msra.mxu1 %v9068_v33 }
 0x546   :  { %8499 = vmatprep.subr.bf16.mxu1 %v9322_v56 }
 0x547   :  { %8480 = vmatpush3.bf16.msra.mxu0 %v9061_v28 }
 0x548   :  { %8481 = vmatprep.subr.bf16.mxu0 %v9322_v56 }
 0x549   :  { %8500 = vmatpush3.bf16.msra.mxu1 %v9069_v34 }
 0x54a   :  { %8501 = vmatprep.subr.bf16.mxu1 %v9322_v56 }
 0x54b   :  { %8482 = vmatpush3.bf16.msra.mxu0 %v9062_v37 }
 0x54c   :  { %8483 = vmatprep.subr.bf16.mxu0 %v9322_v56 }
 0x54d   :  { %8502 = vmatpush3.bf16.msra.mxu1 %v9070_v14 }
 0x54e   :  { %8503 = vmatprep.subr.bf16.mxu1 %v9322_v56 }
 0x54f   :  { %8484 = vmatpush3.bf16.msra.mxu0 %v9063_v46 }
 0x550   :  { %8485 = vmatprep.subr.bf16.mxu0 %v9322_v56 }
 0x551   :  { %8504 = vmatpush3.bf16.msra.mxu1 %v9071_v62 }
 0x552   :  { %8505 = vmatprep.subr.bf16.mxu1 %v9322_v56 }
 0x553   :  { %8486 = vmatpush3.bf16.msra.mxu0 %v9064_v29 }
 0x555   :  { %8506 = vmatpush3.bf16.msra.mxu1 %v9072_v63 }
 0x609   :  { %v8425_v51 = vpop.f32.mrb[12].mxu0  ;;  %v8447_v10 = vpop.f32.mrb[12].mxu1 }
 0x60a   :  { %v8426_v44 = vpop.f32.mrb[13].mxu0  ;;  %v8448_v38 = vpop.f32.mrb[13].mxu1 }
 0x60b   :  { %v8427_v39 = vadd.f32 %v8426_v44, %v8425_v51  ;;  %v8449_v55 = vadd.f32 %v8448_v38, %v8447_v10  ;;  %v8428_v40 = vpop.f32.mrb[14].mxu0  ;;  %v8450_v57 = vpop.f32.mrb[14].mxu1 }
 0x60c   :  { %v8429_v41 = vpop.f32.mrb[15].mxu0  ;;  %v8451_v42 = vpop.f32.mrb[15].mxu1 }
 0x60d   :  { %v7173_v48 = vadd.f32 %v8427_v39, %v8358_v35  ;;  %v8430_v45 = vadd.f32 %v8429_v41, %v8428_v40  ;;  %v8452_v47 = vadd.f32 %v8451_v42, %v8450_v57 }
 0x60f   :  { %v7214_v53 = vadd.f32 %v8449_v55, %v7173_v48  ;;  %v7176_v54 = vadd.f32 %v8430_v45, %v8358_v35 }
 0x611   :  { %v7217_v59 = vadd.f32 %v8452_v47, %v7176_v54  ;;  %v7220_v58 = vmax.f32 %v7214_v53, 0.0 }
 0x613   :  { %v7221_v60 = vmax.f32 %v7217_v59, 0.0 }
 0x615   :  { %v7222_v61 = vpack.c.bf16 %v7221_v60, %v7220_v58 }
 0x617   :  { %8488 = vmatmul.mubr.bf16.vlgmr.msra.gmra.mrb[16].mxu0 %v7222_v61 }
 0x6ea   :  { %v7328_v2 = vpop.f32.mrb[16].mxu0 }
 0x6eb   :  { %v7329_v3 = vadd.f32 %v8391_v1, %v7328_v2  ;;  %v8489_v15 = vpop.f32.mrb[17].mxu0 }
 0x6ec   :  { %v7331_v4 = vpop.f32.mrb[18].mxu0 }
 0x6ed   :  { %v7332_v5 = vadd.f32 %v8391_v1, %v7331_v4  ;;  %v8490_v6 = vpop.f32.mrb[19].mxu0  ;;  %v7335_v7 = vmax.f32 %v7329_v3, 0.0 }
 0x6ef   :  { %v7336_v8 = vmax.f32 %v7332_v5, 0.0 }
 0x6f1   :  { %v7337_v43 = vpack.c.bf16 %v7336_v8, %v7335_v7 }
 0x6f3   :  { %8508 = vmatmul.mubr.bf16.vlgmr.msra.gmra.mrb[16].mxu1 %v7337_v43 }
 0x7c6   :  { %v7443_v11 = vpop.f32.mrb[16].mxu1 }
 0x7c7   :  { %v7444_v49 = vadd.f32 %v8400_v9, %v7443_v11  ;;  %v8509_v12 = vpop.f32.mrb[17].mxu1 }
 0x7c8   :  { %v7446_v13 = vpop.f32.mrb[18].mxu1 }
 0x7c9   :  { %7450 = vst [vmem:[%s9714_s11] sm:$0xff] %v7444_v49  ;;  %v7447_v56 = vadd.f32 %v8400_v9, %v7446_v13  ;;  %v8510_v50 = vpop.f32.mrb[19].mxu1 }
 0x7cb   :  { %7451 = vst [vmem:[%s9714_s11 + $0x8] sm:$0xff] %v7447_v56 }
 0x7cc   :  { %7456 = vsyncpa [#allocation3], 1 }
 0x7cd   :  { %7457 = vsyncpa [#allocation5], 1 }
 0x7ce   :  { %7458 = vsyncpa [#allocation8], 1 }
 0x7cf   :  { %7459 = vsyncpa [#allocation11], 1 }
 0x7d0   :  { %7460 = vsyncpa [#allocation14], 1 }
 0x7d1   :  { %7461 = vsyncpa [#allocation17], 1 }

</bundles_post_ra>
